<compile_context>
chip_gen: v7x
topology: tpu7x:2x2x1
jax: 0.10.0
libtpu: 0.0.40
codegen_flags: <defaults>
</compile_context>

<pallas_src>
import functools

import numpy as np
import jax
import jax.numpy as jnp
from jax.experimental import pallas as pl
from jax.experimental.pallas import tpu as pltpu


# -----------------------------------------------------------------------------
# Small math helpers
# -----------------------------------------------------------------------------
def _gelu(x):
    c = 0.7978845608028654  # sqrt(2/pi), tanh-approx GELU (see TODO above)
    return 0.5 * x * (1.0 + jnp.tanh(c * (x + 0.044715 * x * x * x)))


# -----------------------------------------------------------------------------
# Static network layout: (name, out_ch, in_ch, ksize) for every conv, in
# execution order.  The two OC=1 output convs are merged into one OC=2 conv.
# -----------------------------------------------------------------------------
def _conv_layout(no_blocks=3):
    layout = [("input", 2, 2, 3)]
    for i in range(no_blocks):
        layout += [
            (f"rb{i}_skip", 2, 2, 1),
            (f"rb{i}_c1", 4, 2, 3),
            (f"rb{i}_c2", 4, 4, 3),
            (f"rb{i}_c3", 2, 4, 3),
        ]
    layout.append(("out", 2, 2, 3))
    return layout


def _conv_meta(no_blocks=3):
    """name -> (ksize, oc, ic, bias_row_offset, offset).

    For 3x3 convs, `offset` is the 8-row-aligned block index into the expanded
    weight table (one block of `oc` rows per input channel).  For 1x1 skip
    convs it is the skip slot index."""
    meta = {}
    blk = skip = b_off = 0
    for name, oc, ic, k in _conv_layout(no_blocks):
        if k == 3:
            meta[name] = (3, oc, ic, b_off, blk)
            blk += ic
        else:
            meta[name] = (1, oc, ic, b_off, skip)
            skip += 1
        b_off += oc
    return meta, blk, skip, b_off


def _build_shift_matrices(H, W):
    """S[t*HW + src, dst] = 1 iff `src` is the (valid, zero-padded) 3x3 tap `t`
    neighbour of `dst` in an (H, W) image flattened row-major to HW lanes.
    Built once on the host; the stacked operator gives the full conv receptive
    field in ONE (oc, 9*HW) @ (9*HW, HW) matmul inside the kernel."""
    HW = H * W
    dst = np.arange(HW)
    h, w = dst // W, dst % W
    mats = []
    for kh in range(3):
        for kw in range(3):
            dh, dw = kh - 1, kw - 1
            hh, ww = h + dh, w + dw
            valid = (hh >= 0) & (hh < H) & (ww >= 0) & (ww < W)
            src = hh * W + ww
            s = np.zeros((HW, HW), np.float32)
            s[src[valid], dst[valid]] = 1.0
            mats.append(s)
    return np.concatenate(mats, axis=0)  # (9*HW, HW)


# -----------------------------------------------------------------------------
# The fused kernel: whole CSINet forward for ONE batch element per grid step.
# Activation layout inside the kernel: (channels, HW) with HW on the lanes.
# -----------------------------------------------------------------------------
def _csinet_kernel(x_ref, wexp_ref, cb_ref, skw_ref, w1_ref, b1_ref,
                   w2_ref, b2_ref, s_ref, r_ref, o_ref, *,
                   HW, DF, meta, no_blocks):

    def conv3(x_in, name, act=False, skip=None):
        _, oc, ic, b_off, blk = meta[name]
        # replicate the HW lanes 9x (one copy per tap): (ic, 9*HW)
        xr = jnp.dot(x_in, r_ref[...], preferred_element_type=jnp.float32)
        # per-tap weights applied as VPU broadcast-FMAs -> Z (oc, 9*HW)
        z = wexp_ref[blk * 8:blk * 8 + oc, :] * xr[0:1, :]
        for i in range(1, ic):
            r0 = (blk + i) * 8
            z = z + wexp_ref[r0:r0 + oc, :] * xr[i:i + 1, :]
        # single MXU contraction over (tap, src) against the stacked shift op
        y = jnp.dot(z, s_ref[...], preferred_element_type=jnp.float32)
        y = y + cb_ref[b_off:b_off + oc, :]
        if skip is not None:
            y = y + skip
        return _gelu(y) if act else y

    def conv1(x_in, name):                                           # 1x1 skip
        _, oc, ic, b_off, idx = meta[name]
        w = skw_ref[idx * 8:idx * 8 + oc, 0:ic]                      # (oc, ic)
        return (jnp.dot(w, x_in, preferred_element_type=jnp.float32)
                + cb_ref[b_off:b_off + oc, :])

    h = x_ref[0]                                                     # (2, HW)

    # input conv (no activation in the reference model)
    h = conv3(h, "input")

    # dense encode / decode; flattened feature index = complex * HW + hw
    z = b1_ref[...]                                                  # (1, DF)
    for c in range(2):
        z = z + jnp.dot(h[c:c + 1, :], w1_ref[c * HW:(c + 1) * HW, :],
                        preferred_element_type=jnp.float32)
    r0 = jnp.dot(z, w2_ref[0:DF, :],
                 preferred_element_type=jnp.float32) + b2_ref[0:1, :]
    r1 = jnp.dot(z, w2_ref[DF:2 * DF, :],
                 preferred_element_type=jnp.float32) + b2_ref[1:2, :]
    rid = jax.lax.broadcasted_iota(jnp.int32, (2, 1), 0)
    h = jnp.where(rid == 0, r0, r1)                                  # (2, HW)

    # residual blocks:  GELU(conv3(GELU(conv2(GELU(conv1(x))))) + skip(x))
    for i in range(no_blocks):
        skip = conv1(h, f"rb{i}_skip")
        t1 = conv3(h, f"rb{i}_c1", act=True)
        t2 = conv3(t1, f"rb{i}_c2", act=True)
        h = conv3(t2, f"rb{i}_c3", act=True, skip=skip)

    # merged output convs: row 0 = real, row 1 = imag
    o_ref[0] = conv3(h, "out").astype(o_ref.dtype)


# -----------------------------------------------------------------------------
# Forward wrapper: one pallas_call, layout conversion only at the boundaries.
# -----------------------------------------------------------------------------
@functools.partial(jax.jit, static_argnames=("n_tx", "n_rx", "n_carrier", "no_blocks"))
def csinet_forward(x, packed, *, n_tx, n_rx, n_carrier, no_blocks=3):
    B = x.shape[0]
    HW = n_carrier * n_tx * n_rx
    DF = packed["w1"].shape[1]
    meta, _, _, _ = _conv_meta(no_blocks)

    # boundary rearrange: b ntx nrx c complex -> (b, complex, c*(ntx nrx))
    xin = x.transpose(0, 4, 3, 1, 2).reshape(B, 2, HW).astype(jnp.float32)

    kernel = functools.partial(_csinet_kernel, HW=HW, DF=DF,
                               meta=meta, no_blocks=no_blocks)

    def full(arr):
        nd = arr.ndim
        return pl.BlockSpec(arr.shape, lambda b: (0,) * nd)

    y = pl.pallas_call(
        kernel,
        out_shape=jax.ShapeDtypeStruct((B, 2, HW), jnp.float32),
        grid=(B,),
        in_specs=[
            pl.BlockSpec((1, 2, HW), lambda b: (b, 0, 0)),
            full(packed["wexp"]),
            full(packed["conv_b"]),
            full(packed["skw"]),
            full(packed["w1"]),
            full(packed["b1"]),
            full(packed["w2s"]),
            full(packed["b2s"]),
            full(packed["smat"]),
            full(packed["repmat"]),
        ],
        out_specs=pl.BlockSpec((1, 2, HW), lambda b: (b, 0, 0)),
        compiler_params=pltpu.CompilerParams(
            dimension_semantics=("parallel",)),
    )(xin, packed["wexp"], packed["conv_b"], packed["skw"], packed["w1"],
      packed["b1"], packed["w2s"], packed["b2s"], packed["smat"],
      packed["repmat"])

    # boundary rearrange: (b, complex, c, ntx, nrx) -> (b, nrx, ntx, c, complex)
    return y.reshape(B, 2, n_carrier, n_tx, n_rx).transpose(0, 4, 3, 2, 1)


# -----------------------------------------------------------------------------
# Parameter packing (host-side, once).
#  wexp:   expanded 3x3 weights, rows grouped per (conv, in_channel) in 8-row
#          aligned blocks; element [o, t*HW + q] = w[o, i, t] (constant in q).
#  skw:    1x1 skip conv weights, 8-row aligned blocks.
#  conv_b: all conv biases as a column vector.
#  smat:   stacked shift operator (9*HW, HW).
#  repmat: lane replication operator [I|I|...|I] (HW, 9*HW).
# -----------------------------------------------------------------------------
def pack_params(params, n_tx, n_rx, n_carrier, no_blocks=3):
    HW = n_carrier * n_tx * n_rx
    meta, n_blk, n_skip, n_brows = _conv_meta(no_blocks)

    convs = {
        "input": (params["input_conv_w"], params["input_conv_b"]),
        "out": (jnp.concatenate([params["oc1_w"], params["oc2_w"]], axis=0),
                jnp.concatenate([params["oc1_b"], params["oc2_b"]], axis=0)),
    }
    for i, rb in enumerate(params["resblocks"]):
        convs[f"rb{i}_skip"] = (rb["skip_w"], rb["skip_b"])
        convs[f"rb{i}_c1"] = (rb["w1"], rb["b1"])
        convs[f"rb{i}_c2"] = (rb["w2"], rb["b2"])
        convs[f"rb{i}_c3"] = (rb["w3"], rb["b3"])

    wexp = np.zeros((n_blk * 8, 9 * HW), np.float32)
    skw = np.zeros((n_skip * 8, 4), np.float32)
    cb = np.zeros((n_brows, 1), np.float32)
    for name, (w, b) in convs.items():
        k, oc, ic, b_off, off = meta[name]
        w = np.asarray(w, np.float32)
        cb[b_off:b_off + oc, 0] = np.asarray(b, np.float32)
        if k == 3:
            wt = w.reshape(oc, ic, 9).transpose(1, 0, 2)       # (ic, oc, 9)
            wt = np.repeat(wt, HW, axis=-1)                    # (ic, oc, 9*HW)
            for i in range(ic):
                r0 = (off + i) * 8
                wexp[r0:r0 + oc, :] = wt[i]
        else:                                                  # 1x1 skip conv
            skw[off * 8:off * 8 + oc, :ic] = w.reshape(oc, ic)

    w1 = np.asarray(params["in_dense_w"], np.float32)          # (2*HW, DF)
    b1 = np.asarray(params["in_dense_b"], np.float32).reshape(1, -1)
    w2 = np.asarray(params["out_dense_w"], np.float32)         # (DF, 2*HW)
    w2s = np.concatenate([w2[:, :HW], w2[:, HW:]], axis=0)     # (2*DF, HW)
    b2s = np.asarray(params["out_dense_b"], np.float32).reshape(2, HW)

    smat = _build_shift_matrices(n_carrier, n_tx * n_rx)       # (9*HW, HW)
    repmat = np.tile(np.eye(HW, dtype=np.float32), (1, 9))     # (HW, 9*HW)

    host = dict(wexp=wexp, conv_b=cb, skw=skw, w1=w1, b1=b1, w2s=w2s,
                b2s=b2s, smat=smat, repmat=repmat)
    return {k: jnp.asarray(v) for k, v in host.items()}


# -----------------------------------------------------------------------------
# Deterministic synthetic parameters (BN folded into the preceding conv)
# -----------------------------------------------------------------------------
def init_params(key, dim_feedback, n_tx, n_rx, n_carrier, no_blocks=3):
    nant = n_tx * n_rx
    feat = 2 * n_carrier * nant
    keys = iter(jax.random.split(key, 128))

    def nrm(shape, scale=0.1):
        return scale * jax.random.normal(next(keys), shape, jnp.float32)

    def fold_bn(w, b, oc):
        gamma = 1.0 + nrm((oc,))
        beta = nrm((oc,))
        mean = nrm((oc,))
        var = 0.9 + 0.1 * jnp.abs(jax.random.normal(next(keys), (oc,), jnp.float32))
        scale = gamma * jax.lax.rsqrt(var + 1e-5)
        return w * scale[:, None, None, None], (b - mean) * scale + beta

    p = {
        "input_conv_w": nrm((2, 2, 3, 3)),
        "input_conv_b": nrm((2,)),
        "in_dense_w": nrm((feat, dim_feedback)),
        "in_dense_b": nrm((dim_feedback,)),
        "out_dense_w": nrm((dim_feedback, feat)),
        "out_dense_b": nrm((feat,)),
        "oc1_w": nrm((1, 2, 3, 3)),
        "oc1_b": nrm((1,)),
        "oc2_w": nrm((1, 2, 3, 3)),
        "oc2_b": nrm((1,)),
    }
    rbs = []
    for _ in range(no_blocks):
        rb = {}
        rb["w1"], rb["b1"] = fold_bn(nrm((4, 2, 3, 3)), nrm((4,)), 4)
        rb["w2"], rb["b2"] = fold_bn(nrm((4, 4, 3, 3)), nrm((4,)), 4)
        rb["w3"], rb["b3"] = fold_bn(nrm((2, 4, 3, 3)), nrm((2,)), 2)
        rb["skip_w"] = nrm((2, 2, 1, 1))
        rb["skip_b"] = nrm((2,))
        rbs.append(rb)
    p["resblocks"] = rbs
    return p


# -----------------------------------------------------------------------------
# Pure-JAX (XLA) reference of the same forward pass, for a numeric check
# -----------------------------------------------------------------------------
def _conv2d_ref(x, w, b):
    y = jax.lax.conv_general_dilated(
        x, w, window_strides=(1, 1), padding="SAME",
        dimension_numbers=("NCHW", "OIHW", "NCHW"),
        precision=jax.lax.Precision.HIGHEST)
    return y + b[None, :, None, None]


def csinet_reference(x, params, n_tx, n_rx, n_carrier):
    B = x.shape[0]
    nant = n_tx * n_rx
    c = n_carrier
    hp = jax.lax.Precision.HIGHEST
    h = x.transpose(0, 4, 3, 1, 2).reshape(B, 2, c, nant).astype(jnp.float32)
    h = _conv2d_ref(h, params["input_conv_w"], params["input_conv_b"])
    h = h.reshape(B, 2 * c * nant)
    h = jnp.dot(h, params["in_dense_w"], precision=hp) + params["in_dense_b"]
    h = jnp.dot(h, params["out_dense_w"], precision=hp) + params["out_dense_b"]
    h = h.reshape(B, 2, c, nant)
    for rb in params["resblocks"]:
        skip = _conv2d_ref(h, rb["skip_w"], rb["skip_b"])
        t = _gelu(_conv2d_ref(h, rb["w1"], rb["b1"]))
        t = _gelu(_conv2d_ref(t, rb["w2"], rb["b2"]))
        h = _gelu(_conv2d_ref(t, rb["w3"], rb["b3"]) + skip)
    real = _conv2d_ref(h, params["oc1_w"], params["oc1_b"])
    imag = _conv2d_ref(h, params["oc2_w"], params["oc2_b"])
    out = jnp.stack([real[:, 0], imag[:, 0]], axis=-1)              # (B, c, nant, 2)
    out = out.reshape(B, c, n_tx, n_rx, 2).transpose(0, 3, 2, 1, 4)
    return out


# -----------------------------------------------------------------------------
# Main
# -----------------------------------------------------------------------------
if __name__ == "__main__":
    # CSINet(dim_feedback=32, n_tx=2, n_rx=2, n_carrier=16, no_blocks=3)
    dim_feedback, n_tx, n_rx, n_carrier, no_blocks = 32, 2, 2, 16, 3
    batch = 2

    key = jax.random.PRNGKey(0)
    k_in, k_par = jax.random.split(key)
    x = jax.random.normal(k_in, (batch, n_tx, n_rx, n_carrier, 2), jnp.float32)
    params = init_params(k_par, dim_feedback, n_tx, n_rx, n_carrier, no_blocks)
    packed = pack_params(params, n_tx, n_rx, n_carrier, no_blocks)

    out = csinet_forward(x, packed, n_tx=n_tx, n_rx=n_rx,
                         n_carrier=n_carrier, no_blocks=no_blocks)
    out = jax.block_until_ready(out)

    assert out.shape == (batch, n_rx, n_tx, n_carrier, 2), out.shape
    assert bool(jnp.all(jnp.isfinite(out)))

    # numeric check against the pure-JAX reference of the same forward pass
    ref = csinet_reference(x, params, n_tx, n_rx, n_carrier)
    np.testing.assert_allclose(np.asarray(out), np.asarray(ref),
                               rtol=2e-2, atol=2e-2)

    print("KERNEL_OK")
</pallas_src>

<mosaic_0001>
module attributes {stable_mosaic.version = 11 : i64} {
  func.func @_csinet_kernel(%arg0: i32, %arg1: memref<1x2x64xf32, #tpu.memory_space<vmem>>, %arg2: memref<272x576xf32, #tpu.memory_space<vmem>>, %arg3: memref<40x1xf32, #tpu.memory_space<vmem>>, %arg4: memref<24x4xf32, #tpu.memory_space<vmem>>, %arg5: memref<128x32xf32, #tpu.memory_space<vmem>>, %arg6: memref<1x32xf32, #tpu.memory_space<vmem>>, %arg7: memref<64x64xf32, #tpu.memory_space<vmem>>, %arg8: memref<2x64xf32, #tpu.memory_space<vmem>>, %arg9: memref<576x64xf32, #tpu.memory_space<vmem>>, %arg10: memref<64x576xf32, #tpu.memory_space<vmem>>, %arg11: memref<1x2x64xf32, #tpu.memory_space<vmem>>) attributes {dimension_semantics = [#tpu.dimension_semantics<parallel>], iteration_bounds = array<i64: 2>, scalar_prefetch = 0 : i64, scratch_operands = 0 : i64, tpu.core_type = #tpu.core_type<tc>, window_params = [{transform_indices = @transform_0, window_bounds = array<i64: 1, 2, 64>}, {pipeline_mode = #tpu.pipeline_mode<synchronous>, transform_indices = @transform_1, window_bounds = array<i64: 272, 576>}, {pipeline_mode = #tpu.pipeline_mode<synchronous>, transform_indices = @transform_2, window_bounds = array<i64: 40, 1>}, {pipeline_mode = #tpu.pipeline_mode<synchronous>, transform_indices = @transform_3, window_bounds = array<i64: 24, 4>}, {pipeline_mode = #tpu.pipeline_mode<synchronous>, transform_indices = @transform_4, window_bounds = array<i64: 128, 32>}, {pipeline_mode = #tpu.pipeline_mode<synchronous>, transform_indices = @transform_5, window_bounds = array<i64: 1, 32>}, {pipeline_mode = #tpu.pipeline_mode<synchronous>, transform_indices = @transform_6, window_bounds = array<i64: 64, 64>}, {pipeline_mode = #tpu.pipeline_mode<synchronous>, transform_indices = @transform_7, window_bounds = array<i64: 2, 64>}, {pipeline_mode = #tpu.pipeline_mode<synchronous>, transform_indices = @transform_8, window_bounds = array<i64: 576, 64>}, {pipeline_mode = #tpu.pipeline_mode<synchronous>, transform_indices = @transform_9, window_bounds = array<i64: 64, 576>}, {transform_indices = @transform_10, window_bounds = array<i64: 1, 2, 64>}]} {
    %c0 = arith.constant 0 : index
    %c0_0 = arith.constant 0 : index
    %c0_1 = arith.constant 0 : index
    %0 = vector.load %arg1[%c0, %c0_0, %c0_1] : memref<1x2x64xf32, #tpu.memory_space<vmem>>, vector<1x2x64xf32>
    %1 = vector.shape_cast %0 : vector<1x2x64xf32> to vector<2x64xf32>
    %c0_2 = arith.constant 0 : index
    %c0_3 = arith.constant 0 : index
    %2 = vector.load %arg10[%c0_2, %c0_3] : memref<64x576xf32, #tpu.memory_space<vmem>>, vector<64x576xf32>
    %cst = arith.constant dense<0.000000e+00> : vector<2x576xf32>
    %3 = tpu.matmul %1, %2, %cst {dimension_numbers = #tpu.dot_dimension_numbers<[1], [0], [0], [1], [0, 0, 1, 1], [], []>} : vector<2x64xf32>, vector<64x576xf32>, vector<2x576xf32> -> vector<2x576xf32>
    %c0_4 = arith.constant 0 : index
    %c0_5 = arith.constant 0 : index
    %4 = vector.load %arg2[%c0_4, %c0_5] : memref<272x576xf32, #tpu.memory_space<vmem>>, vector<2x576xf32>
    %5 = vector.extract_strided_slice %3 {offsets = [0, 0], sizes = [1, 576], strides = [1, 1]} : vector<2x576xf32> to vector<1x576xf32>
    %6 = vector.broadcast %5 : vector<1x576xf32> to vector<2x576xf32>
    %7 = arith.mulf %4, %6 : vector<2x576xf32>
    %c8 = arith.constant 8 : index
    %c0_6 = arith.constant 0 : index
    %8 = vector.load %arg2[%c8, %c0_6] : memref<272x576xf32, #tpu.memory_space<vmem>>, vector<2x576xf32>
    %9 = vector.extract_strided_slice %3 {offsets = [1, 0], sizes = [1, 576], strides = [1, 1]} : vector<2x576xf32> to vector<1x576xf32>
    %10 = vector.broadcast %9 : vector<1x576xf32> to vector<2x576xf32>
    %11 = arith.mulf %8, %10 : vector<2x576xf32>
    %12 = arith.addf %7, %11 : vector<2x576xf32>
    %c0_7 = arith.constant 0 : index
    %c0_8 = arith.constant 0 : index
    %13 = vector.load %arg9[%c0_7, %c0_8] : memref<576x64xf32, #tpu.memory_space<vmem>>, vector<576x64xf32>
    %cst_9 = arith.constant dense<0.000000e+00> : vector<2x64xf32>
    %14 = tpu.matmul %12, %13, %cst_9 {dimension_numbers = #tpu.dot_dimension_numbers<[1], [0], [0], [1], [0, 0, 1, 1], [], []>} : vector<2x576xf32>, vector<576x64xf32>, vector<2x64xf32> -> vector<2x64xf32>
    %c0_10 = arith.constant 0 : index
    %c0_11 = arith.constant 0 : index
    %15 = vector.load %arg3[%c0_10, %c0_11] : memref<40x1xf32, #tpu.memory_space<vmem>>, vector<2x1xf32>
    %16 = vector.broadcast %15 : vector<2x1xf32> to vector<2x64xf32>
    %17 = arith.addf %14, %16 : vector<2x64xf32>
    %c0_12 = arith.constant 0 : index
    %c0_13 = arith.constant 0 : index
    %18 = vector.load %arg6[%c0_12, %c0_13] : memref<1x32xf32, #tpu.memory_space<vmem>>, vector<1x32xf32>
    %19 = vector.extract_strided_slice %17 {offsets = [0, 0], sizes = [1, 64], strides = [1, 1]} : vector<2x64xf32> to vector<1x64xf32>
    %c0_14 = arith.constant 0 : index
    %c0_15 = arith.constant 0 : index
    %20 = vector.load %arg5[%c0_14, %c0_15] : memref<128x32xf32, #tpu.memory_space<vmem>>, vector<64x32xf32>
    %cst_16 = arith.constant dense<0.000000e+00> : vector<1x32xf32>
    %21 = tpu.matmul %19, %20, %cst_16 {dimension_numbers = #tpu.dot_dimension_numbers<[1], [0], [0], [1], [0, 0, 1, 1], [], []>} : vector<1x64xf32>, vector<64x32xf32>, vector<1x32xf32> -> vector<1x32xf32>
    %22 = arith.addf %18, %21 : vector<1x32xf32>
    %23 = vector.extract_strided_slice %17 {offsets = [1, 0], sizes = [1, 64], strides = [1, 1]} : vector<2x64xf32> to vector<1x64xf32>
    %c64 = arith.constant 64 : index
    %c0_17 = arith.constant 0 : index
    %24 = vector.load %arg5[%c64, %c0_17] : memref<128x32xf32, #tpu.memory_space<vmem>>, vector<64x32xf32>
    %cst_18 = arith.constant dense<0.000000e+00> : vector<1x32xf32>
    %25 = tpu.matmul %23, %24, %cst_18 {dimension_numbers = #tpu.dot_dimension_numbers<[1], [0], [0], [1], [0, 0, 1, 1], [], []>} : vector<1x64xf32>, vector<64x32xf32>, vector<1x32xf32> -> vector<1x32xf32>
    %26 = arith.addf %22, %25 : vector<1x32xf32>
    %c0_19 = arith.constant 0 : index
    %c0_20 = arith.constant 0 : index
    %27 = vector.load %arg7[%c0_19, %c0_20] : memref<64x64xf32, #tpu.memory_space<vmem>>, vector<32x64xf32>
    %cst_21 = arith.constant dense<0.000000e+00> : vector<1x64xf32>
    %28 = tpu.matmul %26, %27, %cst_21 {dimension_numbers = #tpu.dot_dimension_numbers<[1], [0], [0], [1], [0, 0, 1, 1], [], []>} : vector<1x32xf32>, vector<32x64xf32>, vector<1x64xf32> -> vector<1x64xf32>
    %c0_22 = arith.constant 0 : index
    %c0_23 = arith.constant 0 : index
    %29 = vector.load %arg8[%c0_22, %c0_23] : memref<2x64xf32, #tpu.memory_space<vmem>>, vector<1x64xf32>
    %30 = arith.addf %28, %29 : vector<1x64xf32>
    %c32 = arith.constant 32 : index
    %c0_24 = arith.constant 0 : index
    %31 = vector.load %arg7[%c32, %c0_24] : memref<64x64xf32, #tpu.memory_space<vmem>>, vector<32x64xf32>
    %cst_25 = arith.constant dense<0.000000e+00> : vector<1x64xf32>
    %32 = tpu.matmul %26, %31, %cst_25 {dimension_numbers = #tpu.dot_dimension_numbers<[1], [0], [0], [1], [0, 0, 1, 1], [], []>} : vector<1x32xf32>, vector<32x64xf32>, vector<1x64xf32> -> vector<1x64xf32>
    %c1 = arith.constant 1 : index
    %c0_26 = arith.constant 0 : index
    %33 = vector.load %arg8[%c1, %c0_26] : memref<2x64xf32, #tpu.memory_space<vmem>>, vector<1x64xf32>
    %34 = arith.addf %32, %33 : vector<1x64xf32>
    %35 = tpu.iota {dimensions = array<i32: 0>} : vector<2x1xi32>
    %c0_i32 = arith.constant 0 : i32
    %36 = vector.broadcast %c0_i32 : i32 to vector<2x1xi32>
    %37 = arith.cmpi eq, %35, %36 : vector<2x1xi32>
    %38 = vector.shape_cast %37 : vector<2x1xi1> to vector<2x1xi1>
    %39 = vector.broadcast %38 : vector<2x1xi1> to vector<2x64xi1>
    %40 = vector.shape_cast %30 : vector<1x64xf32> to vector<1x64xf32>
    %41 = vector.broadcast %40 : vector<1x64xf32> to vector<2x64xf32>
    %42 = vector.shape_cast %34 : vector<1x64xf32> to vector<1x64xf32>
    %43 = vector.broadcast %42 : vector<1x64xf32> to vector<2x64xf32>
    %44 = arith.select %39, %41, %43 : vector<2x64xi1>, vector<2x64xf32>
    %c0_27 = arith.constant 0 : index
    %c0_28 = arith.constant 0 : index
    %45 = vector.load %arg4[%c0_27, %c0_28] : memref<24x4xf32, #tpu.memory_space<vmem>>, vector<2x2xf32>
    %cst_29 = arith.constant dense<0.000000e+00> : vector<2x64xf32>
    %46 = tpu.matmul %45, %44, %cst_29 {dimension_numbers = #tpu.dot_dimension_numbers<[1], [0], [0], [1], [0, 0, 1, 1], [], []>} : vector<2x2xf32>, vector<2x64xf32>, vector<2x64xf32> -> vector<2x64xf32>
    %c2 = arith.constant 2 : index
    %c0_30 = arith.constant 0 : index
    %47 = vector.load %arg3[%c2, %c0_30] : memref<40x1xf32, #tpu.memory_space<vmem>>, vector<2x1xf32>
    %48 = vector.broadcast %47 : vector<2x1xf32> to vector<2x64xf32>
    %49 = arith.addf %46, %48 : vector<2x64xf32>
    %c0_31 = arith.constant 0 : index
    %c0_32 = arith.constant 0 : index
    %50 = vector.load %arg10[%c0_31, %c0_32] : memref<64x576xf32, #tpu.memory_space<vmem>>, vector<64x576xf32>
    %cst_33 = arith.constant dense<0.000000e+00> : vector<2x576xf32>
    %51 = tpu.matmul %44, %50, %cst_33 {dimension_numbers = #tpu.dot_dimension_numbers<[1], [0], [0], [1], [0, 0, 1, 1], [], []>} : vector<2x64xf32>, vector<64x576xf32>, vector<2x576xf32> -> vector<2x576xf32>
    %c16 = arith.constant 16 : index
    %c0_34 = arith.constant 0 : index
    %52 = vector.load %arg2[%c16, %c0_34] : memref<272x576xf32, #tpu.memory_space<vmem>>, vector<4x576xf32>
    %53 = vector.extract_strided_slice %51 {offsets = [0, 0], sizes = [1, 576], strides = [1, 1]} : vector<2x576xf32> to vector<1x576xf32>
    %54 = vector.broadcast %53 : vector<1x576xf32> to vector<4x576xf32>
    %55 = arith.mulf %52, %54 : vector<4x576xf32>
    %c24 = arith.constant 24 : index
    %c0_35 = arith.constant 0 : index
    %56 = vector.load %arg2[%c24, %c0_35] : memref<272x576xf32, #tpu.memory_space<vmem>>, vector<4x576xf32>
    %57 = vector.extract_strided_slice %51 {offsets = [1, 0], sizes = [1, 576], strides = [1, 1]} : vector<2x576xf32> to vector<1x576xf32>
    %58 = vector.broadcast %57 : vector<1x576xf32> to vector<4x576xf32>
    %59 = arith.mulf %56, %58 : vector<4x576xf32>
    %60 = arith.addf %55, %59 : vector<4x576xf32>
    %c0_36 = arith.constant 0 : index
    %c0_37 = arith.constant 0 : index
    %61 = vector.load %arg9[%c0_36, %c0_37] : memref<576x64xf32, #tpu.memory_space<vmem>>, vector<576x64xf32>
    %cst_38 = arith.constant dense<0.000000e+00> : vector<4x64xf32>
    %62 = tpu.matmul %60, %61, %cst_38 {dimension_numbers = #tpu.dot_dimension_numbers<[1], [0], [0], [1], [0, 0, 1, 1], [], []>} : vector<4x576xf32>, vector<576x64xf32>, vector<4x64xf32> -> vector<4x64xf32>
    %c4 = arith.constant 4 : index
    %c0_39 = arith.constant 0 : index
    %63 = vector.load %arg3[%c4, %c0_39] : memref<40x1xf32, #tpu.memory_space<vmem>>, vector<4x1xf32>
    %64 = vector.broadcast %63 : vector<4x1xf32> to vector<4x64xf32>
    %65 = arith.addf %62, %64 : vector<4x64xf32>
    %cst_40 = arith.constant 5.000000e-01 : f32
    %66 = vector.broadcast %cst_40 : f32 to vector<4x64xf32>
    %67 = arith.mulf %66, %65 : vector<4x64xf32>
    %cst_41 = arith.constant 4.471500e-02 : f32
    %68 = vector.broadcast %cst_41 : f32 to vector<4x64xf32>
    %69 = arith.mulf %68, %65 : vector<4x64xf32>
    %70 = arith.mulf %69, %65 : vector<4x64xf32>
    %71 = arith.mulf %70, %65 : vector<4x64xf32>
    %72 = arith.addf %65, %71 : vector<4x64xf32>
    %cst_42 = arith.constant 0.797884583 : f32
    %73 = vector.broadcast %cst_42 : f32 to vector<4x64xf32>
    %74 = arith.mulf %73, %72 : vector<4x64xf32>
    %75 = math.tanh %74 : vector<4x64xf32>
    %cst_43 = arith.constant 1.000000e+00 : f32
    %76 = vector.broadcast %cst_43 : f32 to vector<4x64xf32>
    %77 = arith.addf %76, %75 : vector<4x64xf32>
    %78 = arith.mulf %67, %77 : vector<4x64xf32>
    %c0_44 = arith.constant 0 : index
    %c0_45 = arith.constant 0 : index
    %79 = vector.load %arg10[%c0_44, %c0_45] : memref<64x576xf32, #tpu.memory_space<vmem>>, vector<64x576xf32>
    %cst_46 = arith.constant dense<0.000000e+00> : vector<4x576xf32>
    %80 = tpu.matmul %78, %79, %cst_46 {dimension_numbers = #tpu.dot_dimension_numbers<[1], [0], [0], [1], [0, 0, 1, 1], [], []>} : vector<4x64xf32>, vector<64x576xf32>, vector<4x576xf32> -> vector<4x576xf32>
    %c32_47 = arith.constant 32 : index
    %c0_48 = arith.constant 0 : index
    %81 = vector.load %arg2[%c32_47, %c0_48] : memref<272x576xf32, #tpu.memory_space<vmem>>, vector<4x576xf32>
    %82 = vector.extract_strided_slice %80 {offsets = [0, 0], sizes = [1, 576], strides = [1, 1]} : vector<4x576xf32> to vector<1x576xf32>
    %83 = vector.broadcast %82 : vector<1x576xf32> to vector<4x576xf32>
    %84 = arith.mulf %81, %83 : vector<4x576xf32>
    %c40 = arith.constant 40 : index
    %c0_49 = arith.constant 0 : index
    %85 = vector.load %arg2[%c40, %c0_49] : memref<272x576xf32, #tpu.memory_space<vmem>>, vector<4x576xf32>
    %86 = vector.extract_strided_slice %80 {offsets = [1, 0], sizes = [1, 576], strides = [1, 1]} : vector<4x576xf32> to vector<1x576xf32>
    %87 = vector.broadcast %86 : vector<1x576xf32> to vector<4x576xf32>
    %88 = arith.mulf %85, %87 : vector<4x576xf32>
    %89 = arith.addf %84, %88 : vector<4x576xf32>
    %c48 = arith.constant 48 : index
    %c0_50 = arith.constant 0 : index
    %90 = vector.load %arg2[%c48, %c0_50] : memref<272x576xf32, #tpu.memory_space<vmem>>, vector<4x576xf32>
    %91 = vector.extract_strided_slice %80 {offsets = [2, 0], sizes = [1, 576], strides = [1, 1]} : vector<4x576xf32> to vector<1x576xf32>
    %92 = vector.broadcast %91 : vector<1x576xf32> to vector<4x576xf32>
    %93 = arith.mulf %90, %92 : vector<4x576xf32>
    %94 = arith.addf %89, %93 : vector<4x576xf32>
    %c56 = arith.constant 56 : index
    %c0_51 = arith.constant 0 : index
    %95 = vector.load %arg2[%c56, %c0_51] : memref<272x576xf32, #tpu.memory_space<vmem>>, vector<4x576xf32>
    %96 = vector.extract_strided_slice %80 {offsets = [3, 0], sizes = [1, 576], strides = [1, 1]} : vector<4x576xf32> to vector<1x576xf32>
    %97 = vector.broadcast %96 : vector<1x576xf32> to vector<4x576xf32>
    %98 = arith.mulf %95, %97 : vector<4x576xf32>
    %99 = arith.addf %94, %98 : vector<4x576xf32>
    %c0_52 = arith.constant 0 : index
    %c0_53 = arith.constant 0 : index
    %100 = vector.load %arg9[%c0_52, %c0_53] : memref<576x64xf32, #tpu.memory_space<vmem>>, vector<576x64xf32>
    %cst_54 = arith.constant dense<0.000000e+00> : vector<4x64xf32>
    %101 = tpu.matmul %99, %100, %cst_54 {dimension_numbers = #tpu.dot_dimension_numbers<[1], [0], [0], [1], [0, 0, 1, 1], [], []>} : vector<4x576xf32>, vector<576x64xf32>, vector<4x64xf32> -> vector<4x64xf32>
    %c8_55 = arith.constant 8 : index
    %c0_56 = arith.constant 0 : index
    %102 = vector.load %arg3[%c8_55, %c0_56] : memref<40x1xf32, #tpu.memory_space<vmem>>, vector<4x1xf32>
    %103 = vector.broadcast %102 : vector<4x1xf32> to vector<4x64xf32>
    %104 = arith.addf %101, %103 : vector<4x64xf32>
    %cst_57 = arith.constant 5.000000e-01 : f32
    %105 = vector.broadcast %cst_57 : f32 to vector<4x64xf32>
    %106 = arith.mulf %105, %104 : vector<4x64xf32>
    %cst_58 = arith.constant 4.471500e-02 : f32
    %107 = vector.broadcast %cst_58 : f32 to vector<4x64xf32>
    %108 = arith.mulf %107, %104 : vector<4x64xf32>
    %109 = arith.mulf %108, %104 : vector<4x64xf32>
    %110 = arith.mulf %109, %104 : vector<4x64xf32>
    %111 = arith.addf %104, %110 : vector<4x64xf32>
    %cst_59 = arith.constant 0.797884583 : f32
    %112 = vector.broadcast %cst_59 : f32 to vector<4x64xf32>
    %113 = arith.mulf %112, %111 : vector<4x64xf32>
    %114 = math.tanh %113 : vector<4x64xf32>
    %cst_60 = arith.constant 1.000000e+00 : f32
    %115 = vector.broadcast %cst_60 : f32 to vector<4x64xf32>
    %116 = arith.addf %115, %114 : vector<4x64xf32>
    %117 = arith.mulf %106, %116 : vector<4x64xf32>
    %c0_61 = arith.constant 0 : index
    %c0_62 = arith.constant 0 : index
    %118 = vector.load %arg10[%c0_61, %c0_62] : memref<64x576xf32, #tpu.memory_space<vmem>>, vector<64x576xf32>
    %cst_63 = arith.constant dense<0.000000e+00> : vector<4x576xf32>
    %119 = tpu.matmul %117, %118, %cst_63 {dimension_numbers = #tpu.dot_dimension_numbers<[1], [0], [0], [1], [0, 0, 1, 1], [], []>} : vector<4x64xf32>, vector<64x576xf32>, vector<4x576xf32> -> vector<4x576xf32>
    %c64_64 = arith.constant 64 : index
    %c0_65 = arith.constant 0 : index
    %120 = vector.load %arg2[%c64_64, %c0_65] : memref<272x576xf32, #tpu.memory_space<vmem>>, vector<2x576xf32>
    %121 = vector.extract_strided_slice %119 {offsets = [0, 0], sizes = [1, 576], strides = [1, 1]} : vector<4x576xf32> to vector<1x576xf32>
    %122 = vector.broadcast %121 : vector<1x576xf32> to vector<2x576xf32>
    %123 = arith.mulf %120, %122 : vector<2x576xf32>
    %c72 = arith.constant 72 : index
    %c0_66 = arith.constant 0 : index
    %124 = vector.load %arg2[%c72, %c0_66] : memref<272x576xf32, #tpu.memory_space<vmem>>, vector<2x576xf32>
    %125 = vector.extract_strided_slice %119 {offsets = [1, 0], sizes = [1, 576], strides = [1, 1]} : vector<4x576xf32> to vector<1x576xf32>
    %126 = vector.broadcast %125 : vector<1x576xf32> to vector<2x576xf32>
    %127 = arith.mulf %124, %126 : vector<2x576xf32>
    %128 = arith.addf %123, %127 : vector<2x576xf32>
    %c80 = arith.constant 80 : index
    %c0_67 = arith.constant 0 : index
    %129 = vector.load %arg2[%c80, %c0_67] : memref<272x576xf32, #tpu.memory_space<vmem>>, vector<2x576xf32>
    %130 = vector.extract_strided_slice %119 {offsets = [2, 0], sizes = [1, 576], strides = [1, 1]} : vector<4x576xf32> to vector<1x576xf32>
    %131 = vector.broadcast %130 : vector<1x576xf32> to vector<2x576xf32>
    %132 = arith.mulf %129, %131 : vector<2x576xf32>
    %133 = arith.addf %128, %132 : vector<2x576xf32>
    %c88 = arith.constant 88 : index
    %c0_68 = arith.constant 0 : index
    %134 = vector.load %arg2[%c88, %c0_68] : memref<272x576xf32, #tpu.memory_space<vmem>>, vector<2x576xf32>
    %135 = vector.extract_strided_slice %119 {offsets = [3, 0], sizes = [1, 576], strides = [1, 1]} : vector<4x576xf32> to vector<1x576xf32>
    %136 = vector.broadcast %135 : vector<1x576xf32> to vector<2x576xf32>
    %137 = arith.mulf %134, %136 : vector<2x576xf32>
    %138 = arith.addf %133, %137 : vector<2x576xf32>
    %c0_69 = arith.constant 0 : index
    %c0_70 = arith.constant 0 : index
    %139 = vector.load %arg9[%c0_69, %c0_70] : memref<576x64xf32, #tpu.memory_space<vmem>>, vector<576x64xf32>
    %cst_71 = arith.constant dense<0.000000e+00> : vector<2x64xf32>
    %140 = tpu.matmul %138, %139, %cst_71 {dimension_numbers = #tpu.dot_dimension_numbers<[1], [0], [0], [1], [0, 0, 1, 1], [], []>} : vector<2x576xf32>, vector<576x64xf32>, vector<2x64xf32> -> vector<2x64xf32>
    %c12 = arith.constant 12 : index
    %c0_72 = arith.constant 0 : index
    %141 = vector.load %arg3[%c12, %c0_72] : memref<40x1xf32, #tpu.memory_space<vmem>>, vector<2x1xf32>
    %142 = vector.broadcast %141 : vector<2x1xf32> to vector<2x64xf32>
    %143 = arith.addf %140, %142 : vector<2x64xf32>
    %144 = arith.addf %143, %49 : vector<2x64xf32>
    %cst_73 = arith.constant 5.000000e-01 : f32
    %145 = vector.broadcast %cst_73 : f32 to vector<2x64xf32>
    %146 = arith.mulf %145, %144 : vector<2x64xf32>
    %cst_74 = arith.constant 4.471500e-02 : f32
    %147 = vector.broadcast %cst_74 : f32 to vector<2x64xf32>
    %148 = arith.mulf %147, %144 : vector<2x64xf32>
    %149 = arith.mulf %148, %144 : vector<2x64xf32>
    %150 = arith.mulf %149, %144 : vector<2x64xf32>
    %151 = arith.addf %144, %150 : vector<2x64xf32>
    %cst_75 = arith.constant 0.797884583 : f32
    %152 = vector.broadcast %cst_75 : f32 to vector<2x64xf32>
    %153 = arith.mulf %152, %151 : vector<2x64xf32>
    %154 = math.tanh %153 : vector<2x64xf32>
    %cst_76 = arith.constant 1.000000e+00 : f32
    %155 = vector.broadcast %cst_76 : f32 to vector<2x64xf32>
    %156 = arith.addf %155, %154 : vector<2x64xf32>
    %157 = arith.mulf %146, %156 : vector<2x64xf32>
    %c8_77 = arith.constant 8 : index
    %c0_78 = arith.constant 0 : index
    %158 = vector.load %arg4[%c8_77, %c0_78] : memref<24x4xf32, #tpu.memory_space<vmem>>, vector<2x2xf32>
    %cst_79 = arith.constant dense<0.000000e+00> : vector<2x64xf32>
    %159 = tpu.matmul %158, %157, %cst_79 {dimension_numbers = #tpu.dot_dimension_numbers<[1], [0], [0], [1], [0, 0, 1, 1], [], []>} : vector<2x2xf32>, vector<2x64xf32>, vector<2x64xf32> -> vector<2x64xf32>
    %c14 = arith.constant 14 : index
    %c0_80 = arith.constant 0 : index
    %160 = vector.load %arg3[%c14, %c0_80] : memref<40x1xf32, #tpu.memory_space<vmem>>, vector<2x1xf32>
    %161 = vector.broadcast %160 : vector<2x1xf32> to vector<2x64xf32>
    %162 = arith.addf %159, %161 : vector<2x64xf32>
    %c0_81 = arith.constant 0 : index
    %c0_82 = arith.constant 0 : index
    %163 = vector.load %arg10[%c0_81, %c0_82] : memref<64x576xf32, #tpu.memory_space<vmem>>, vector<64x576xf32>
    %cst_83 = arith.constant dense<0.000000e+00> : vector<2x576xf32>
    %164 = tpu.matmul %157, %163, %cst_83 {dimension_numbers = #tpu.dot_dimension_numbers<[1], [0], [0], [1], [0, 0, 1, 1], [], []>} : vector<2x64xf32>, vector<64x576xf32>, vector<2x576xf32> -> vector<2x576xf32>
    %c96 = arith.constant 96 : index
    %c0_84 = arith.constant 0 : index
    %165 = vector.load %arg2[%c96, %c0_84] : memref<272x576xf32, #tpu.memory_space<vmem>>, vector<4x576xf32>
    %166 = vector.extract_strided_slice %164 {offsets = [0, 0], sizes = [1, 576], strides = [1, 1]} : vector<2x576xf32> to vector<1x576xf32>
    %167 = vector.broadcast %166 : vector<1x576xf32> to vector<4x576xf32>
    %168 = arith.mulf %165, %167 : vector<4x576xf32>
    %c104 = arith.constant 104 : index
    %c0_85 = arith.constant 0 : index
    %169 = vector.load %arg2[%c104, %c0_85] : memref<272x576xf32, #tpu.memory_space<vmem>>, vector<4x576xf32>
    %170 = vector.extract_strided_slice %164 {offsets = [1, 0], sizes = [1, 576], strides = [1, 1]} : vector<2x576xf32> to vector<1x576xf32>
    %171 = vector.broadcast %170 : vector<1x576xf32> to vector<4x576xf32>
    %172 = arith.mulf %169, %171 : vector<4x576xf32>
    %173 = arith.addf %168, %172 : vector<4x576xf32>
    %c0_86 = arith.constant 0 : index
    %c0_87 = arith.constant 0 : index
    %174 = vector.load %arg9[%c0_86, %c0_87] : memref<576x64xf32, #tpu.memory_space<vmem>>, vector<576x64xf32>
    %cst_88 = arith.constant dense<0.000000e+00> : vector<4x64xf32>
    %175 = tpu.matmul %173, %174, %cst_88 {dimension_numbers = #tpu.dot_dimension_numbers<[1], [0], [0], [1], [0, 0, 1, 1], [], []>} : vector<4x576xf32>, vector<576x64xf32>, vector<4x64xf32> -> vector<4x64xf32>
    %c16_89 = arith.constant 16 : index
    %c0_90 = arith.constant 0 : index
    %176 = vector.load %arg3[%c16_89, %c0_90] : memref<40x1xf32, #tpu.memory_space<vmem>>, vector<4x1xf32>
    %177 = vector.broadcast %176 : vector<4x1xf32> to vector<4x64xf32>
    %178 = arith.addf %175, %177 : vector<4x64xf32>
    %cst_91 = arith.constant 5.000000e-01 : f32
    %179 = vector.broadcast %cst_91 : f32 to vector<4x64xf32>
    %180 = arith.mulf %179, %178 : vector<4x64xf32>
    %cst_92 = arith.constant 4.471500e-02 : f32
    %181 = vector.broadcast %cst_92 : f32 to vector<4x64xf32>
    %182 = arith.mulf %181, %178 : vector<4x64xf32>
    %183 = arith.mulf %182, %178 : vector<4x64xf32>
    %184 = arith.mulf %183, %178 : vector<4x64xf32>
    %185 = arith.addf %178, %184 : vector<4x64xf32>
    %cst_93 = arith.constant 0.797884583 : f32
    %186 = vector.broadcast %cst_93 : f32 to vector<4x64xf32>
    %187 = arith.mulf %186, %185 : vector<4x64xf32>
    %188 = math.tanh %187 : vector<4x64xf32>
    %cst_94 = arith.constant 1.000000e+00 : f32
    %189 = vector.broadcast %cst_94 : f32 to vector<4x64xf32>
    %190 = arith.addf %189, %188 : vector<4x64xf32>
    %191 = arith.mulf %180, %190 : vector<4x64xf32>
    %c0_95 = arith.constant 0 : index
    %c0_96 = arith.constant 0 : index
    %192 = vector.load %arg10[%c0_95, %c0_96] : memref<64x576xf32, #tpu.memory_space<vmem>>, vector<64x576xf32>
    %cst_97 = arith.constant dense<0.000000e+00> : vector<4x576xf32>
    %193 = tpu.matmul %191, %192, %cst_97 {dimension_numbers = #tpu.dot_dimension_numbers<[1], [0], [0], [1], [0, 0, 1, 1], [], []>} : vector<4x64xf32>, vector<64x576xf32>, vector<4x576xf32> -> vector<4x576xf32>
    %c112 = arith.constant 112 : index
    %c0_98 = arith.constant 0 : index
    %194 = vector.load %arg2[%c112, %c0_98] : memref<272x576xf32, #tpu.memory_space<vmem>>, vector<4x576xf32>
    %195 = vector.extract_strided_slice %193 {offsets = [0, 0], sizes = [1, 576], strides = [1, 1]} : vector<4x576xf32> to vector<1x576xf32>
    %196 = vector.broadcast %195 : vector<1x576xf32> to vector<4x576xf32>
    %197 = arith.mulf %194, %196 : vector<4x576xf32>
    %c120 = arith.constant 120 : index
    %c0_99 = arith.constant 0 : index
    %198 = vector.load %arg2[%c120, %c0_99] : memref<272x576xf32, #tpu.memory_space<vmem>>, vector<4x576xf32>
    %199 = vector.extract_strided_slice %193 {offsets = [1, 0], sizes = [1, 576], strides = [1, 1]} : vector<4x576xf32> to vector<1x576xf32>
    %200 = vector.broadcast %199 : vector<1x576xf32> to vector<4x576xf32>
    %201 = arith.mulf %198, %200 : vector<4x576xf32>
    %202 = arith.addf %197, %201 : vector<4x576xf32>
    %c128 = arith.constant 128 : index
    %c0_100 = arith.constant 0 : index
    %203 = vector.load %arg2[%c128, %c0_100] : memref<272x576xf32, #tpu.memory_space<vmem>>, vector<4x576xf32>
    %204 = vector.extract_strided_slice %193 {offsets = [2, 0], sizes = [1, 576], strides = [1, 1]} : vector<4x576xf32> to vector<1x576xf32>
    %205 = vector.broadcast %204 : vector<1x576xf32> to vector<4x576xf32>
    %206 = arith.mulf %203, %205 : vector<4x576xf32>
    %207 = arith.addf %202, %206 : vector<4x576xf32>
    %c136 = arith.constant 136 : index
    %c0_101 = arith.constant 0 : index
    %208 = vector.load %arg2[%c136, %c0_101] : memref<272x576xf32, #tpu.memory_space<vmem>>, vector<4x576xf32>
    %209 = vector.extract_strided_slice %193 {offsets = [3, 0], sizes = [1, 576], strides = [1, 1]} : vector<4x576xf32> to vector<1x576xf32>
    %210 = vector.broadcast %209 : vector<1x576xf32> to vector<4x576xf32>
    %211 = arith.mulf %208, %210 : vector<4x576xf32>
    %212 = arith.addf %207, %211 : vector<4x576xf32>
    %c0_102 = arith.constant 0 : index
    %c0_103 = arith.constant 0 : index
    %213 = vector.load %arg9[%c0_102, %c0_103] : memref<576x64xf32, #tpu.memory_space<vmem>>, vector<576x64xf32>
    %cst_104 = arith.constant dense<0.000000e+00> : vector<4x64xf32>
    %214 = tpu.matmul %212, %213, %cst_104 {dimension_numbers = #tpu.dot_dimension_numbers<[1], [0], [0], [1], [0, 0, 1, 1], [], []>} : vector<4x576xf32>, vector<576x64xf32>, vector<4x64xf32> -> vector<4x64xf32>
    %c20 = arith.constant 20 : index
    %c0_105 = arith.constant 0 : index
    %215 = vector.load %arg3[%c20, %c0_105] : memref<40x1xf32, #tpu.memory_space<vmem>>, vector<4x1xf32>
    %216 = vector.broadcast %215 : vector<4x1xf32> to vector<4x64xf32>
    %217 = arith.addf %214, %216 : vector<4x64xf32>
    %cst_106 = arith.constant 5.000000e-01 : f32
    %218 = vector.broadcast %cst_106 : f32 to vector<4x64xf32>
    %219 = arith.mulf %218, %217 : vector<4x64xf32>
    %cst_107 = arith.constant 4.471500e-02 : f32
    %220 = vector.broadcast %cst_107 : f32 to vector<4x64xf32>
    %221 = arith.mulf %220, %217 : vector<4x64xf32>
    %222 = arith.mulf %221, %217 : vector<4x64xf32>
    %223 = arith.mulf %222, %217 : vector<4x64xf32>
    %224 = arith.addf %217, %223 : vector<4x64xf32>
    %cst_108 = arith.constant 0.797884583 : f32
    %225 = vector.broadcast %cst_108 : f32 to vector<4x64xf32>
    %226 = arith.mulf %225, %224 : vector<4x64xf32>
    %227 = math.tanh %226 : vector<4x64xf32>
    %cst_109 = arith.constant 1.000000e+00 : f32
    %228 = vector.broadcast %cst_109 : f32 to vector<4x64xf32>
    %229 = arith.addf %228, %227 : vector<4x64xf32>
    %230 = arith.mulf %219, %229 : vector<4x64xf32>
    %c0_110 = arith.constant 0 : index
    %c0_111 = arith.constant 0 : index
    %231 = vector.load %arg10[%c0_110, %c0_111] : memref<64x576xf32, #tpu.memory_space<vmem>>, vector<64x576xf32>
    %cst_112 = arith.constant dense<0.000000e+00> : vector<4x576xf32>
    %232 = tpu.matmul %230, %231, %cst_112 {dimension_numbers = #tpu.dot_dimension_numbers<[1], [0], [0], [1], [0, 0, 1, 1], [], []>} : vector<4x64xf32>, vector<64x576xf32>, vector<4x576xf32> -> vector<4x576xf32>
    %c144 = arith.constant 144 : index
    %c0_113 = arith.constant 0 : index
    %233 = vector.load %arg2[%c144, %c0_113] : memref<272x576xf32, #tpu.memory_space<vmem>>, vector<2x576xf32>
    %234 = vector.extract_strided_slice %232 {offsets = [0, 0], sizes = [1, 576], strides = [1, 1]} : vector<4x576xf32> to vector<1x576xf32>
    %235 = vector.broadcast %234 : vector<1x576xf32> to vector<2x576xf32>
    %236 = arith.mulf %233, %235 : vector<2x576xf32>
    %c152 = arith.constant 152 : index
    %c0_114 = arith.constant 0 : index
    %237 = vector.load %arg2[%c152, %c0_114] : memref<272x576xf32, #tpu.memory_space<vmem>>, vector<2x576xf32>
    %238 = vector.extract_strided_slice %232 {offsets = [1, 0], sizes = [1, 576], strides = [1, 1]} : vector<4x576xf32> to vector<1x576xf32>
    %239 = vector.broadcast %238 : vector<1x576xf32> to vector<2x576xf32>
    %240 = arith.mulf %237, %239 : vector<2x576xf32>
    %241 = arith.addf %236, %240 : vector<2x576xf32>
    %c160 = arith.constant 160 : index
    %c0_115 = arith.constant 0 : index
    %242 = vector.load %arg2[%c160, %c0_115] : memref<272x576xf32, #tpu.memory_space<vmem>>, vector<2x576xf32>
    %243 = vector.extract_strided_slice %232 {offsets = [2, 0], sizes = [1, 576], strides = [1, 1]} : vector<4x576xf32> to vector<1x576xf32>
    %244 = vector.broadcast %243 : vector<1x576xf32> to vector<2x576xf32>
    %245 = arith.mulf %242, %244 : vector<2x576xf32>
    %246 = arith.addf %241, %245 : vector<2x576xf32>
    %c168 = arith.constant 168 : index
    %c0_116 = arith.constant 0 : index
    %247 = vector.load %arg2[%c168, %c0_116] : memref<272x576xf32, #tpu.memory_space<vmem>>, vector<2x576xf32>
    %248 = vector.extract_strided_slice %232 {offsets = [3, 0], sizes = [1, 576], strides = [1, 1]} : vector<4x576xf32> to vector<1x576xf32>
    %249 = vector.broadcast %248 : vector<1x576xf32> to vector<2x576xf32>
    %250 = arith.mulf %247, %249 : vector<2x576xf32>
    %251 = arith.addf %246, %250 : vector<2x576xf32>
    %c0_117 = arith.constant 0 : index
    %c0_118 = arith.constant 0 : index
    %252 = vector.load %arg9[%c0_117, %c0_118] : memref<576x64xf32, #tpu.memory_space<vmem>>, vector<576x64xf32>
    %cst_119 = arith.constant dense<0.000000e+00> : vector<2x64xf32>
    %253 = tpu.matmul %251, %252, %cst_119 {dimension_numbers = #tpu.dot_dimension_numbers<[1], [0], [0], [1], [0, 0, 1, 1], [], []>} : vector<2x576xf32>, vector<576x64xf32>, vector<2x64xf32> -> vector<2x64xf32>
    %c24_120 = arith.constant 24 : index
    %c0_121 = arith.constant 0 : index
    %254 = vector.load %arg3[%c24_120, %c0_121] : memref<40x1xf32, #tpu.memory_space<vmem>>, vector<2x1xf32>
    %255 = vector.broadcast %254 : vector<2x1xf32> to vector<2x64xf32>
    %256 = arith.addf %253, %255 : vector<2x64xf32>
    %257 = arith.addf %256, %162 : vector<2x64xf32>
    %cst_122 = arith.constant 5.000000e-01 : f32
    %258 = vector.broadcast %cst_122 : f32 to vector<2x64xf32>
    %259 = arith.mulf %258, %257 : vector<2x64xf32>
    %cst_123 = arith.constant 4.471500e-02 : f32
    %260 = vector.broadcast %cst_123 : f32 to vector<2x64xf32>
    %261 = arith.mulf %260, %257 : vector<2x64xf32>
    %262 = arith.mulf %261, %257 : vector<2x64xf32>
    %263 = arith.mulf %262, %257 : vector<2x64xf32>
    %264 = arith.addf %257, %263 : vector<2x64xf32>
    %cst_124 = arith.constant 0.797884583 : f32
    %265 = vector.broadcast %cst_124 : f32 to vector<2x64xf32>
    %266 = arith.mulf %265, %264 : vector<2x64xf32>
    %267 = math.tanh %266 : vector<2x64xf32>
    %cst_125 = arith.constant 1.000000e+00 : f32
    %268 = vector.broadcast %cst_125 : f32 to vector<2x64xf32>
    %269 = arith.addf %268, %267 : vector<2x64xf32>
    %270 = arith.mulf %259, %269 : vector<2x64xf32>
    %c16_126 = arith.constant 16 : index
    %c0_127 = arith.constant 0 : index
    %271 = vector.load %arg4[%c16_126, %c0_127] : memref<24x4xf32, #tpu.memory_space<vmem>>, vector<2x2xf32>
    %cst_128 = arith.constant dense<0.000000e+00> : vector<2x64xf32>
    %272 = tpu.matmul %271, %270, %cst_128 {dimension_numbers = #tpu.dot_dimension_numbers<[1], [0], [0], [1], [0, 0, 1, 1], [], []>} : vector<2x2xf32>, vector<2x64xf32>, vector<2x64xf32> -> vector<2x64xf32>
    %c26 = arith.constant 26 : index
    %c0_129 = arith.constant 0 : index
    %273 = vector.load %arg3[%c26, %c0_129] : memref<40x1xf32, #tpu.memory_space<vmem>>, vector<2x1xf32>
    %274 = vector.broadcast %273 : vector<2x1xf32> to vector<2x64xf32>
    %275 = arith.addf %272, %274 : vector<2x64xf32>
    %c0_130 = arith.constant 0 : index
    %c0_131 = arith.constant 0 : index
    %276 = vector.load %arg10[%c0_130, %c0_131] : memref<64x576xf32, #tpu.memory_space<vmem>>, vector<64x576xf32>
    %cst_132 = arith.constant dense<0.000000e+00> : vector<2x576xf32>
    %277 = tpu.matmul %270, %276, %cst_132 {dimension_numbers = #tpu.dot_dimension_numbers<[1], [0], [0], [1], [0, 0, 1, 1], [], []>} : vector<2x64xf32>, vector<64x576xf32>, vector<2x576xf32> -> vector<2x576xf32>
    %c176 = arith.constant 176 : index
    %c0_133 = arith.constant 0 : index
    %278 = vector.load %arg2[%c176, %c0_133] : memref<272x576xf32, #tpu.memory_space<vmem>>, vector<4x576xf32>
    %279 = vector.extract_strided_slice %277 {offsets = [0, 0], sizes = [1, 576], strides = [1, 1]} : vector<2x576xf32> to vector<1x576xf32>
    %280 = vector.broadcast %279 : vector<1x576xf32> to vector<4x576xf32>
    %281 = arith.mulf %278, %280 : vector<4x576xf32>
    %c184 = arith.constant 184 : index
    %c0_134 = arith.constant 0 : index
    %282 = vector.load %arg2[%c184, %c0_134] : memref<272x576xf32, #tpu.memory_space<vmem>>, vector<4x576xf32>
    %283 = vector.extract_strided_slice %277 {offsets = [1, 0], sizes = [1, 576], strides = [1, 1]} : vector<2x576xf32> to vector<1x576xf32>
    %284 = vector.broadcast %283 : vector<1x576xf32> to vector<4x576xf32>
    %285 = arith.mulf %282, %284 : vector<4x576xf32>
    %286 = arith.addf %281, %285 : vector<4x576xf32>
    %c0_135 = arith.constant 0 : index
    %c0_136 = arith.constant 0 : index
    %287 = vector.load %arg9[%c0_135, %c0_136] : memref<576x64xf32, #tpu.memory_space<vmem>>, vector<576x64xf32>
    %cst_137 = arith.constant dense<0.000000e+00> : vector<4x64xf32>
    %288 = tpu.matmul %286, %287, %cst_137 {dimension_numbers = #tpu.dot_dimension_numbers<[1], [0], [0], [1], [0, 0, 1, 1], [], []>} : vector<4x576xf32>, vector<576x64xf32>, vector<4x64xf32> -> vector<4x64xf32>
    %c28 = arith.constant 28 : index
    %c0_138 = arith.constant 0 : index
    %289 = vector.load %arg3[%c28, %c0_138] : memref<40x1xf32, #tpu.memory_space<vmem>>, vector<4x1xf32>
    %290 = vector.broadcast %289 : vector<4x1xf32> to vector<4x64xf32>
    %291 = arith.addf %288, %290 : vector<4x64xf32>
    %cst_139 = arith.constant 5.000000e-01 : f32
    %292 = vector.broadcast %cst_139 : f32 to vector<4x64xf32>
    %293 = arith.mulf %292, %291 : vector<4x64xf32>
    %cst_140 = arith.constant 4.471500e-02 : f32
    %294 = vector.broadcast %cst_140 : f32 to vector<4x64xf32>
    %295 = arith.mulf %294, %291 : vector<4x64xf32>
    %296 = arith.mulf %295, %291 : vector<4x64xf32>
    %297 = arith.mulf %296, %291 : vector<4x64xf32>
    %298 = arith.addf %291, %297 : vector<4x64xf32>
    %cst_141 = arith.constant 0.797884583 : f32
    %299 = vector.broadcast %cst_141 : f32 to vector<4x64xf32>
    %300 = arith.mulf %299, %298 : vector<4x64xf32>
    %301 = math.tanh %300 : vector<4x64xf32>
    %cst_142 = arith.constant 1.000000e+00 : f32
    %302 = vector.broadcast %cst_142 : f32 to vector<4x64xf32>
    %303 = arith.addf %302, %301 : vector<4x64xf32>
    %304 = arith.mulf %293, %303 : vector<4x64xf32>
    %c0_143 = arith.constant 0 : index
    %c0_144 = arith.constant 0 : index
    %305 = vector.load %arg10[%c0_143, %c0_144] : memref<64x576xf32, #tpu.memory_space<vmem>>, vector<64x576xf32>
    %cst_145 = arith.constant dense<0.000000e+00> : vector<4x576xf32>
    %306 = tpu.matmul %304, %305, %cst_145 {dimension_numbers = #tpu.dot_dimension_numbers<[1], [0], [0], [1], [0, 0, 1, 1], [], []>} : vector<4x64xf32>, vector<64x576xf32>, vector<4x576xf32> -> vector<4x576xf32>
    %c192 = arith.constant 192 : index
    %c0_146 = arith.constant 0 : index
    %307 = vector.load %arg2[%c192, %c0_146] : memref<272x576xf32, #tpu.memory_space<vmem>>, vector<4x576xf32>
    %308 = vector.extract_strided_slice %306 {offsets = [0, 0], sizes = [1, 576], strides = [1, 1]} : vector<4x576xf32> to vector<1x576xf32>
    %309 = vector.broadcast %308 : vector<1x576xf32> to vector<4x576xf32>
    %310 = arith.mulf %307, %309 : vector<4x576xf32>
    %c200 = arith.constant 200 : index
    %c0_147 = arith.constant 0 : index
    %311 = vector.load %arg2[%c200, %c0_147] : memref<272x576xf32, #tpu.memory_space<vmem>>, vector<4x576xf32>
    %312 = vector.extract_strided_slice %306 {offsets = [1, 0], sizes = [1, 576], strides = [1, 1]} : vector<4x576xf32> to vector<1x576xf32>
    %313 = vector.broadcast %312 : vector<1x576xf32> to vector<4x576xf32>
    %314 = arith.mulf %311, %313 : vector<4x576xf32>
    %315 = arith.addf %310, %314 : vector<4x576xf32>
    %c208 = arith.constant 208 : index
    %c0_148 = arith.constant 0 : index
    %316 = vector.load %arg2[%c208, %c0_148] : memref<272x576xf32, #tpu.memory_space<vmem>>, vector<4x576xf32>
    %317 = vector.extract_strided_slice %306 {offsets = [2, 0], sizes = [1, 576], strides = [1, 1]} : vector<4x576xf32> to vector<1x576xf32>
    %318 = vector.broadcast %317 : vector<1x576xf32> to vector<4x576xf32>
    %319 = arith.mulf %316, %318 : vector<4x576xf32>
    %320 = arith.addf %315, %319 : vector<4x576xf32>
    %c216 = arith.constant 216 : index
    %c0_149 = arith.constant 0 : index
    %321 = vector.load %arg2[%c216, %c0_149] : memref<272x576xf32, #tpu.memory_space<vmem>>, vector<4x576xf32>
    %322 = vector.extract_strided_slice %306 {offsets = [3, 0], sizes = [1, 576], strides = [1, 1]} : vector<4x576xf32> to vector<1x576xf32>
    %323 = vector.broadcast %322 : vector<1x576xf32> to vector<4x576xf32>
    %324 = arith.mulf %321, %323 : vector<4x576xf32>
    %325 = arith.addf %320, %324 : vector<4x576xf32>
    %c0_150 = arith.constant 0 : index
    %c0_151 = arith.constant 0 : index
    %326 = vector.load %arg9[%c0_150, %c0_151] : memref<576x64xf32, #tpu.memory_space<vmem>>, vector<576x64xf32>
    %cst_152 = arith.constant dense<0.000000e+00> : vector<4x64xf32>
    %327 = tpu.matmul %325, %326, %cst_152 {dimension_numbers = #tpu.dot_dimension_numbers<[1], [0], [0], [1], [0, 0, 1, 1], [], []>} : vector<4x576xf32>, vector<576x64xf32>, vector<4x64xf32> -> vector<4x64xf32>
    %c32_153 = arith.constant 32 : index
    %c0_154 = arith.constant 0 : index
    %328 = vector.load %arg3[%c32_153, %c0_154] : memref<40x1xf32, #tpu.memory_space<vmem>>, vector<4x1xf32>
    %329 = vector.broadcast %328 : vector<4x1xf32> to vector<4x64xf32>
    %330 = arith.addf %327, %329 : vector<4x64xf32>
    %cst_155 = arith.constant 5.000000e-01 : f32
    %331 = vector.broadcast %cst_155 : f32 to vector<4x64xf32>
    %332 = arith.mulf %331, %330 : vector<4x64xf32>
    %cst_156 = arith.constant 4.471500e-02 : f32
    %333 = vector.broadcast %cst_156 : f32 to vector<4x64xf32>
    %334 = arith.mulf %333, %330 : vector<4x64xf32>
    %335 = arith.mulf %334, %330 : vector<4x64xf32>
    %336 = arith.mulf %335, %330 : vector<4x64xf32>
    %337 = arith.addf %330, %336 : vector<4x64xf32>
    %cst_157 = arith.constant 0.797884583 : f32
    %338 = vector.broadcast %cst_157 : f32 to vector<4x64xf32>
    %339 = arith.mulf %338, %337 : vector<4x64xf32>
    %340 = math.tanh %339 : vector<4x64xf32>
    %cst_158 = arith.constant 1.000000e+00 : f32
    %341 = vector.broadcast %cst_158 : f32 to vector<4x64xf32>
    %342 = arith.addf %341, %340 : vector<4x64xf32>
    %343 = arith.mulf %332, %342 : vector<4x64xf32>
    %c0_159 = arith.constant 0 : index
    %c0_160 = arith.constant 0 : index
    %344 = vector.load %arg10[%c0_159, %c0_160] : memref<64x576xf32, #tpu.memory_space<vmem>>, vector<64x576xf32>
    %cst_161 = arith.constant dense<0.000000e+00> : vector<4x576xf32>
    %345 = tpu.matmul %343, %344, %cst_161 {dimension_numbers = #tpu.dot_dimension_numbers<[1], [0], [0], [1], [0, 0, 1, 1], [], []>} : vector<4x64xf32>, vector<64x576xf32>, vector<4x576xf32> -> vector<4x576xf32>
    %c224 = arith.constant 224 : index
    %c0_162 = arith.constant 0 : index
    %346 = vector.load %arg2[%c224, %c0_162] : memref<272x576xf32, #tpu.memory_space<vmem>>, vector<2x576xf32>
    %347 = vector.extract_strided_slice %345 {offsets = [0, 0], sizes = [1, 576], strides = [1, 1]} : vector<4x576xf32> to vector<1x576xf32>
    %348 = vector.broadcast %347 : vector<1x576xf32> to vector<2x576xf32>
    %349 = arith.mulf %346, %348 : vector<2x576xf32>
    %c232 = arith.constant 232 : index
    %c0_163 = arith.constant 0 : index
    %350 = vector.load %arg2[%c232, %c0_163] : memref<272x576xf32, #tpu.memory_space<vmem>>, vector<2x576xf32>
    %351 = vector.extract_strided_slice %345 {offsets = [1, 0], sizes = [1, 576], strides = [1, 1]} : vector<4x576xf32> to vector<1x576xf32>
    %352 = vector.broadcast %351 : vector<1x576xf32> to vector<2x576xf32>
    %353 = arith.mulf %350, %352 : vector<2x576xf32>
    %354 = arith.addf %349, %353 : vector<2x576xf32>
    %c240 = arith.constant 240 : index
    %c0_164 = arith.constant 0 : index
    %355 = vector.load %arg2[%c240, %c0_164] : memref<272x576xf32, #tpu.memory_space<vmem>>, vector<2x576xf32>
    %356 = vector.extract_strided_slice %345 {offsets = [2, 0], sizes = [1, 576], strides = [1, 1]} : vector<4x576xf32> to vector<1x576xf32>
    %357 = vector.broadcast %356 : vector<1x576xf32> to vector<2x576xf32>
    %358 = arith.mulf %355, %357 : vector<2x576xf32>
    %359 = arith.addf %354, %358 : vector<2x576xf32>
    %c248 = arith.constant 248 : index
    %c0_165 = arith.constant 0 : index
    %360 = vector.load %arg2[%c248, %c0_165] : memref<272x576xf32, #tpu.memory_space<vmem>>, vector<2x576xf32>
    %361 = vector.extract_strided_slice %345 {offsets = [3, 0], sizes = [1, 576], strides = [1, 1]} : vector<4x576xf32> to vector<1x576xf32>
    %362 = vector.broadcast %361 : vector<1x576xf32> to vector<2x576xf32>
    %363 = arith.mulf %360, %362 : vector<2x576xf32>
    %364 = arith.addf %359, %363 : vector<2x576xf32>
    %c0_166 = arith.constant 0 : index
    %c0_167 = arith.constant 0 : index
    %365 = vector.load %arg9[%c0_166, %c0_167] : memref<576x64xf32, #tpu.memory_space<vmem>>, vector<576x64xf32>
    %cst_168 = arith.constant dense<0.000000e+00> : vector<2x64xf32>
    %366 = tpu.matmul %364, %365, %cst_168 {dimension_numbers = #tpu.dot_dimension_numbers<[1], [0], [0], [1], [0, 0, 1, 1], [], []>} : vector<2x576xf32>, vector<576x64xf32>, vector<2x64xf32> -> vector<2x64xf32>
    %c36 = arith.constant 36 : index
    %c0_169 = arith.constant 0 : index
    %367 = vector.load %arg3[%c36, %c0_169] : memref<40x1xf32, #tpu.memory_space<vmem>>, vector<2x1xf32>
    %368 = vector.broadcast %367 : vector<2x1xf32> to vector<2x64xf32>
    %369 = arith.addf %366, %368 : vector<2x64xf32>
    %370 = arith.addf %369, %275 : vector<2x64xf32>
    %cst_170 = arith.constant 5.000000e-01 : f32
    %371 = vector.broadcast %cst_170 : f32 to vector<2x64xf32>
    %372 = arith.mulf %371, %370 : vector<2x64xf32>
    %cst_171 = arith.constant 4.471500e-02 : f32
    %373 = vector.broadcast %cst_171 : f32 to vector<2x64xf32>
    %374 = arith.mulf %373, %370 : vector<2x64xf32>
    %375 = arith.mulf %374, %370 : vector<2x64xf32>
    %376 = arith.mulf %375, %370 : vector<2x64xf32>
    %377 = arith.addf %370, %376 : vector<2x64xf32>
    %cst_172 = arith.constant 0.797884583 : f32
    %378 = vector.broadcast %cst_172 : f32 to vector<2x64xf32>
    %379 = arith.mulf %378, %377 : vector<2x64xf32>
    %380 = math.tanh %379 : vector<2x64xf32>
    %cst_173 = arith.constant 1.000000e+00 : f32
    %381 = vector.broadcast %cst_173 : f32 to vector<2x64xf32>
    %382 = arith.addf %381, %380 : vector<2x64xf32>
    %383 = arith.mulf %372, %382 : vector<2x64xf32>
    %c0_174 = arith.constant 0 : index
    %c0_175 = arith.constant 0 : index
    %384 = vector.load %arg10[%c0_174, %c0_175] : memref<64x576xf32, #tpu.memory_space<vmem>>, vector<64x576xf32>
    %cst_176 = arith.constant dense<0.000000e+00> : vector<2x576xf32>
    %385 = tpu.matmul %383, %384, %cst_176 {dimension_numbers = #tpu.dot_dimension_numbers<[1], [0], [0], [1], [0, 0, 1, 1], [], []>} : vector<2x64xf32>, vector<64x576xf32>, vector<2x576xf32> -> vector<2x576xf32>
    %c256 = arith.constant 256 : index
    %c0_177 = arith.constant 0 : index
    %386 = vector.load %arg2[%c256, %c0_177] : memref<272x576xf32, #tpu.memory_space<vmem>>, vector<2x576xf32>
    %387 = vector.extract_strided_slice %385 {offsets = [0, 0], sizes = [1, 576], strides = [1, 1]} : vector<2x576xf32> to vector<1x576xf32>
    %388 = vector.broadcast %387 : vector<1x576xf32> to vector<2x576xf32>
    %389 = arith.mulf %386, %388 : vector<2x576xf32>
    %c264 = arith.constant 264 : index
    %c0_178 = arith.constant 0 : index
    %390 = vector.load %arg2[%c264, %c0_178] : memref<272x576xf32, #tpu.memory_space<vmem>>, vector<2x576xf32>
    %391 = vector.extract_strided_slice %385 {offsets = [1, 0], sizes = [1, 576], strides = [1, 1]} : vector<2x576xf32> to vector<1x576xf32>
    %392 = vector.broadcast %391 : vector<1x576xf32> to vector<2x576xf32>
    %393 = arith.mulf %390, %392 : vector<2x576xf32>
    %394 = arith.addf %389, %393 : vector<2x576xf32>
    %c0_179 = arith.constant 0 : index
    %c0_180 = arith.constant 0 : index
    %395 = vector.load %arg9[%c0_179, %c0_180] : memref<576x64xf32, #tpu.memory_space<vmem>>, vector<576x64xf32>
    %cst_181 = arith.constant dense<0.000000e+00> : vector<2x64xf32>
    %396 = tpu.matmul %394, %395, %cst_181 {dimension_numbers = #tpu.dot_dimension_numbers<[1], [0], [0], [1], [0, 0, 1, 1], [], []>} : vector<2x576xf32>, vector<576x64xf32>, vector<2x64xf32> -> vector<2x64xf32>
    %c38 = arith.constant 38 : index
    %c0_182 = arith.constant 0 : index
    %397 = vector.load %arg3[%c38, %c0_182] : memref<40x1xf32, #tpu.memory_space<vmem>>, vector<2x1xf32>
    %398 = vector.broadcast %397 : vector<2x1xf32> to vector<2x64xf32>
    %399 = arith.addf %396, %398 : vector<2x64xf32>
    %c0_183 = arith.constant 0 : index
    %c0_184 = arith.constant 0 : index
    %c0_185 = arith.constant 0 : index
    %400 = vector.load %arg11[%c0_183, %c0_184, %c0_185] : memref<1x2x64xf32, #tpu.memory_space<vmem>>, vector<1x2x64xf32>
    %401 = vector.shape_cast %400 : vector<1x2x64xf32> to vector<2x64xf32>
    %402 = vector.shape_cast %399 : vector<2x64xf32> to vector<1x2x64xf32>
    tpu.vector_store %arg11[%c0_183, %c0_184, %c0_185], %402 {strides = array<i32>} : memref<1x2x64xf32, #tpu.memory_space<vmem>>, vector<1x2x64xf32>,
    return
  }
  func.func @transform_0(%arg0: i32) -> (i32, i32, i32) {
    %c0_i32 = arith.constant 0 : i32
    %c0_i32_0 = arith.constant 0 : i32
    %c0_i32_1 = arith.constant 0 : i32
    return %arg0, %c0_i32, %c0_i32_0 : i32, i32, i32
  }
  func.func @transform_1(%arg0: i32) -> (i32, i32) {
    %c0_i32 = arith.constant 0 : i32
    %c0_i32_0 = arith.constant 0 : i32
    %c0_i32_1 = arith.constant 0 : i32
    return %c0_i32, %c0_i32_0 : i32, i32
  }
  func.func @transform_2(%arg0: i32) -> (i32, i32) {
    %c0_i32 = arith.constant 0 : i32
    %c0_i32_0 = arith.constant 0 : i32
    %c0_i32_1 = arith.constant 0 : i32
    return %c0_i32, %c0_i32_0 : i32, i32
  }
  func.func @transform_3(%arg0: i32) -> (i32, i32) {
    %c0_i32 = arith.constant 0 : i32
    %c0_i32_0 = arith.constant 0 : i32
    %c0_i32_1 = arith.constant 0 : i32
    return %c0_i32, %c0_i32_0 : i32, i32
  }
  func.func @transform_4(%arg0: i32) -> (i32, i32) {
    %c0_i32 = arith.constant 0 : i32
    %c0_i32_0 = arith.constant 0 : i32
    %c0_i32_1 = arith.constant 0 : i32
    return %c0_i32, %c0_i32_0 : i32, i32
  }
  func.func @transform_5(%arg0: i32) -> (i32, i32) {
    %c0_i32 = arith.constant 0 : i32
    %c0_i32_0 = arith.constant 0 : i32
    %c0_i32_1 = arith.constant 0 : i32
    return %c0_i32, %c0_i32_0 : i32, i32
  }
  func.func @transform_6(%arg0: i32) -> (i32, i32) {
    %c0_i32 = arith.constant 0 : i32
    %c0_i32_0 = arith.constant 0 : i32
    %c0_i32_1 = arith.constant 0 : i32
    return %c0_i32, %c0_i32_0 : i32, i32
  }
  func.func @transform_7(%arg0: i32) -> (i32, i32) {
    %c0_i32 = arith.constant 0 : i32
    %c0_i32_0 = arith.constant 0 : i32
    %c0_i32_1 = arith.constant 0 : i32
    return %c0_i32, %c0_i32_0 : i32, i32
  }
  func.func @transform_8(%arg0: i32) -> (i32, i32) {
    %c0_i32 = arith.constant 0 : i32
    %c0_i32_0 = arith.constant 0 : i32
    %c0_i32_1 = arith.constant 0 : i32
    return %c0_i32, %c0_i32_0 : i32, i32
  }
  func.func @transform_9(%arg0: i32) -> (i32, i32) {
    %c0_i32 = arith.constant 0 : i32
    %c0_i32_0 = arith.constant 0 : i32
    %c0_i32_1 = arith.constant 0 : i32
    return %c0_i32, %c0_i32_0 : i32, i32
  }
  func.func @transform_10(%arg0: i32) -> (i32, i32, i32) {
    %c0_i32 = arith.constant 0 : i32
    %c0_i32_0 = arith.constant 0 : i32
    %c0_i32_1 = arith.constant 0 : i32
    return %arg0, %c0_i32, %c0_i32_0 : i32, i32, i32
  }
}

</mosaic_0001>

<bundles_post_ra>
// kernel: csinet_forward.1
= control target key start
LH: loop header
LB: loop body
LE: loop exit
PB: predicated region body
PF: predicated region fallthrough
CT: control target
= control target key end

     0   :  { %15 = vsyncpa [#allocation3], 0  ;;  %s10202_s13 = smov 0   ;;  %s12283_s0 = inlined_call_operand.vmem [shape: f32[2,2,64], index: 0, kind: input, shape index: {}]   ;;  %s12284_s1 = inlined_call_operand.vmem [shape: f32[272,576], index: 1, kind: input, shape index: {}]   ;;  %s12285_s2 = inlined_call_operand.vmem [shape: f32[40,1], index: 2, kind: input, shape index: {}]   ;;  %s12286_s3 = inlined_call_operand.vmem [shape: f32[24,4], index: 3, kind: input, shape index: {}]   ;;  %s12287_s4 = inlined_call_operand.vmem [shape: f32[128,32], index: 4, kind: input, shape index: {}]   ;;  %s12288_s5 = inlined_call_operand.vmem [shape: f32[1,32], index: 5, kind: input, shape index: {}]   ;;  %s12289_s6 = inlined_call_operand.vmem [shape: f32[64,64], index: 6, kind: input, shape index: {}]   ;;  %s12290_s7 = inlined_call_operand.vmem [shape: f32[2,64], index: 7, kind: input, shape index: {}]   ;;  %s12291_s8 = inlined_call_operand.vmem [shape: f32[576,64], index: 8, kind: input, shape index: {}]   ;;  %s12292_s9 = inlined_call_operand.hbm [shape: f32[64,576], index: 9, kind: input, shape index: {}]   ;;  %s12293_s10 = inlined_call_operand.vmem [shape: f32[2,2,64], index: 10, kind: output, shape index: {}]  }
   0x1 LB: > { %s10208_s14 = sadd.s32 4294967295, %s10138_s13   ;;  %p7127_p0 = scmp.ge.s32.totalorder %s10138_s13, 1  ;;  %s10138_s13 = sphi %s10202_s13, %s21_s13  }
   0x2   : > { %p267_p1 = scmp.lt.s32.totalorder %s10138_s13, 3  ;;  %s10140_s15 = smov [#allocation2]  }
   0x3   : > { %s303_s16 = sshll.u32 %s10140_s15, 4  ;;  %p12294_p3 = scmp.eq.s32.totalorder %s10208_s14, 0  ;;  %s304_s16 = int_to_ptr.vmem [resolvable:$true] %s303_s16 }
   0x4   : > { %p10212_p2 = pnand %p7127_p0, %p267_p1  ;;  %s10100_s21 = scalar_lea.hbm %s12292_s9, 5120 }
   0x5   : > { %p10101_p6 = scmp.ne.s32.totalorder %s12292_s9, %s10100_s21  ;;  %p10107_p10 = scmp.lt.u32.totalorder %s10100_s21, %s12292_s9 }
   0x6   : > { %s12442_s17 = scalar_select %p10212_p2, 1, 0 }
   0x7   : > { %p10059_p4 = pneg %p10212_p2 }
   0x9   : > { %p10221_p5 = pnand %p12294_p3, %p10059_p4 }
   0xb   : > { %p10102_p7 = pneg %p10221_p5 }
   0xd   : > { %p10103_p8 = pnand %p10102_p7, %p10101_p6 }
   0xf   : > { %p10104_p9 = pneg %p10103_p8 }
  0x11   : > { %p10109_p11 = pnand %p10107_p10, %p10104_p9 }
  0x13   : > { %10112 = shalt.err (!%p10109_p11)
}
  0x14   : > { %s10113_s26 = scalar_lea.vmem %s304_s16, 5120  ;;  %p10121_p1 = scmp.lt.s32.totalorder %s304_s16, %s304_s16 }
  0x15   : > { %p10114_p12 = scmp.ne.s32.totalorder %s304_s16, %s10113_s26  ;;  %p10122_p4 = scmp.lt.s32.totalorder %s10113_s26, %s10113_s26 }
  0x17   : > { %p10116_p13 = pnand %p10114_p12, %p10102_p7  ;;  %p10123_p3 = por %p10122_p4, %p10121_p1 }
  0x19   : > { %p10117_p0 = pneg %p10116_p13 }
  0x1b   : > { %p10124_p2 = pnand %p10123_p3, %p10117_p0 }
  0x1d   : > { %10127 = shalt.err (!%p10124_p2)
}
  0x1e   : > { %s10141_s27 = smov 640   ;;  %s10142_s28 = smov 40  }
  0x1f   : > { %10062 = dma.hbm_to_vmem [thread:$0]  (!%p10221_p5), %s12292_s9, 5120, %s304_s16, [#allocation3], %s10141_s27, %s10141_s27, %s10142_s28  }
  0x20   : > { %p12444_p6 = scmp.ne.s32.totalorder %s12442_s17, 0 }
  0x22   : > { %326 = sbr.rel (%p12444_p6) target bundleno = 5776 (0x1690), region = 60 }
  0x29   : > { %p12445_p8 = scmp.eq.s32.totalorder %s10208_s14, 0 }
  0x2b   : > { %10133 = dma.done.wait (%p12445_p8), [#allocation3], 5120   ;;  %p12446_p7 = pmov %p12445_p8 }
  0x2c   : > { %v12296_v0 = vmov 0.0   ;;  %v372_v1 = vld [vmem:[#allocation2 + $0x8] sm:$0xff]  ;;  %v377_v2 = vld [vmem:[#allocation2 + $0x30] sm:$0xff]  ;;  %v371_v3 = vld [vmem:[#allocation2] sm:$0xff]  ;;  %p362_p2 = scmp.lt.s32.totalorder %s10208_s14, 1  ;;  %vm411_vm0 = vcmask 523264  }
  0x2d   : > { %10135 = vsyncadd (%p12446_p7), [#allocation3], 4294962176  ;;  %479 = vmatprep.mubr.f32.mxu0 %v12296_v0  ;;  %550 = vmatprep.mubr.f32.mxu1 %v12296_v0  ;;  %v10249_v4 = vpack.c.bf16 %v377_v2, %v372_v1  ;;  %v376_v5 = vld [vmem:[#allocation2 + $0x28] sm:$0xff]  ;;  %v374_v6 = vld [vmem:[#allocation2 + $0x18] sm:$0xff]  ;;  %v12298_v60 = vmov 0.0|0.0   ;;  %vm10145_vm1 = vmmov 0  }
  0x2e   : > { %v379_v7 = vld [vmem:[#allocation2 + $0x40] sm:$0xff]  ;;  %v10251_v8 = vpack.c.bf16 %v376_v5, %v371_v3  ;;  %v373_v10 = vld [vmem:[#allocation2 + $0x10] sm:$0xff]  ;;  %v378_v11 = vld [vmem:[#allocation2 + $0x38] sm:$0xff]  ;;  %s12749_s14 = smov (!%p362_p2, %s10208_s14), 1  ;;  %vm1153_vm2 = vcmask 261120   ;;  %vm1327_vm4 = vcmask 1041408  }
  0x2f   : > { %12447 = vst [vmem:[#allocation5_spill] sm:$0xff] %v10249_v4  ;;  %v10253_v9 = vpack.c.bf16 %v379_v7, %v374_v6  ;;  %v382_v12 = vld [vmem:[#allocation2 + $0x58] sm:$0xff]  ;;  %8686 = vmatprep.subr.bf16.mxu0 %v10249_v4  ;;  %v10257_v13 = vpack.c.bf16 %v378_v11, %v373_v10  ;;  %v387_v14 = vld [vmem:[#allocation2 + $0x80] sm:$0xff]  ;;  %v381_v15 = vld [vmem:[#allocation2 + $0x50] sm:$0xff]  ;;  %s7132_s11 = sshll.u32 %s12749_s14, 1  ;;  %vm1323_vm5 = vcmask 15360  }
  0x30   : > { %v386_v16 = vld [vmem:[#allocation2 + $0x78] sm:$0xff]  ;;  %8688 = vmatpush1.bf16.msra.mxu0 %v10251_v8  ;;  %v10261_v17 = vpack.c.bf16 %v387_v14, %v382_v12  ;;  %v384_v19 = vld [vmem:[#allocation2 + $0x68] sm:$0xff]  ;;  %v389_v20 = vld [vmem:[#allocation2 + $0x90] sm:$0xff]  ;;  %s365_s16 = scalar_lea.vmem %s12283_s0, %s7132_s11  ;;  %s369_s30 = scalar_lea.vmem %s12293_s10, %s7132_s11  ;;  %vm7058_vm6 = vcmask 517120  }
  0x31   : > { %8702 = vmatprep.subr.bf16.mxu1 %v10253_v9  ;;  %v10263_v18 = vpack.c.bf16 %v386_v16, %v381_v15  ;;  %v383_v21 = vld [vmem:[#allocation2 + $0x60] sm:$0xff]  ;;  %v10266_v22 = vpack.c.bf16 %v389_v20, %v384_v19  ;;  %v388_v23 = vld [vmem:[#allocation2 + $0x88] sm:$0xff]  ;;  %v397_v25 = vld [vmem:[#allocation2 + $0xd0] sm:$0xff] }
  0x32   : > { %8704 = vmatpush1.bf16.msra.mxu1 %v10257_v13  ;;  %v392_v24 = vld [vmem:[#allocation2 + $0xa8] sm:$0xff]  ;;  %8690 = vmatprep.subr.bf16.mxu0 %v10261_v17  ;;  %v10269_v26 = vpack.c.bf16 %v388_v23, %v383_v21  ;;  %v391_v28 = vld [vmem:[#allocation2 + $0xa0] sm:$0xff]  ;;  %v394_v30 = vld [vmem:[#allocation2 + $0xb8] sm:$0xff] }
  0x33   : > { %v10271_v27 = vpack.c.bf16 %v397_v25, %v392_v24  ;;  %v396_v29 = vld [vmem:[#allocation2 + $0xc8] sm:$0xff]  ;;  %8706 = vmatprep.subr.bf16.mxu1 %v10266_v22  ;;  %v399_v31 = vld [vmem:[#allocation2 + $0xe0] sm:$0xff]  ;;  %v393_v32 = vld [vmem:[#allocation2 + $0xb0] sm:$0xff] }
  0x34   : > { %v398_v33 = vld [vmem:[#allocation2 + $0xd8] sm:$0xff]  ;;  %8692 = vmatpush1.bf16.msra.mxu0 %v10263_v18  ;;  %v10280_v34 = vpack.c.bf16 %v396_v29, %v391_v28  ;;  %v10282_v35 = vpack.c.bf16 %v399_v31, %v394_v30  ;;  %v407_v37 = vld [vmem:[#allocation2 + $0x120] sm:$0xff]  ;;  %v401_v38 = vld [vmem:[#allocation2 + $0xf0] sm:$0xff] }
  0x35   : > { %v402_v36 = vld [vmem:[#allocation2 + $0xf8] sm:$0xff]  ;;  %8694 = vmatprep.subr.bf16.mxu0 %v10271_v27  ;;  %v10286_v39 = vpack.c.bf16 %v398_v33, %v393_v32  ;;  %v404_v42 = vld [vmem:[#allocation2 + $0x108] sm:$0xff]  ;;  %v409_v43 = vld [vmem:[#allocation2 + $0x130] sm:$0xff] }
  0x36   : > { %12448 = vst [vmem:[#allocation6_spill] sm:$0xff] %v10282_v35  ;;  %8708 = vmatpush1.bf16.msra.mxu1 %v10269_v26  ;;  %v10288_v40 = vpack.c.bf16 %v407_v37, %v402_v36  ;;  %v406_v41 = vld [vmem:[#allocation2 + $0x118] sm:$0xff]  ;;  %v10291_v44 = vpack.c.bf16 %v409_v43, %v404_v42  ;;  %v403_v45 = vld [vmem:[#allocation2 + $0x100] sm:$0xff]  ;;  %v408_v46 = vld [vmem:[#allocation2 + $0x128] sm:$0xff] }
  0x37   : > { %12449 = vst [vmem:[#allocation7_spill] sm:$0xff] %v10286_v39  ;;  %8710 = vmatprep.subr.bf16.mxu1 %v10282_v35  ;;  %v10295_v47 = vpack.c.bf16 %v406_v41, %v401_v38  ;;  %v10299_v48 = vpack.c.bf16 %v408_v46, %v403_v45  ;;  %v375_v49 = vld [vmem:[#allocation2 + $0x20] sm:$0xff]  ;;  %v380_v50 = vld [vmem:[#allocation2 + $0x48] sm:$0xff]  ;;  %v710_v58 = vld [vmem:[%s12291_s8 + $0x90] sm:$0xff] }
  0x38   : > { %12450 = vst [vmem:[#allocation8_spill] sm:$0xff] %v10291_v44  ;;  %8696 = vmatpush1.bf16.msra.mxu0 %v10280_v34  ;;  %v708_v51 = vld [vmem:[%s12291_s8 + $0x80] sm:$0xff]  ;;  %v709_v52 = vld [vmem:[%s12291_s8 + $0x88] sm:$0xff]  ;;  %v10324_v57 = vpack.c.bf16 %v380_v50, %v375_v49  ;;  %v711_v59 = vld [vmem:[%s12291_s8 + $0x98] sm:$0xff] }
  0x39   : > { %12451 = vst [vmem:[#allocation9_spill] sm:$0xff] %v10295_v47  ;;  %8698 = vmatprep.subr.bf16.mxu0 %v10288_v40  ;;  %12452 = vst [vmem:[#allocation10_spill] sm:$0xff] %v10299_v48  ;;  %v10313_v53 = vpack.c.bf16 %v709_v52, %v708_v51  ;;  %v692_v54 = vld [vmem:[%s12291_s8] sm:$0xff]  ;;  %v693_v55 = vld [vmem:[%s12291_s8 + $0x8] sm:$0xff]  ;;  %v10339_v1 = vpack.c.bf16 %v711_v59, %v710_v58 }
  0x3a   : > { %8712 = vmatpush1.bf16.msra.mxu1 %v10286_v39  ;;  %v10322_v56 = vld [vmem:[%s365_s16] sm:$0x3]  ;;  %12454 = vst [vmem:[#allocation12_spill] sm:$0xff] %v10324_v57  ;;  %v385_v61 = vld [vmem:[#allocation2 + $0x70] sm:$0xff]  ;;  %v390_v62 = vld [vmem:[#allocation2 + $0x98] sm:$0xff]  ;;  %v10335_v63 = vpack.c.bf16 %v693_v55, %v692_v54 }
  0x3b   : > { %8714 = vmatprep.subr.bf16.mxu1 %v10291_v44  ;;  %12453 = vst [vmem:[#allocation11_spill] sm:$0xff] %v10313_v53  ;;  %12456 = vst [vmem:[#allocation14_spill] sm:$0xff] %v10339_v1  ;;  %v694_v2 = vld [vmem:[%s12291_s8 + $0x10] sm:$0xff]  ;;  %v695_v3 = vld [vmem:[%s12291_s8 + $0x18] sm:$0xff]  ;;  %v10350_v5 = vpack.c.bf16 %v390_v62, %v385_v61 }
  0x3c   : > { %8700 = vmatpush1.bf16.msra.mxu0 %v10295_v47  ;;  %12455 = vst [vmem:[#allocation13_spill] sm:$0xff] %v10335_v63  ;;  %v712_v6 = vld [vmem:[%s12291_s8 + $0xa0] sm:$0xff]  ;;  %v713_v7 = vld [vmem:[%s12291_s8 + $0xa8] sm:$0xff]  ;;  %v10362_v12 = vpack.c.bf16 %v695_v3, %v694_v2  ;;  %v714_v20 = vld [vmem:[%s12291_s8 + $0xb0] sm:$0xff] }
  0x3d   : > { %8717 = vmatprep.subr.bf16.mxu0 %v12298_v60  ;;  %12457 = vst [vmem:[#allocation15_spill] sm:$0xff] %v10350_v5  ;;  %v395_v10 = vld [vmem:[#allocation2 + $0xc0] sm:$0xff]  ;;  %v400_v11 = vld [vmem:[#allocation2 + $0xe8] sm:$0xff]  ;;  %v10365_v14 = vpack.c.bf16 %v713_v7, %v712_v6  ;;  %v715_v21 = vld [vmem:[%s12291_s8 + $0xb8] sm:$0xff] }
  0x3e   : > { %8716 = vmatpush1.bf16.msra.mxu1 %v10299_v48  ;;  %12458 = vst [vmem:[#allocation16_spill] sm:$0xff] %v10362_v12  ;;  %v696_v15 = vld [vmem:[%s12291_s8 + $0x20] sm:$0xff]  ;;  %v697_v16 = vld [vmem:[%s12291_s8 + $0x28] sm:$0xff]  ;;  %v10374_v19 = vpack.c.bf16 %v400_v11, %v395_v10  ;;  %v405_v23 = vld [vmem:[#allocation2 + $0x110] sm:$0xff]  ;;  %v10393_v30 = vpack.c.bf16 %v715_v21, %v714_v20 }
  0x3f   : > { %8730 = vmatprep.subr.bf16.mxu1 %v10313_v53  ;;  %7134 = vmatmul.mubr.msk.f32.vlgmr.msra.gmra.mrb[0].mxu0 %vm411_vm0, %v10322_v56  ;;  %12459 = vst [vmem:[#allocation17_spill] sm:$0xff] %v10365_v14  ;;  %v410_v24 = vld [vmem:[#allocation2 + $0x138] sm:$0xff]  ;;  %v740_v25 = vld [vmem:[%s12291_s8 + $0x180] sm:$0xff]  ;;  %v741_v28 = vld [vmem:[%s12291_s8 + $0x188] sm:$0xff]  ;;  %v10390_v29 = vpack.c.bf16 %v697_v16, %v696_v15 }
  0x40   : > { %8719 = vmatpush3.bf16.msra.mxu0 %v10324_v57  ;;  %8208 = vmatprep.mubr.msk.f32.mxu0 %vm10145_vm1, %v12296_v0  ;;  %12460 = vst [vmem:[#allocation18_spill] sm:$0xff] %v10374_v19  ;;  %12462 = vst [vmem:[#allocation20_spill] sm:$0xff] %v10393_v30  ;;  %v698_v31 = vld [vmem:[%s12291_s8 + $0x30] sm:$0xff]  ;;  %v699_v32 = vld [vmem:[%s12291_s8 + $0x38] sm:$0xff]  ;;  %v10402_v33 = vpack.c.bf16 %v410_v24, %v405_v23  ;;  %v10411_v38 = vpack.c.bf16 %v741_v28, %v740_v25 }
  0x41   : > { %7135 = vmatmul.mubr.msk.f32.vlgmr.msra.gmra.mrb[0].mxu1 %vm411_vm0, %v10322_v56  ;;  %8720 = vmatprep.subr.bf16.mxu0 %v12298_v60  ;;  %12461 = vst [vmem:[#allocation19_spill] sm:$0xff] %v10390_v29  ;;  %v716_v36 = vld [vmem:[%s12291_s8 + $0xc0] sm:$0xff]  ;;  %v717_v37 = vld [vmem:[%s12291_s8 + $0xc8] sm:$0xff]  ;;  %v742_v43 = vld [vmem:[%s12291_s8 + $0x190] sm:$0xff]  ;;  %v10426_v46 = vpack.c.bf16 %v699_v32, %v698_v31 }
  0x42   : > { %8732 = vmatpush3.bf16.msra.mxu1 %v10335_v63  ;;  %12463 = vst [vmem:[#allocation21_spill] sm:$0xff] %v10402_v33  ;;  %12464 = vst [vmem:[#allocation22_spill] sm:$0xff] %v10411_v38  ;;  %v724_v41 = vld [vmem:[%s12291_s8 + $0x100] sm:$0xff]  ;;  %v725_v42 = vld [vmem:[%s12291_s8 + $0x108] sm:$0xff]  ;;  %v10429_v49 = vpack.c.bf16 %v717_v37, %v716_v36 }
  0x43   : > { %8734 = vmatprep.subr.bf16.mxu1 %v10339_v1  ;;  %v743_v45 = vld [vmem:[%s12291_s8 + $0x198] sm:$0xff]  ;;  %12465 = vst [vmem:[#allocation23_spill] sm:$0xff] %v10426_v46  ;;  %v700_v50 = vld [vmem:[%s12291_s8 + $0x40] sm:$0xff]  ;;  %v701_v51 = vld [vmem:[%s12291_s8 + $0x48] sm:$0xff]  ;;  %v10438_v52 = vpack.c.bf16 %v725_v42, %v724_v41 }
  0x44   : > { %8722 = vmatpush3.bf16.msra.mxu0 %v10350_v5  ;;  %12466 = vst [vmem:[#allocation24_spill] sm:$0xff] %v10429_v49  ;;  %v718_v54 = vld [vmem:[%s12291_s8 + $0xd0] sm:$0xff]  ;;  %v719_v55 = vld [vmem:[%s12291_s8 + $0xd8] sm:$0xff]  ;;  %v10447_v58 = vpack.c.bf16 %v743_v45, %v742_v43  ;;  %v744_v62 = vld [vmem:[%s12291_s8 + $0x1a0] sm:$0xff]  ;;  %v10462_v3 = vpack.c.bf16 %v701_v51, %v700_v50 }
  0x45   : > { %8723 = vmatprep.subr.bf16.mxu0 %v12298_v60  ;;  %12467 = vst [vmem:[#allocation25_spill] sm:$0xff] %v10438_v52  ;;  %v726_v59 = vld [vmem:[%s12291_s8 + $0x110] sm:$0xff]  ;;  %v727_v61 = vld [vmem:[%s12291_s8 + $0x118] sm:$0xff]  ;;  %v745_v2 = vld [vmem:[%s12291_s8 + $0x1a8] sm:$0xff]  ;;  %v10467_v6 = vpack.c.bf16 %v719_v55, %v718_v54 }
  0x46   : > { %8736 = vmatpush3.bf16.msra.mxu1 %v10362_v12  ;;  %12468 = vst [vmem:[#allocation26_spill] sm:$0xff] %v10447_v58  ;;  %12469 = vst [vmem:[#allocation27_spill] sm:$0xff] %v10462_v3  ;;  %v702_v7 = vld [vmem:[%s12291_s8 + $0x50] sm:$0xff]  ;;  %v703_v10 = vld [vmem:[%s12291_s8 + $0x58] sm:$0xff]  ;;  %v10476_v11 = vpack.c.bf16 %v727_v61, %v726_v59  ;;  %v10479_v15 = vpack.c.bf16 %v745_v2, %v744_v62 }
  0x47   : > { %8738 = vmatprep.subr.bf16.mxu1 %v10365_v14  ;;  %12470 = vst [vmem:[#allocation28_spill] sm:$0xff] %v10467_v6  ;;  %v729_v16 = vld [vmem:[%s12291_s8 + $0x128] sm:$0xff]  ;;  %v746_v20 = vld [vmem:[%s12291_s8 + $0x1b0] sm:$0xff]  ;;  %v747_v21 = vld [vmem:[%s12291_s8 + $0x1b8] sm:$0xff]  ;;  %v10494_v23 = vpack.c.bf16 %v703_v10, %v702_v7 }
  0x48   : > { %8725 = vmatpush3.bf16.msra.mxu0 %v10374_v19  ;;  %12471 = vst [vmem:[#allocation29_spill] sm:$0xff] %v10476_v11  ;;  %12472 = vst [vmem:[#allocation30_spill] sm:$0xff] %v10479_v15  ;;  %v10501_v25 = vpack.c.bf16 %v747_v21, %v746_v20  ;;  %v730_v28 = vld [vmem:[%s12291_s8 + $0x130] sm:$0xff]  ;;  %v731_v31 = vld [vmem:[%s12291_s8 + $0x138] sm:$0xff] }
  0x49   : > { %8726 = vmatprep.subr.bf16.mxu0 %v12298_v60  ;;  %12473 = vst [vmem:[#allocation31_spill] sm:$0xff] %v10494_v23  ;;  %v748_v32 = vld [vmem:[%s12291_s8 + $0x1c0] sm:$0xff]  ;;  %v749_v36 = vld [vmem:[%s12291_s8 + $0x1c8] sm:$0xff]  ;;  %v10517_v37 = vpack.c.bf16 %v731_v31, %v730_v28  ;;  %v750_v45 = vld [vmem:[%s12291_s8 + $0x1d0] sm:$0xff] }
  0x4a   : > { %8740 = vmatpush3.bf16.msra.mxu1 %v10390_v29  ;;  %12475 = vst [vmem:[#allocation33_spill] sm:$0xff] %v10501_v25  ;;  %v10520_v41 = vpack.c.bf16 %v749_v36, %v748_v32  ;;  %v732_v42 = vld [vmem:[%s12291_s8 + $0x140] sm:$0xff]  ;;  %v733_v43 = vld [vmem:[%s12291_s8 + $0x148] sm:$0xff]  ;;  %v751_v50 = vld [vmem:[%s12291_s8 + $0x1d8] sm:$0xff] }
  0x4b   : > { %8742 = vmatprep.subr.bf16.mxu1 %v10393_v30  ;;  %12476 = vst [vmem:[#allocation34_spill] sm:$0xff] %v10517_v37  ;;  %v10535_v51 = vpack.c.bf16 %v733_v43, %v732_v42  ;;  %v10538_v54 = vpack.c.bf16 %v751_v50, %v750_v45  ;;  %v720_v55 = vld [vmem:[%s12291_s8 + $0xe0] sm:$0xff]  ;;  %v721_v59 = vld [vmem:[%s12291_s8 + $0xe8] sm:$0xff]  ;;  %v734_v61 = vld [vmem:[%s12291_s8 + $0x150] sm:$0xff] }
  0x4c   : > { %8728 = vmatpush3.bf16.msra.mxu0 %v10402_v33  ;;  %12477 = vst [vmem:[#allocation35_spill] sm:$0xff] %v10520_v41  ;;  %v10551_v62 = vpack.c.bf16 %v721_v59, %v720_v55  ;;  %v735_v2 = vld [vmem:[%s12291_s8 + $0x158] sm:$0xff]  ;;  %v704_v7 = vld [vmem:[%s12291_s8 + $0x60] sm:$0xff]  ;;  %v705_v10 = vld [vmem:[%s12291_s8 + $0x68] sm:$0xff] }
  0x4d   : > { %8762 = vmatprep.subr.bf16.mxu0 %v10411_v38  ;;  %12478 = vst [vmem:[#allocation36_spill] sm:$0xff] %v10535_v51  ;;  %12479 = vst [vmem:[#allocation37_spill] sm:$0xff] %v10538_v54  ;;  %v752_v20 = vld [vmem:[%s12291_s8 + $0x1e0] sm:$0xff]  ;;  %v753_v21 = vld [vmem:[%s12291_s8 + $0x1e8] sm:$0xff] }
  0x4e   : > { %8744 = vmatpush3.bf16.msra.mxu1 %v10426_v46  ;;  %12480 = vst [vmem:[#allocation38_spill] sm:$0xff] %v10551_v62  ;;  %v10575_v28 = vpack.c.bf16 %v753_v21, %v752_v20  ;;  %v722_v31 = vld [vmem:[%s12291_s8 + $0xf0] sm:$0xff]  ;;  %v723_v32 = vld [vmem:[%s12291_s8 + $0xf8] sm:$0xff]  ;;  %v736_v36 = vld [vmem:[%s12291_s8 + $0x160] sm:$0xff] }
  0x4f   : > { %8209 = vmatmul.mubr.msk.f32.vlgmr.msra.gmra.mrb[2].mxu0 %vm411_vm0, %v10322_v56  ;;  %8746 = vmatprep.subr.bf16.mxu1 %v10429_v49  ;;  %v728_v56 = vld [vmem:[%s12291_s8 + $0x120] sm:$0xff]  ;;  %v10586_v42 = vpack.c.bf16 %v723_v32, %v722_v31  ;;  %v737_v43 = vld [vmem:[%s12291_s8 + $0x168] sm:$0xff]  ;;  %v706_v45 = vld [vmem:[%s12291_s8 + $0x70] sm:$0xff]  ;;  %v10146_v32 = vmov 0  }
  0x50   : > { %8764 = vmatpush3.bf16.msra.mxu0 %v10438_v52  ;;  %v10498_v24 = vpack.c.bf16 %v729_v16, %v728_v56  ;;  %v10562_v56 = vpack.c.bf16 %v735_v2, %v734_v61  ;;  %v10564_v16 = vpack.c.bf16 %v705_v10, %v704_v7  ;;  %12483 = vst [vmem:[#allocation41_spill] sm:$0xff] %v10575_v28  ;;  %v707_v55 = vld [vmem:[%s12291_s8 + $0x78] sm:$0xff]  ;;  %v754_v61 = vld [vmem:[%s12291_s8 + $0x1f0] sm:$0xff]  ;;  %v764_v31 = vld [vmem:[%s12285_s2] sm:$0x3] }
  0x51   : > { %8766 = vmatprep.subr.bf16.mxu0 %v10447_v58  ;;  %12484 = vst [vmem:[#allocation42_spill] sm:$0xff] %v10586_v42  ;;  %v10595_v50 = vpack.c.bf16 %v737_v43, %v736_v36  ;;  %v10601_v59 = vpack.c.bf16 %v707_v55, %v706_v45  ;;  %v755_v2 = vld [vmem:[%s12291_s8 + $0x1f8] sm:$0xff]  ;;  %v738_v10 = vld [vmem:[%s12291_s8 + $0x170] sm:$0xff]  ;;  %10080 = vset.pattern.permute.xlu0 %v10146_v32  ;;  %v1680_v36 = vld [vmem:[%s12285_s2 + $0x4] sm:$0xf] }
  0x52   : > { %8748 = vmatpush3.bf16.msra.mxu1 %v10462_v3  ;;  %12474 = vst [vmem:[#allocation32_spill] sm:$0xff] %v10498_v24  ;;  %12481 = vst [vmem:[#allocation39_spill] sm:$0xff] %v10562_v56  ;;  %v10610_v7 = vpack.c.bf16 %v755_v2, %v754_v61  ;;  %v739_v20 = vld [vmem:[%s12291_s8 + $0x178] sm:$0xff]  ;;  %10081 = vset.pattern.permute.xlu1 %v10146_v32  ;;  %v1317_v43 = vld [vmem:[%s12285_s2 + $0x2] sm:$0x3] }
  0x53   : > { %8750 = vmatprep.subr.bf16.mxu1 %v10467_v6  ;;  %12482 = vst [vmem:[#allocation40_spill] sm:$0xff] %v10564_v16  ;;  %12485 = vst [vmem:[#allocation43_spill] sm:$0xff] %v10595_v50  ;;  %v10620_v21 = vpack.c.bf16 %v739_v20, %v738_v10  ;;  %767 = vperm.xlu0 %10080, %v764_v31   ;;  %v4005_v45 = vld [vmem:[%s12285_s2 + $0x14] sm:$0xf]  ;;  %v3066_v55 = vld [vmem:[%s12285_s2 + $0xe] sm:$0x3]  ;;  %v632_v10 = vlaneseq }
  0x54   : > { %8768 = vmatpush3.bf16.msra.mxu0 %v10476_v11  ;;  %12486 = vst [vmem:[#allocation44_spill] sm:$0xff] %v10601_v59  ;;  %12487 = vst [vmem:[#allocation45_spill] sm:$0xff] %v10610_v7  ;;  %v5752_v61 = vld [vmem:[%s12285_s2 + $0x20] sm:$0xf]  ;;  %v4813_v2 = vld [vmem:[%s12285_s2 + $0x1a] sm:$0x3] }
  0x55   : > { %8770 = vmatprep.subr.bf16.mxu0 %v10479_v15  ;;  %12488 = vst [vmem:[#allocation46_spill] sm:$0xff] %v10620_v21  ;;  %v10646_v20 = vshrl.u32 %v632_v10, 7 }
  0x56   : > { %8752 = vmatpush3.bf16.msra.mxu1 %v10494_v23 }
  0x57   : > { %8754 = vmatprep.subr.bf16.mxu1 %v10551_v62  ;;  %1683 = vperm.xlu0 %10080, %v1680_v36   ;;  %12489 = vst [vmem:[#allocation47_spill] sm:$0xff] %v10646_v20  ;;  %v10649_v31 = vsub.s32 0, %v10646_v20  ;;  %v10652_v32 = vsub.s32 1, %v10646_v20  ;;  %v627_v36 = vld [vmem:[%s12284_s1] sm:$0x3]  ;;  %vm1304_vm3 = vcmp.eq.s32.totalorder %v10646_v20, 0 }
  0x58   : > { %8772 = vmatpush3.bf16.msra.mxu0 %v10498_v24 }
  0x59   : > { %8774 = vmatprep.subr.bf16.mxu0 %v10501_v25 }
  0x5a   : > { %8756 = vmatpush3.bf16.msra.mxu1 %v10564_v16  ;;  %v759_v16 = vld [vmem:[%s12291_s8 + $0x218] sm:$0xff] }
  0x5b   : > { %8758 = vmatprep.subr.bf16.mxu1 %v10586_v42  ;;  %1320 = vperm.xlu0 %10080, %v1317_v43   ;;  %v657_v43 = vld [vmem:[%s12284_s1 + $0x28] sm:$0x3]  ;;  %v758_v42 = vld [vmem:[%s12291_s8 + $0x210] sm:$0xff] }
  0x5c   : > { %8776 = vmatpush3.bf16.msra.mxu0 %v10517_v37 }
  0x5d   : > { %8778 = vmatprep.subr.bf16.mxu0 %v10520_v41  ;;  %v660_v41 = vld [vmem:[%s12284_s1 + $0x40] sm:$0x3] }
  0x5e   : > { %8760 = vmatpush3.bf16.msra.mxu1 %v10601_v59 }
  0x5f   : > { %8793 = vmatprep.subr.bf16.mxu1 %v12298_v60  ;;  %4008 = vperm.xlu0 %10080, %v4005_v45  }
  0x60   : > { %8780 = vmatpush3.bf16.msra.mxu0 %v10535_v51 }
  0x61   : > { %8782 = vmatprep.subr.bf16.mxu0 %v10538_v54 }
  0x63   : > { %3069 = vperm.xlu0 %10080, %v3066_v55   ;;  %v628_v55 = vld [vmem:[%s12284_s1 + $0x8] sm:$0x3] }
  0x64   : > { %8784 = vmatpush3.bf16.msra.mxu0 %v10562_v56 }
  0x65   : > { %8786 = vmatprep.subr.bf16.mxu0 %v10575_v28 }
  0x67   : > { %5755 = vperm.xlu0 %10080, %v5752_v61   ;;  %v658_v61 = vld [vmem:[%s12284_s1 + $0x30] sm:$0x3] }
  0x68   : > { %8788 = vmatpush3.bf16.msra.mxu0 %v10595_v50 }
  0x69   : > { %8790 = vmatprep.subr.bf16.mxu0 %v10610_v7  ;;  %v659_v7 = vld [vmem:[%s12284_s1 + $0x38] sm:$0x3] }
  0x6b   : > { %4816 = vperm.xlu0 %10080, %v4813_v2  }
  0x6c   : > { %8792 = vmatpush3.bf16.msra.mxu0 %v10620_v21  ;;  %v629_v21 = vld [vmem:[%s12284_s1 + $0x10] sm:$0x3] }
  0x6d   : > { %8805 = vmatprep.subr.bf16.mxu0 %v12298_v60 }
 0x112   : > { %v481_v45 = vpop.f32.mrb[0].mxu0 }
 0x113   : > { %v635_v2 = vrot.slane %v481_v45, %v10649_v31  ;;  %v665_v10 = vrot.slane %v481_v45, %v10652_v32  ;;  %v483_v0 = vpop.f32.mrb[1].mxu0  ;;  %v630_v45 = vld [vmem:[%s12284_s1 + $0x18] sm:$0x3] }
 0x114   : > { %v552_v60 = vpop.f32.mrb[0].mxu1  ;;  %v639_v50 = vrot.slane %v483_v0, %v10649_v31  ;;  %v669_v28 = vrot.slane %v483_v0, %v10652_v32  ;;  %v756_v0 = vld [vmem:[%s12291_s8 + $0x200] sm:$0xff] }
 0x115   : > { %v643_v56 = vrot.slane %v552_v60, %v10649_v31  ;;  %v673_v54 = vrot.slane %v552_v60, %v10652_v32  ;;  %v554_v51 = vpop.f32.mrb[1].mxu1  ;;  %v652_v37 = vmul.f32 %v635_v2, %v627_v36  ;;  %v682_v25 = vmul.f32 %v665_v10, %v657_v43  ;;  %v757_v60 = vld [vmem:[%s12291_s8 + $0x208] sm:$0xff] }
 0x116   : > { %v647_v24 = vrot.slane %v554_v51, %v10649_v31  ;;  %v677_v15 = vrot.slane %v554_v51, %v10652_v32  ;;  %v653_v11 = vmul.f32 %v639_v50, %v628_v55  ;;  %v683_v58 = vmul.f32 %v669_v28, %v658_v61  ;;  %v985_v55 = vld [vmem:[%s12287_s4 + $0x8] sm:$0xff] }
 0x117   : > { %v654_v52 = vmul.f32 %v643_v56, %v629_v21  ;;  %v684_v59 = vmul.f32 %v673_v54, %v659_v7  ;;  %v10692_v2 = vpack.c.bf16 %v757_v60, %v756_v0  ;;  %v687_v10 = vadd.f32 %v682_v25, %v652_v37  ;;  %v763_v25 = vld [vmem:[%s12291_s8 + $0x238] sm:$0xff]  ;;  %v661_v54 = vld [vmem:[%s12284_s1 + $0x48] sm:$0x3]  ;;  %v984_v21 = vld [vmem:[%s12287_s4] sm:$0xff] }
 0x118   : > { %v655_v38 = vmul.f32 %v647_v24, %v630_v45  ;;  %v685_v33 = vmul.f32 %v677_v15, %v660_v41  ;;  %v688_v43 = vadd.f32 %v683_v58, %v653_v11  ;;  %v12492_v58 = vmov 0.0|0.0   ;;  %v762_v24 = vld [vmem:[%s12291_s8 + $0x230] sm:$0xff]  ;;  %v631_v41 = vld [vmem:[%s12284_s1 + $0x20] sm:$0x3]  ;;  %v987_v0 = vld [vmem:[%s12287_s4 + $0x18] sm:$0xff] }
 0x119   : > { %v689_v36 = vadd.f32 %v684_v59, %v654_v52  ;;  %12490 = vst [vmem:[#allocation48_spill] sm:$0xff] %v10692_v2  ;;  %v10701_v52 = vpack.c.bf16 %v759_v16, %v758_v42  ;;  %v12493_v11 = vmov 0.0   ;;  %v10733_v42 = vpack.c.bf16 %v763_v25, %v762_v24  ;;  %v986_v45 = vld [vmem:[%s12287_s4 + $0x10] sm:$0xff]  ;;  %v988_v60 = vld [vmem:[%s12287_s4 + $0x20] sm:$0xff]  ;;  %v1149_v25 = vld [vmem:[%s12289_s6 + $0x8] sm:$0xff] }
 0x11a   : > { %v690_v51 = vadd.f32 %v685_v33, %v655_v38  ;;  %837 = vmatprep.mubr.f32.mxu1 %v688_v43  ;;  %v760_v33 = vld [vmem:[%s12291_s8 + $0x220] sm:$0xff]  ;;  %v761_v38 = vld [vmem:[%s12291_s8 + $0x228] sm:$0xff]  ;;  %v8806_v61 = vpack.c.bf16 %v985_v55, %v984_v21  ;;  %v768_v21 = vpop.permute.xlu0 %767 }
 0x11b   : > { %838 = vmatmul.mubr.f32.vlgmr.msra.gmra.mrb[2].mxu1 %v687_v10  ;;  %12491 = vst [vmem:[#allocation49_spill] sm:$0xff] %v10701_v52  ;;  %v10715_v15 = vpack.c.bf16 %v761_v38, %v760_v33  ;;  %v989_v43 = vld [vmem:[%s12287_s4 + $0x28] sm:$0xff]  ;;  %v991_v33 = vld [vmem:[%s12287_s4 + $0x38] sm:$0xff]  ;;  %v1148_v24 = vld [vmem:[%s12289_s6] sm:$0xff] }
 0x11c   : > { %907 = vmatprep.mubr.f32.mxu0 %v690_v51  ;;  %8795 = vmatpush3.bf16.msra.mxu1 %v10692_v2  ;;  %v8812_v10 = vpack.c.bf16 %v989_v43, %v988_v60  ;;  %v990_v51 = vld [vmem:[%s12287_s4 + $0x30] sm:$0xff]  ;;  %v1067_v60 = vld [vmem:[%s12287_s4 + $0x48] sm:$0xff] }
 0x11d   : > { %908 = vmatmul.mubr.f32.vlgmr.msra.gmra.mrb[4].mxu0 %v689_v36  ;;  %8796 = vmatprep.subr.bf16.mxu1 %v12492_v58  ;;  %v8809_v36 = vpack.c.bf16 %v987_v0, %v986_v45  ;;  %v8815_v38 = vpack.c.bf16 %v991_v33, %v990_v51  ;;  %v1066_v0 = vld [vmem:[%s12287_s4 + $0x40] sm:$0xff]  ;;  %v1068_v33 = vld [vmem:[%s12287_s4 + $0x50] sm:$0xff] }
 0x11e   : > { %8227 = vmatprep.mubr.msk.f32.mxu1 %vm10145_vm1, %v12493_v11  ;;  %8246 = vmatprep.mubr.msk.f32.mxu0 %vm10145_vm1, %v12493_v11  ;;  %v8818_v43 = vpack.c.bf16 %v1067_v60, %v1066_v0  ;;  %v1229_v0 = vld [vmem:[%s12289_s6 + $0x30] sm:$0xff]  ;;  %v1230_v60 = vld [vmem:[%s12289_s6 + $0x38] sm:$0xff] }
 0x11f   : > { %8807 = vmatpush3.bf16.msra.mxu0 %v8806_v61 }
 0x120   : > { %8798 = vmatpush3.bf16.msra.mxu1 %v10701_v52  ;;  %8808 = vmatprep.subr.bf16.mxu0 %v12492_v58 }
 0x121   : > { %8799 = vmatprep.subr.bf16.mxu1 %v12492_v58 }
 0x122   : > { %v623_v37 = vpop.f32.mrb[2].mxu0 }
 0x123   : > { %v651_v56 = vrot.slane %v623_v37, %v10649_v31  ;;  %v681_v16 = vrot.slane %v623_v37, %v10652_v32  ;;  %v8210_v28 = vpop.f32.mrb[3].mxu0  ;;  %8810 = vmatpush3.bf16.msra.mxu0 %v8809_v36  ;;  %v1150_v37 = vld [vmem:[%s12289_s6 + $0x10] sm:$0xff] }
 0x124   : > { %8801 = vmatpush3.bf16.msra.mxu1 %v10715_v15  ;;  %8811 = vmatprep.subr.bf16.mxu0 %v12492_v58 }
 0x125   : > { %v656_v50 = vmul.f32 %v651_v56, %v631_v41  ;;  %v686_v59 = vmul.f32 %v681_v16, %v661_v54  ;;  %8802 = vmatprep.subr.bf16.mxu1 %v12492_v58  ;;  %v8830_v41 = vpack.c.bf16 %v1149_v25, %v1148_v24  ;;  %v1151_v54 = vld [vmem:[%s12289_s6 + $0x18] sm:$0xff]  ;;  %v1070_v25 = vld [vmem:[%s12287_s4 + $0x60] sm:$0xff] }
 0x126   : > { %v8833_v56 = vpack.c.bf16 %v1151_v54, %v1150_v37  ;;  %v1071_v37 = vld [vmem:[%s12287_s4 + $0x68] sm:$0xff]  ;;  %v1072_v54 = vld [vmem:[%s12287_s4 + $0x70] sm:$0xff] }
 0x127   : > { %v691_v7 = vadd.f32 %v686_v59, %v656_v50  ;;  %8813 = vmatpush3.bf16.msra.mxu0 %v8812_v10 }
 0x128   : > { %8804 = vmatpush3.bf16.msra.mxu1 %v10733_v42  ;;  %8814 = vmatprep.subr.bf16.mxu0 %v12492_v58 }
 0x129   : > { %8829 = vmatprep.subr.bf16.mxu1 %v12492_v58 }
 0x12b   : > { %8228 = vmatmul.mubr.msk.f32.vlgmr.msra.gmra.mrb[4].mxu1 %vm411_vm0, %v691_v7  ;;  %8816 = vmatpush3.bf16.msra.mxu0 %v8815_v38  ;;  %v1069_v38 = vld [vmem:[%s12287_s4 + $0x58] sm:$0xff] }
 0x12c   : > { %8276 = vmatprep.mubr.msk.f32.mxu1 %vm10145_vm1, %v12493_v11  ;;  %8817 = vmatprep.subr.bf16.mxu0 %v12492_v58  ;;  %v8821_v24 = vpack.c.bf16 %v1069_v38, %v1068_v33  ;;  %v1231_v33 = vld [vmem:[%s12290_s7 + $0x1] sm:$0x1] }
 0x12d   : > { %8831 = vmatpush3.bf16.msra.mxu1 %v8830_v41  ;;  %v8824_v41 = vpack.c.bf16 %v1071_v37, %v1070_v25 }
 0x12e   : > { %8832 = vmatprep.subr.bf16.mxu1 %v12492_v58 }
 0x131   : > { %8834 = vmatpush3.bf16.msra.mxu1 %v8833_v56  ;;  %v1073_v56 = vld [vmem:[%s12287_s4 + $0x78] sm:$0xff] }
 0x132   : > { %8835 = vmatprep.subr.bf16.mxu1 %v12492_v58 }
 0x1ee   : > { %v7231_v16 = vpop.f32.mrb[2].mxu1 }
 0x1ef   : > { %v7232_v28 = vpop.f32.mrb[3].mxu1 }
 0x1f0   : > { %v7266_v50 = vpop.f32.mrb[4].mxu0  ;;  %v7233_v59 = vadd.f32 %v7232_v28, %v7231_v16  ;;  %v8827_v16 = vpack.c.bf16 %v1073_v56, %v1072_v54  ;;  %v1316_v56 = vld [vmem:[%s12286_s3] sm:$0x3] }
 0x1f1   : > { %v7267_v7 = vpop.f32.mrb[5].mxu0 }
 0x1f2   : > { %v7268_v55 = vadd.f32 %v7267_v7, %v7266_v50  ;;  %v840_v61 = vadd.f32 %v7233_v59, %v768_v21  ;;  %v1227_v50 = vld [vmem:[%s12289_s6 + $0x20] sm:$0xff]  ;;  %v1228_v59 = vld [vmem:[%s12289_s6 + $0x28] sm:$0xff] }
 0x1f3   : > { %v983_v7 = vld [vmem:[%s12288_s5] sm:$0x1] }
 0x1f4   : > { %v910_v45 = vadd.f32 %v7268_v55, %v840_v61  ;;  %v8836_v55 = vpack.c.bf16 %v1228_v59, %v1227_v50  ;;  %v12495_v50 = vld [vmem:[#allocation42_spill] sm:$0xff]  ;;  %v12496_v59 = vld [vmem:[#allocation21_spill] sm:$0xff] }
 0x1fe   : > { %v979_v36 = vpop.f32.mrb[4].mxu1 }
 0x1ff   : > { %v980_v10 = vadd.f32 %v979_v36, %v910_v45  ;;  %v8229_v51 = vpop.f32.mrb[5].mxu1  ;;  %v8839_v36 = vpack.c.bf16 %v1230_v60, %v1229_v0  ;;  %v12502_v0 = vld [vmem:[#allocation30_spill] sm:$0xff]  ;;  %v12503_v60 = vld [vmem:[#allocation32_spill] sm:$0xff] }
 0x200   : > { %v1152_v51 = vld [vmem:[%s12290_s7] sm:$0x1] }
 0x201   : > { %8247 = vmatmul.mubr.msk.f32.vlgmr.msra.gmra.mrb[6].mxu0 %vm411_vm0, %v980_v10  ;;  %v1074_v28 = vrot.slane %v980_v10, 1 }
 0x202   : > { %8819 = vmatpush3.bf16.msra.mxu0 %v8818_v43  ;;  %8265 = vmatprep.mubr.msk.f32.mxu0 %vm10145_vm1, %v12493_v11 }
 0x203   : > { %8820 = vmatprep.subr.bf16.mxu0 %v12492_v58 }
 0x206   : > { %8822 = vmatpush3.bf16.msra.mxu0 %v8821_v24 }
 0x207   : > { %8823 = vmatprep.subr.bf16.mxu0 %v12492_v58 }
 0x20a   : > { %8825 = vmatpush3.bf16.msra.mxu0 %v8824_v41 }
 0x20b   : > { %8826 = vmatprep.subr.bf16.mxu0 %v12492_v58 }
 0x20e   : > { %8828 = vmatpush3.bf16.msra.mxu0 %v8827_v16 }
 0x20f   : > { %8858 = vmatprep.subr.bf16.mxu0 %v10253_v9 }
 0x211   : > { %8266 = vmatmul.mubr.msk.f32.vlgmr.msra.gmra.mrb[6].mxu0 %vm411_vm0, %v1074_v28  ;;  %v12494_v28 = vld [vmem:[#allocation40_spill] sm:$0xff] }
 0x212   : > { %8860 = vmatpush1.bf16.msra.mxu0 %v10257_v13  ;;  %1538 = vmatprep.mubr.f32.mxu0 %v12493_v11 }
 0x213   : > { %8862 = vmatprep.subr.bf16.mxu0 %v10266_v22 }
 0x216   : > { %8864 = vmatpush1.bf16.msra.mxu0 %v10269_v26 }
 0x217   : > { %8866 = vmatprep.subr.bf16.mxu0 %v10282_v35 }
 0x21a   : > { %8868 = vmatpush1.bf16.msra.mxu0 %v10286_v39 }
 0x21b   : > { %8870 = vmatprep.subr.bf16.mxu0 %v10291_v44 }
 0x21e   : > { %8872 = vmatpush1.bf16.msra.mxu0 %v10299_v48 }
 0x21f   : > { %8886 = vmatprep.subr.bf16.mxu0 %v10313_v53 }
 0x2e4   : > { %v1143_v21 = vpop.f32.mrb[6].mxu0 }
 0x2e5   : > { %v10041_v61 = vadd.f32 %v1143_v21, %v983_v7  ;;  %v8267_v45 = vpop.f32.mrb[7].mxu0  ;;  %v12497_v7 = vld [vmem:[#allocation22_spill] sm:$0xff]  ;;  %v12498_v21 = vld [vmem:[#allocation44_spill] sm:$0xff] }
 0x2e6   : > { %v12501_v45 = vld [vmem:[#allocation29_spill] sm:$0xff] }
 0x2e7   : > { %8277 = vmatmul.mubr.msk.f32.vlgmr.msra.gmra.mrb[6].mxu1 %vm1153_vm2, %v10041_v61 }
 0x2e8   : > { %8837 = vmatpush3.bf16.msra.mxu1 %v8836_v55  ;;  %8287 = vmatprep.mubr.msk.f32.mxu1 %vm10145_vm1, %v12493_v11  ;;  %v12499_v55 = vld [vmem:[#allocation25_spill] sm:$0xff] }
 0x2e9   : > { %8838 = vmatprep.subr.bf16.mxu1 %v12492_v58 }
 0x2ec   : > { %8840 = vmatpush3.bf16.msra.mxu1 %v8839_v36  ;;  %v12504_v36 = vld [vmem:[#allocation33_spill] sm:$0xff] }
 0x2ed   : > { %8290 = vmatprep.subr.mxu1 %v12493_v11 }
 0x2ef   : > { %8288 = vmatmul.mubr.msk.f32.vlgmr.msra.gmra.mrb[8].mxu1 %vm1153_vm2, %v10041_v61  ;;  %v12500_v61 = vld [vmem:[#allocation26_spill] sm:$0xff] }
 0x2f0   : > { %8292 = vmatprep.mubr.msk.f32.mxu1 %vm10145_vm1, %v12493_v11 }
 0x3ba   : > { %v1223_v43 = vpop.f32.mrb[6].mxu1 }
 0x3bb   : > { %v8278_v10 = vpop.f32.mrb[7].mxu1  ;;  %v1224_v38 = vadd.f32 %v1223_v43, %v1152_v51  ;;  %v12505_v43 = vld [vmem:[#allocation34_spill] sm:$0xff]  ;;  %v12507_v51 = vld [vmem:[#allocation36_spill] sm:$0xff] }
 0x3bc   : > { %v12506_v10 = vld [vmem:[#allocation35_spill] sm:$0xff] }
 0x3bd   : > { %v1310_v41 = vrot.slane %v1224_v38, %v10649_v31  ;;  %v12509_v38 = vld [vmem:[#allocation39_spill] sm:$0xff] }
 0x3c2   : > { %v1298_v24 = vpop.f32.mrb[8].mxu1 }
 0x3c3   : > { %v1299_v25 = vadd.f32 %v1298_v24, %v1231_v33  ;;  %v8289_v37 = vpop.f32.mrb[9].mxu1  ;;  %v12508_v33 = vld [vmem:[#allocation37_spill] sm:$0xff] }
 0x3c4   : > { %v12510_v24 = vld [vmem:[#allocation41_spill] sm:$0xff] }
 0x3c5   : > { %v1314_v54 = vrot.slane %v1299_v25, %v10649_v31  ;;  %v12511_v25 = vld [vmem:[#allocation43_spill] sm:$0xff]  ;;  %v12512_v37 = vld [vmem:[#allocation45_spill] sm:$0xff] }
 0x3c7   : > { %v1315_v16 = vsel %vm1304_vm3, %v1310_v41, %v1314_v54  ;;  %v12513_v41 = vld [vmem:[#allocation46_spill] sm:$0xff] }
 0x3c8   : > { %8291 = vmatpush3.msk.msra.mxu1 %vm1327_vm4, %v1315_v16  ;;  %7145 = vmatmul.mubr.msk.f32.vlgmr.msra.gmra.mrb[8].mxu0 %vm411_vm0, %v1315_v16 }
 0x3c9   : > { %8842 = vmatprep.subr.bf16.mxu1 %v10249_v4  ;;  %8293 = vmatmul.mubr.msk.f32.vlgmr.msra.gmra.mrb[10].mxu1 %vm1323_vm5, %v1316_v56  ;;  %v1617_v56 = vld [vmem:[%s12284_s1 + $0x60] sm:$0xf] }
 0x3ca   : > { %8844 = vmatpush1.bf16.msra.mxu1 %v10251_v8  ;;  %1467 = vmatprep.mubr.f32.mxu1 %v12493_v11 }
 0x3cb   : > { %8846 = vmatprep.subr.bf16.mxu1 %v10261_v17  ;;  %8888 = vmatpush3.bf16.msra.mxu0 %v10335_v63 }
 0x3cc   : > { %8890 = vmatprep.subr.bf16.mxu0 %v10339_v1 }
 0x3ce   : > { %8848 = vmatpush1.bf16.msra.mxu1 %v10263_v18 }
 0x3cf   : > { %8850 = vmatprep.subr.bf16.mxu1 %v10271_v27  ;;  %8892 = vmatpush3.bf16.msra.mxu0 %v10362_v12 }
 0x3d0   : > { %8894 = vmatprep.subr.bf16.mxu0 %v10365_v14 }
 0x3d2   : > { %8852 = vmatpush1.bf16.msra.mxu1 %v10280_v34 }
 0x3d3   : > { %8854 = vmatprep.subr.bf16.mxu1 %v10288_v40  ;;  %8896 = vmatpush3.bf16.msra.mxu0 %v10390_v29 }
 0x3d4   : > { %8898 = vmatprep.subr.bf16.mxu0 %v10393_v30 }
 0x3d6   : > { %8856 = vmatpush1.bf16.msra.mxu1 %v10295_v47 }
 0x3d7   : > { %8873 = vmatprep.subr.bf16.mxu1 %v12492_v58  ;;  %8900 = vmatpush3.bf16.msra.mxu0 %v10426_v46 }
 0x3d8   : > { %8902 = vmatprep.subr.bf16.mxu0 %v10429_v49 }
 0x3d9   : > { %7144 = vmatmul.mubr.msk.f32.vlgmr.msra.gmra.mrb[12].mxu1 %vm411_vm0, %v1315_v16 }
 0x3da   : > { %8875 = vmatpush3.bf16.msra.mxu1 %v10324_v57  ;;  %8311 = vmatprep.mubr.msk.f32.mxu1 %vm10145_vm1, %v12493_v11 }
 0x3db   : > { %8876 = vmatprep.subr.bf16.mxu1 %v12492_v58  ;;  %8904 = vmatpush3.bf16.msra.mxu0 %v10462_v3 }
 0x3dc   : > { %8906 = vmatprep.subr.bf16.mxu0 %v10467_v6 }
 0x3de   : > { %8878 = vmatpush3.bf16.msra.mxu1 %v10350_v5 }
 0x3df   : > { %8879 = vmatprep.subr.bf16.mxu1 %v12492_v58  ;;  %8908 = vmatpush3.bf16.msra.mxu0 %v10494_v23 }
 0x3e0   : > { %8910 = vmatprep.subr.bf16.mxu0 %v10551_v62 }
 0x3e2   : > { %8881 = vmatpush3.bf16.msra.mxu1 %v10374_v19 }
 0x3e3   : > { %8882 = vmatprep.subr.bf16.mxu1 %v12492_v58  ;;  %8912 = vmatpush3.bf16.msra.mxu0 %v12494_v28 }
 0x3e4   : > { %8914 = vmatprep.subr.bf16.mxu0 %v12495_v50 }
 0x3e6   : > { %8884 = vmatpush3.bf16.msra.mxu1 %v12496_v59 }
 0x3e7   : > { %8918 = vmatprep.subr.bf16.mxu1 %v12497_v7  ;;  %8916 = vmatpush3.bf16.msra.mxu0 %v12498_v21 }
 0x3e8   : > { %8949 = vmatprep.subr.bf16.mxu0 %v12492_v58 }
 0x3e9   : > { %8312 = vmatmul.mubr.msk.f32.vlgmr.msra.gmra.mrb[14].mxu1 %vm411_vm0, %v1315_v16  ;;  %v1647_v16 = vld [vmem:[%s12284_s1 + $0x88] sm:$0xf] }
 0x3ea   : > { %8920 = vmatpush3.bf16.msra.mxu1 %v12499_v55 }
 0x3eb   : > { %8922 = vmatprep.subr.bf16.mxu1 %v12500_v61 }
 0x3ee   : > { %8924 = vmatpush3.bf16.msra.mxu1 %v12501_v45 }
 0x3ef   : > { %8926 = vmatprep.subr.bf16.mxu1 %v12502_v0 }
 0x3f2   : > { %8928 = vmatpush3.bf16.msra.mxu1 %v12503_v60 }
 0x3f3   : > { %8930 = vmatprep.subr.bf16.mxu1 %v12504_v36 }
 0x3f6   : > { %8932 = vmatpush3.bf16.msra.mxu1 %v12505_v43 }
 0x3f7   : > { %8934 = vmatprep.subr.bf16.mxu1 %v12506_v10 }
 0x3fa   : > { %8936 = vmatpush3.bf16.msra.mxu1 %v12507_v51 }
 0x3fb   : > { %8938 = vmatprep.subr.bf16.mxu1 %v12508_v33 }
 0x3fe   : > { %8940 = vmatpush3.bf16.msra.mxu1 %v12509_v38 }
 0x3ff   : > { %8942 = vmatprep.subr.bf16.mxu1 %v12510_v24 }
 0x402   : > { %8944 = vmatpush3.bf16.msra.mxu1 %v12511_v25 }
 0x403   : > { %8946 = vmatprep.subr.bf16.mxu1 %v12512_v37 }
 0x406   : > { %8948 = vmatpush3.bf16.msra.mxu1 %v12513_v41  ;;  %v1618_v41 = vld [vmem:[%s12284_s1 + $0x68] sm:$0xf] }
 0x407   : > { %8962 = vmatprep.subr.bf16.mxu1 %v10249_v4  ;;  %v1648_v4 = vld [vmem:[%s12284_s1 + $0x90] sm:$0xf] }
 0x49b   : > { %v1540_v54 = vpop.f32.mrb[8].mxu0 }
 0x49c   : > { %v1631_v20 = vrot.slane %v1540_v54, %v10649_v31  ;;  %v1661_v24 = vrot.slane %v1540_v54, %v10652_v32  ;;  %v1542_v25 = vpop.f32.mrb[9].mxu0 }
 0x49d   : > { %v1635_v37 = vrot.slane %v1542_v25, %v10649_v31  ;;  %v1665_v38 = vrot.slane %v1542_v25, %v10652_v32 }
 0x49e   : > { %v1642_v33 = vmul.f32 %v1631_v20, %v1617_v56  ;;  %v1672_v51 = vmul.f32 %v1661_v24, %v1647_v16  ;;  %v1615_v20 = vld [vmem:[%s12284_s1 + $0x50] sm:$0xf] }
 0x49f   : > { %v1643_v21 = vmul.f32 %v1635_v37, %v1618_v41  ;;  %v1673_v10 = vmul.f32 %v1665_v38, %v1648_v4  ;;  %v1645_v4 = vld [vmem:[%s12284_s1 + $0x78] sm:$0xf] }
 0x4a0   : > { %v1677_v50 = vadd.f32 %v1672_v51, %v1642_v33  ;;  %v1646_v51 = vld [vmem:[%s12284_s1 + $0x80] sm:$0xf] }
 0x4a1   : > { %v1678_v43 = vadd.f32 %v1673_v10, %v1643_v21  ;;  %v1616_v10 = vld [vmem:[%s12284_s1 + $0x58] sm:$0xf] }
 0x4a3   : > { %1823 = vmatprep.mubr.f32.mxu1 %v1678_v43 }
 0x4a4   : > { %1824 = vmatmul.mubr.f32.vlgmr.msra.gmra.mrb[16].mxu1 %v1677_v50 }
 0x4a5   : > { %8964 = vmatpush1.bf16.msra.mxu1 %v10251_v8  ;;  %1975 = vmatprep.mubr.f32.mxu1 %v12493_v11 }
 0x4a6   : > { %8966 = vmatprep.subr.bf16.mxu1 %v10261_v17 }
 0x4a9   : > { %8968 = vmatpush1.bf16.msra.mxu1 %v10263_v18 }
 0x4aa   : > { %8970 = vmatprep.subr.bf16.mxu1 %v10271_v27 }
 0x4ac   : > { %v1469_v54 = vpop.f32.mrb[12].mxu1 }
 0x4ad   : > { %v1623_v50 = vrot.slane %v1469_v54, %v10649_v31  ;;  %v1653_v21 = vrot.slane %v1469_v54, %v10652_v32  ;;  %v1471_v43 = vpop.f32.mrb[13].mxu1  ;;  %8972 = vmatpush1.bf16.msra.mxu1 %v10280_v34 }
 0x4ae   : > { %v1627_v33 = vrot.slane %v1471_v43, %v10649_v31  ;;  %v1657_v38 = vrot.slane %v1471_v43, %v10652_v32  ;;  %8974 = vmatprep.subr.bf16.mxu1 %v10288_v40 }
 0x4af   : > { %v1640_v24 = vmul.f32 %v1623_v50, %v1615_v20  ;;  %v1670_v25 = vmul.f32 %v1653_v21, %v1645_v4  ;;  %v1619_v20 = vld [vmem:[%s12284_s1 + $0x70] sm:$0xf]  ;;  %v1649_v4 = vld [vmem:[%s12284_s1 + $0x98] sm:$0xf] }
 0x4b0   : > { %v1641_v37 = vmul.f32 %v1627_v33, %v1616_v10  ;;  %v1671_v41 = vmul.f32 %v1657_v38, %v1646_v51 }
 0x4b1   : > { %8976 = vmatpush1.bf16.msra.mxu1 %v10295_v47  ;;  %v1675_v16 = vadd.f32 %v1670_v25, %v1640_v24 }
 0x4b2   : > { %v1676_v56 = vadd.f32 %v1671_v41, %v1641_v37  ;;  %8993 = vmatprep.subr.bf16.mxu1 %v12492_v58 }
 0x4b4   : > { %1753 = vmatprep.mubr.f32.mxu0 %v1676_v56 }
 0x4b5   : > { %1754 = vmatmul.mubr.f32.vlgmr.msra.gmra.mrb[10].mxu0 %v1675_v16  ;;  %v1684_v16 = vpop.permute.xlu0 %1683 }
 0x4b6   : > { %8951 = vmatpush3.bf16.msra.mxu0 %v10692_v2  ;;  %8330 = vmatprep.mubr.msk.f32.mxu0 %vm10145_vm1, %v12493_v11 }
 0x4b7   : > { %8952 = vmatprep.subr.bf16.mxu0 %v12492_v58 }
 0x4ba   : > { %8954 = vmatpush3.bf16.msra.mxu0 %v10701_v52 }
 0x4bb   : > { %8955 = vmatprep.subr.bf16.mxu0 %v12492_v58 }
 0x4bc   : > { %v1611_v54 = vpop.f32.mrb[14].mxu1 }
 0x4bd   : > { %v1639_v50 = vrot.slane %v1611_v54, %v10649_v31  ;;  %v1669_v21 = vrot.slane %v1611_v54, %v10652_v32  ;;  %v8313_v43 = vpop.f32.mrb[15].mxu1 }
 0x4be   : > { %8957 = vmatpush3.bf16.msra.mxu0 %v10715_v15 }
 0x4bf   : > { %v1644_v10 = vmul.f32 %v1639_v50, %v1619_v20  ;;  %v1674_v51 = vmul.f32 %v1669_v21, %v1649_v4  ;;  %8958 = vmatprep.subr.bf16.mxu0 %v12492_v58 }
 0x4c1   : > { %v1679_v33 = vadd.f32 %v1674_v51, %v1644_v10 }
 0x4c2   : > { %8960 = vmatpush3.bf16.msra.mxu0 %v10733_v42 }
 0x4c3   : > { %8978 = vmatprep.subr.bf16.mxu0 %v10253_v9 }
 0x4c5   : > { %8331 = vmatmul.mubr.msk.f32.vlgmr.msra.gmra.mrb[12].mxu0 %vm411_vm0, %v1679_v33 }
 0x4c6   : > { %8980 = vmatpush1.bf16.msra.mxu0 %v10257_v13  ;;  %2046 = vmatprep.mubr.f32.mxu0 %v12493_v11 }
 0x4c7   : > { %8982 = vmatprep.subr.bf16.mxu0 %v10266_v22 }
 0x4ca   : > { %8984 = vmatpush1.bf16.msra.mxu0 %v10269_v26 }
 0x4cb   : > { %8986 = vmatprep.subr.bf16.mxu0 %v10282_v35 }
 0x4ce   : > { %8988 = vmatpush1.bf16.msra.mxu0 %v10286_v39 }
 0x4cf   : > { %8990 = vmatprep.subr.bf16.mxu0 %v10291_v44 }
 0x4d2   : > { %8992 = vmatpush1.bf16.msra.mxu0 %v10299_v48 }
 0x4d3   : > { %9006 = vmatprep.subr.bf16.mxu0 %v10313_v53 }
 0x577   : > { %v7384_v38 = vpop.f32.mrb[16].mxu1 }
 0x578   : > { %v7385_v24 = vpop.f32.mrb[17].mxu1 }
 0x579   : > { %v7386_v25 = vadd.f32 %v7385_v24, %v7384_v38  ;;  %v12519_v38 = vld [vmem:[#allocation37_spill] sm:$0xff]  ;;  %v12520_v24 = vld [vmem:[#allocation39_spill] sm:$0xff] }
 0x588   : > { %v7349_v37 = vpop.f32.mrb[10].mxu0 }
 0x589   : > { %v7350_v41 = vpop.f32.mrb[11].mxu0 }
 0x58a   : > { %v7351_v56 = vadd.f32 %v7350_v41, %v7349_v37  ;;  %v12522_v37 = vld [vmem:[#allocation43_spill] sm:$0xff]  ;;  %v12523_v41 = vld [vmem:[#allocation45_spill] sm:$0xff] }
 0x58c   : > { %v1756_v54 = vadd.f32 %v7351_v56, %v1684_v16  ;;  %v12524_v56 = vld [vmem:[#allocation46_spill] sm:$0xff]  ;;  %v12525_v16 = vld [vmem:[#allocation5_spill] sm:$0xff] }
 0x58e   : > { %v1826_v20 = vadd.f32 %v7386_v25, %v1756_v54  ;;  %v12521_v25 = vld [vmem:[#allocation41_spill] sm:$0xff]  ;;  %v2258_v54 = vld [vmem:[%s12285_s2 + $0x8] sm:$0xf] }
 0x58f   : > { %2261 = vperm.xlu1 %10081, %v2258_v54   ;;  %v2153_v54 = vld [vmem:[%s12284_s1 + $0xc8] sm:$0xf] }
 0x598   : > { %v1895_v4 = vpop.f32.mrb[12].mxu0 }
 0x599   : > { %v1896_v50 = vadd.f32 %v1895_v4, %v1826_v20  ;;  %v8332_v21 = vpop.f32.mrb[13].mxu0  ;;  %v2836_v20 = vld [vmem:[%s12285_s2 + $0xc] sm:$0x3]  ;;  %v3427_v4 = vld [vmem:[%s12285_s2 + $0x10] sm:$0xf] }
 0x59a   : > { %2839 = vperm.xlu1 %10081, %v2836_v20   ;;  %v5174_v21 = vld [vmem:[%s12285_s2 + $0x1c] sm:$0xf]  ;;  %v12526_v20 = vld [vmem:[#allocation47_spill] sm:$0xff] }
 0x59b   : > { %v1900_v43 = vmul.f32 0.044715, %v1896_v50  ;;  %v1899_v53 = vmul.f32 0.5, %v1896_v50 }
 0x59d   : > { %v1901_v10 = vmul.f32 %v1900_v43, %v1896_v50  ;;  %v6330_v43 = vld [vmem:[%s12285_s2 + $0x24] sm:$0x3] }
 0x59e   : > { %3430 = vperm.xlu1 %10081, %v3427_v4   ;;  %v11056_v4 = vsub.s32 2, %v12526_v20 }
 0x59f   : > { %v1902_v51 = vmul.f32 %v1901_v10, %v1896_v50  ;;  %v6839_v10 = vld [vmem:[%s12285_s2 + $0x26] sm:$0x3] }
 0x5a0   : > { %12527 = vst [vmem:[#allocation47_spill] sm:$0xff] %v11056_v4 }
 0x5a1   : > { %v1903_v33 = vadd.f32 %v1902_v51, %v1896_v50  ;;  %v4583_v50 = vld [vmem:[%s12285_s2 + $0x18] sm:$0x3]  ;;  %v2123_v51 = vld [vmem:[%s12284_s1 + $0xa0] sm:$0xf] }
 0x5a2   : > { %4586 = vperm.xlu1 %10081, %v4583_v50   ;;  %v11059_v50 = vsub.s32 3, %v12526_v20 }
 0x5a3   : > { %v1904_v44 = vmul.f32 0.7978846, %v1903_v33 }
 0x5a4   : > { %12528 = vst [vmem:[#allocation50_spill] sm:$0xff] %v11059_v50 }
 0x5a5   : > { %10082 = vtanh.f32 %v1904_v44  ;;  %v12516_v44 = vld [vmem:[#allocation35_spill] sm:$0xff] }
 0x5a6   : > { %5177 = vperm.xlu1 %10081, %v5174_v21  }
 0x5aa   : > { %6333 = vperm.xlu1 %10081, %v6330_v43  }
 0x5ae   : > { %6842 = vperm.xlu1 %10081, %v6839_v10  }
 0x5af   : > { %v10083_v48 = vpop.eup %10082 }
 0x5b0   : > { %v1906_v39 = vadd.f32 1.0, %v10083_v48  ;;  %v12517_v48 = vld [vmem:[#allocation44_spill] sm:$0xff] }
 0x5b2   : > { %v1907_v35 = vmul.f32 %v1906_v39, %v1899_v53  ;;  %v12515_v39 = vld [vmem:[#allocation34_spill] sm:$0xff]  ;;  %v12518_v53 = vld [vmem:[#allocation36_spill] sm:$0xff] }
 0x5b4   : > { %7148 = vmatmul.mubr.msk.f32.vlgmr.msra.gmra.mrb[18].mxu1 %vm411_vm0, %v1907_v35  ;;  %7149 = vmatmul.mubr.msk.f32.vlgmr.msra.gmra.mrb[14].mxu0 %vm411_vm0, %v1907_v35 }
 0x5b5   : > { %8995 = vmatpush3.bf16.msra.mxu1 %v10324_v57  ;;  %8349 = vmatprep.mubr.msk.f32.mxu1 %vm10145_vm1, %v12493_v11 }
 0x5b6   : > { %8996 = vmatprep.subr.bf16.mxu1 %v12492_v58  ;;  %9008 = vmatpush3.bf16.msra.mxu0 %v10335_v63 }
 0x5b7   : > { %9010 = vmatprep.subr.bf16.mxu0 %v10339_v1 }
 0x5b9   : > { %8998 = vmatpush3.bf16.msra.mxu1 %v10350_v5 }
 0x5ba   : > { %8999 = vmatprep.subr.bf16.mxu1 %v12492_v58  ;;  %9012 = vmatpush3.bf16.msra.mxu0 %v10362_v12 }
 0x5bb   : > { %9014 = vmatprep.subr.bf16.mxu0 %v10365_v14 }
 0x5bd   : > { %9001 = vmatpush3.bf16.msra.mxu1 %v10374_v19 }
 0x5be   : > { %9002 = vmatprep.subr.bf16.mxu1 %v12492_v58  ;;  %9016 = vmatpush3.bf16.msra.mxu0 %v10390_v29 }
 0x5bf   : > { %9018 = vmatprep.subr.bf16.mxu0 %v10393_v30 }
 0x5c1   : > { %9004 = vmatpush3.bf16.msra.mxu1 %v12496_v59 }
 0x5c2   : > { %9038 = vmatprep.subr.bf16.mxu1 %v12497_v7  ;;  %9020 = vmatpush3.bf16.msra.mxu0 %v10426_v46 }
 0x5c3   : > { %9022 = vmatprep.subr.bf16.mxu0 %v10429_v49 }
 0x5c4   : > { %8350 = vmatmul.mubr.msk.f32.vlgmr.msra.gmra.mrb[20].mxu1 %vm411_vm0, %v1907_v35  ;;  %v12514_v35 = vld [vmem:[#allocation42_spill] sm:$0xff] }
 0x5c5   : > { %9040 = vmatpush3.bf16.msra.mxu1 %v12499_v55  ;;  %v2224_v55 = vld [vmem:[%s12284_s1 + $0x120] sm:$0xf] }
 0x5c6   : > { %9042 = vmatprep.subr.bf16.mxu1 %v12500_v61  ;;  %9024 = vmatpush3.bf16.msra.mxu0 %v10462_v3 }
 0x5c7   : > { %9026 = vmatprep.subr.bf16.mxu0 %v10467_v6 }
 0x5c9   : > { %9044 = vmatpush3.bf16.msra.mxu1 %v12501_v45 }
 0x5ca   : > { %9046 = vmatprep.subr.bf16.mxu1 %v12502_v0  ;;  %9028 = vmatpush3.bf16.msra.mxu0 %v10494_v23 }
 0x5cb   : > { %9030 = vmatprep.subr.bf16.mxu0 %v10551_v62 }
 0x5cd   : > { %9048 = vmatpush3.bf16.msra.mxu1 %v12503_v60  ;;  %v2189_v60 = vld [vmem:[%s12284_s1 + $0xf8] sm:$0xf] }
 0x5ce   : > { %9050 = vmatprep.subr.bf16.mxu1 %v12504_v36  ;;  %9032 = vmatpush3.bf16.msra.mxu0 %v12494_v28  ;;  %v2154_v28 = vld [vmem:[%s12284_s1 + $0xd0] sm:$0xf] }
 0x5cf   : > { %9034 = vmatprep.subr.bf16.mxu0 %v12514_v35  ;;  %v2124_v35 = vld [vmem:[%s12284_s1 + $0xa8] sm:$0xf]  ;;  %v2188_v36 = vld [vmem:[%s12284_s1 + $0xf0] sm:$0xf] }
 0x5d1   : > { %9052 = vmatpush3.bf16.msra.mxu1 %v12515_v39 }
 0x5d2   : > { %9054 = vmatprep.subr.bf16.mxu1 %v12516_v44  ;;  %9036 = vmatpush3.bf16.msra.mxu0 %v12517_v48 }
 0x5d3   : > { %9069 = vmatprep.subr.bf16.mxu0 %v12492_v58 }
 0x5d5   : > { %9056 = vmatpush3.bf16.msra.mxu1 %v12518_v53 }
 0x5d6   : > { %9058 = vmatprep.subr.bf16.mxu1 %v12519_v38 }
 0x5d9   : > { %9060 = vmatpush3.bf16.msra.mxu1 %v12520_v24 }
 0x5da   : > { %9062 = vmatprep.subr.bf16.mxu1 %v12521_v25 }
 0x5dd   : > { %9064 = vmatpush3.bf16.msra.mxu1 %v12522_v37 }
 0x5de   : > { %9066 = vmatprep.subr.bf16.mxu1 %v12523_v41  ;;  %v2155_v41 = vld [vmem:[%s12284_s1 + $0xd8] sm:$0xf] }
 0x5e1   : > { %9068 = vmatpush3.bf16.msra.mxu1 %v12524_v56  ;;  %v2125_v56 = vld [vmem:[%s12284_s1 + $0xb0] sm:$0xf] }
 0x5e2   : > { %9082 = vmatprep.subr.bf16.mxu1 %v12525_v16 }
 0x687   : > { %v1977_v33 = vpop.f32.mrb[18].mxu1  ;;  %v2048_v21 = vpop.f32.mrb[14].mxu0 }
 0x688   : > { %v2131_v43 = vrot.slane %v1977_v33, %v10649_v31  ;;  %v2161_v10 = vrot.slane %v1977_v33, %v10652_v32  ;;  %v1979_v37 = vpop.f32.mrb[19].mxu1  ;;  %v2050_v25 = vpop.f32.mrb[15].mxu0  ;;  %v2139_v24 = vrot.slane %v2048_v21, %v10649_v31  ;;  %v2169_v20 = vrot.slane %v2048_v21, %v10652_v32 }
 0x689   : > { %v2196_v16 = vrot.slane %v1977_v33, %v11056_v4  ;;  %v2231_v48 = vrot.slane %v1977_v33, %v11059_v50  ;;  %v2165_v33 = vrot.slane %v1979_v37, %v10652_v32  ;;  %v2143_v62 = vrot.slane %v2050_v25, %v10649_v31 }
 0x68a   : > { %v2148_v38 = vmul.f32 %v2131_v43, %v2123_v51  ;;  %v2178_v53 = vmul.f32 %v2161_v10, %v2153_v54  ;;  %v2150_v44 = vmul.f32 %v2139_v24, %v2125_v56  ;;  %v2180_v39 = vmul.f32 %v2169_v20, %v2155_v41  ;;  %v2126_v41 = vld [vmem:[%s12284_s1 + $0xb8] sm:$0xf]  ;;  %v2156_v56 = vld [vmem:[%s12284_s1 + $0xe0] sm:$0xf] }
 0x68b   : > { %v2204_v51 = vrot.slane %v2048_v21, %v11056_v4  ;;  %v2135_v54 = vrot.slane %v1979_v37, %v10649_v31  ;;  %v2200_v24 = vrot.slane %v1979_v37, %v11056_v4  ;;  %v2190_v20 = vld [vmem:[%s12284_s1 + $0x100] sm:$0xf]  ;;  %v2173_v23 = vrot.slane %v2050_v25, %v10652_v32 }
 0x68c   : > { %v2183_v43 = vadd.f32 %v2178_v53, %v2148_v38  ;;  %v2185_v10 = vadd.f32 %v2180_v39, %v2150_v44  ;;  %v2179_v45 = vmul.f32 %v2165_v33, %v2154_v28  ;;  %v2235_v6 = vrot.slane %v1979_v37, %v11059_v50  ;;  %v2191_v39 = vld [vmem:[%s12284_s1 + $0x108] sm:$0xf]  ;;  %v2223_v28 = vld [vmem:[%s12284_s1 + $0x118] sm:$0xf] }
 0x68d   : > { %v2149_v0 = vmul.f32 %v2135_v54, %v2124_v35  ;;  %v2208_v44 = vrot.slane %v2050_v25, %v11056_v4  ;;  %v2213_v53 = vmul.f32 %v2196_v16, %v2188_v36  ;;  %v2151_v38 = vmul.f32 %v2143_v62, %v2126_v41  ;;  %v2226_v62 = vld [vmem:[%s12284_s1 + $0x130] sm:$0xf] }
 0x68e   : > { %v2181_v3 = vmul.f32 %v2173_v23, %v2156_v56  ;;  %v2243_v61 = vrot.slane %v2050_v25, %v11059_v50  ;;  %v2215_v35 = vmul.f32 %v2204_v51, %v2190_v20  ;;  %v2239_v37 = vrot.slane %v2048_v21, %v11059_v50  ;;  %v2225_v23 = vld [vmem:[%s12284_s1 + $0x128] sm:$0xf] }
 0x68f   : > { %v2214_v54 = vmul.f32 %v2200_v24, %v2189_v60  ;;  %v2184_v33 = vadd.f32 %v2179_v45, %v2149_v0  ;;  %v2216_v36 = vmul.f32 %v2208_v44, %v2191_v39  ;;  %v2218_v16 = vadd.f32 %v2213_v53, %v2183_v43 }
 0x690   : > { %v2186_v25 = vadd.f32 %v2181_v3, %v2151_v38  ;;  %v2249_v56 = vmul.f32 %v2235_v6, %v2224_v55  ;;  %v2220_v49 = vadd.f32 %v2215_v35, %v2185_v10  ;;  %v2248_v46 = vmul.f32 %v2231_v48, %v2223_v28  ;;  %v2127_v3 = vld [vmem:[%s12284_s1 + $0xc0] sm:$0xf]  ;;  %v2157_v6 = vld [vmem:[%s12284_s1 + $0xe8] sm:$0xf]  ;;  %v2192_v10 = vld [vmem:[%s12284_s1 + $0x110] sm:$0xf] }
 0x691   : > { %v2219_v41 = vadd.f32 %v2214_v54, %v2184_v33  ;;  %v2251_v20 = vmul.f32 %v2243_v61, %v2226_v62  ;;  %v2250_v21 = vmul.f32 %v2239_v37, %v2225_v23  ;;  %v2227_v38 = vld [vmem:[%s12284_s1 + $0x138] sm:$0xf]  ;;  %v12530_v54 = vld [vmem:[#allocation7_spill] sm:$0xff]  ;;  %v12532_v62 = vld [vmem:[#allocation10_spill] sm:$0xff] }
 0x692   : > { %v2221_v51 = vadd.f32 %v2216_v36, %v2186_v25  ;;  %v2253_v0 = vadd.f32 %v2248_v46, %v2218_v16  ;;  %v12531_v33 = vld [vmem:[#allocation8_spill] sm:$0xff]  ;;  %v12533_v23 = vld [vmem:[#allocation11_spill] sm:$0xff] }
 0x693   : > { %v2254_v60 = vadd.f32 %v2249_v56, %v2219_v41  ;;  %v2255_v24 = vadd.f32 %v2250_v21, %v2220_v49 }
 0x694   : > { %v2256_v45 = vadd.f32 %v2251_v20, %v2221_v51  ;;  %v2262_v51 = vpop.permute.xlu1 %2261 }
 0x695   : > { %2331 = vmatprep.mubr.f32.mxu0 %v2254_v60 }
 0x696   : > { %2401 = vmatprep.mubr.f32.mxu1 %v2256_v45  ;;  %2332 = vmatmul.mubr.f32.vlgmr.msra.gmra.mrb[16].mxu0 %v2253_v0 }
 0x697   : > { %v2119_v7 = vpop.f32.mrb[20].mxu1  ;;  %2402 = vmatmul.mubr.f32.vlgmr.msra.gmra.mrb[22].mxu1 %v2255_v24  ;;  %9071 = vmatpush3.bf16.msra.mxu0 %v10692_v2 }
 0x698   : > { %v2147_v55 = vrot.slane %v2119_v7, %v10649_v31  ;;  %v2177_v46 = vrot.slane %v2119_v7, %v10652_v32  ;;  %v8351_v61 = vpop.f32.mrb[21].mxu1  ;;  %9072 = vmatprep.subr.bf16.mxu0 %v12492_v58  ;;  %8368 = vmatprep.mubr.msk.f32.mxu0 %vm10145_vm1, %v12493_v11  ;;  %v2212_v43 = vrot.slane %v2119_v7, %v11056_v4 }
 0x699   : > { %9084 = vmatpush1.bf16.msra.mxu1 %v10251_v8  ;;  %2553 = vmatprep.mubr.f32.mxu1 %v12493_v11  ;;  %v2247_v53 = vrot.slane %v2119_v7, %v11059_v50  ;;  %v12529_v7 = vld [vmem:[#allocation6_spill] sm:$0xff] }
 0x69a   : > { %v2152_v49 = vmul.f32 %v2147_v55, %v2127_v3  ;;  %v2182_v48 = vmul.f32 %v2177_v46, %v2157_v6  ;;  %9086 = vmatprep.subr.bf16.mxu1 %v10261_v17  ;;  %v2217_v44 = vmul.f32 %v2212_v43, %v2192_v10 }
 0x69b   : > { %9074 = vmatpush3.bf16.msra.mxu0 %v10701_v52  ;;  %v2252_v35 = vmul.f32 %v2247_v53, %v2227_v38  ;;  %v12536_v53 = vld [vmem:[#allocation24_spill] sm:$0xff]  ;;  %v12537_v38 = vld [vmem:[#allocation25_spill] sm:$0xff] }
 0x69c   : > { %v2187_v39 = vadd.f32 %v2182_v48, %v2152_v49  ;;  %9075 = vmatprep.subr.bf16.mxu0 %v12492_v58 }
 0x69d   : > { %9088 = vmatpush1.bf16.msra.mxu1 %v10263_v18 }
 0x69e   : > { %9090 = vmatprep.subr.bf16.mxu1 %v10271_v27  ;;  %v2222_v28 = vadd.f32 %v2217_v44, %v2187_v39  ;;  %v12534_v39 = vld [vmem:[#allocation22_spill] sm:$0xff]  ;;  %v12535_v44 = vld [vmem:[#allocation23_spill] sm:$0xff] }
 0x69f   : > { %9077 = vmatpush3.bf16.msra.mxu0 %v10715_v15 }
 0x6a0   : > { %9078 = vmatprep.subr.bf16.mxu0 %v12492_v58  ;;  %v2257_v37 = vadd.f32 %v2252_v35, %v2222_v28  ;;  %v12538_v28 = vld [vmem:[#allocation26_spill] sm:$0xff]  ;;  %v12539_v35 = vld [vmem:[#allocation27_spill] sm:$0xff] }
 0x6a1   : > { %9092 = vmatpush1.bf16.msra.mxu1 %v10280_v34 }
 0x6a2   : > { %9094 = vmatprep.subr.bf16.mxu1 %v10288_v40 }
 0x6a3   : > { %9080 = vmatpush3.bf16.msra.mxu0 %v10733_v42 }
 0x6a4   : > { %9098 = vmatprep.subr.bf16.mxu0 %v10253_v9 }
 0x6a5   : > { %9096 = vmatpush1.bf16.msra.mxu1 %v10295_v47 }
 0x6a6   : > { %8369 = vmatmul.mubr.msk.f32.vlgmr.msra.gmra.mrb[18].mxu0 %vm411_vm0, %v2257_v37  ;;  %9113 = vmatprep.subr.bf16.mxu1 %v12492_v58  ;;  %v12540_v37 = vld [vmem:[#allocation28_spill] sm:$0xff] }
 0x6a7   : > { %9100 = vmatpush1.bf16.msra.mxu0 %v10257_v13  ;;  %2624 = vmatprep.mubr.f32.mxu0 %v12493_v11 }
 0x6a8   : > { %9102 = vmatprep.subr.bf16.mxu0 %v10266_v22 }
 0x6ab   : > { %9104 = vmatpush1.bf16.msra.mxu0 %v10269_v26 }
 0x6ac   : > { %9106 = vmatprep.subr.bf16.mxu0 %v12529_v7 }
 0x6af   : > { %9108 = vmatpush1.bf16.msra.mxu0 %v12530_v54 }
 0x6b0   : > { %9110 = vmatprep.subr.bf16.mxu0 %v12531_v33 }
 0x6b3   : > { %9112 = vmatpush1.bf16.msra.mxu0 %v12532_v62 }
 0x6b4   : > { %9126 = vmatprep.subr.bf16.mxu0 %v12533_v23 }
 0x769   : > { %v7437_v36 = vpop.f32.mrb[16].mxu0 }
 0x76a   : > { %v7472_v25 = vpop.f32.mrb[22].mxu1  ;;  %v7438_v16 = vpop.f32.mrb[17].mxu0 }
 0x76b   : > { %v7439_v41 = vadd.f32 %v7438_v16, %v7437_v36  ;;  %v7473_v56 = vpop.f32.mrb[23].mxu1  ;;  %v12541_v36 = vld [vmem:[#allocation29_spill] sm:$0xff]  ;;  %v12543_v16 = vld [vmem:[#allocation31_spill] sm:$0xff] }
 0x76c   : > { %v7474_v20 = vadd.f32 %v7473_v56, %v7472_v25  ;;  %v12542_v25 = vld [vmem:[#allocation30_spill] sm:$0xff]  ;;  %v12545_v56 = vld [vmem:[#allocation32_spill] sm:$0xff] }
 0x76d   : > { %v2334_v21 = vadd.f32 %v7439_v41, %v2262_v51  ;;  %v12544_v41 = vld [vmem:[#allocation38_spill] sm:$0xff]  ;;  %v12546_v51 = vld [vmem:[#allocation33_spill] sm:$0xff] }
 0x76f   : > { %v2404_v60 = vadd.f32 %v7474_v20, %v2334_v21  ;;  %v12547_v20 = vld [vmem:[#allocation40_spill] sm:$0xff]  ;;  %v12548_v21 = vld [vmem:[#allocation42_spill] sm:$0xff] }
 0x779   : > { %v2473_v45 = vpop.f32.mrb[18].mxu0 }
 0x77a   : > { %v2474_v0 = vadd.f32 %v2473_v45, %v2404_v60  ;;  %v8370_v24 = vpop.f32.mrb[19].mxu0  ;;  %v12549_v60 = vld [vmem:[#allocation34_spill] sm:$0xff]  ;;  %v12550_v45 = vld [vmem:[#allocation35_spill] sm:$0xff] }
 0x77b   : > { %v12552_v24 = vld [vmem:[#allocation5_spill] sm:$0xff] }
 0x77c   : > { %v2478_v3 = vmul.f32 0.044715, %v2474_v0  ;;  %v2477_v48 = vmul.f32 0.5, %v2474_v0 }
 0x77e   : > { %v2479_v6 = vmul.f32 %v2478_v3, %v2474_v0  ;;  %v12553_v3 = vld [vmem:[#allocation36_spill] sm:$0xff] }
 0x780   : > { %v2480_v55 = vmul.f32 %v2479_v6, %v2474_v0  ;;  %v12554_v6 = vld [vmem:[#allocation37_spill] sm:$0xff] }
 0x782   : > { %v2481_v46 = vadd.f32 %v2480_v55, %v2474_v0  ;;  %v12551_v0 = vld [vmem:[#allocation44_spill] sm:$0xff]  ;;  %v12555_v55 = vld [vmem:[#allocation39_spill] sm:$0xff] }
 0x784   : > { %v2482_v61 = vmul.f32 0.7978846, %v2481_v46  ;;  %v12556_v46 = vld [vmem:[#allocation41_spill] sm:$0xff] }
 0x786   : > { %10084 = vtanh.f32 %v2482_v61  ;;  %v12557_v61 = vld [vmem:[#allocation43_spill] sm:$0xff] }
 0x790   : > { %v10085_v49 = vpop.eup %10084 }
 0x791   : > { %v2484_v43 = vadd.f32 1.0, %v10085_v49  ;;  %v12558_v49 = vld [vmem:[#allocation45_spill] sm:$0xff] }
 0x793   : > { %v2485_v10 = vmul.f32 %v2484_v43, %v2477_v48  ;;  %v12559_v48 = vld [vmem:[#allocation46_spill] sm:$0xff] }
 0x795   : > { %7152 = vmatmul.mubr.msk.f32.vlgmr.msra.gmra.mrb[24].mxu1 %vm411_vm0, %v2485_v10  ;;  %7153 = vmatmul.mubr.msk.f32.vlgmr.msra.gmra.mrb[20].mxu0 %vm411_vm0, %v2485_v10 }
 0x796   : > { %9115 = vmatpush3.bf16.msra.mxu1 %v10324_v57  ;;  %8387 = vmatprep.mubr.msk.f32.mxu1 %vm10145_vm1, %v12493_v11 }
 0x797   : > { %9116 = vmatprep.subr.bf16.mxu1 %v12492_v58  ;;  %9128 = vmatpush3.bf16.msra.mxu0 %v10335_v63 }
 0x798   : > { %9130 = vmatprep.subr.bf16.mxu0 %v10339_v1 }
 0x79a   : > { %9118 = vmatpush3.bf16.msra.mxu1 %v10350_v5 }
 0x79b   : > { %9119 = vmatprep.subr.bf16.mxu1 %v12492_v58  ;;  %9132 = vmatpush3.bf16.msra.mxu0 %v10362_v12 }
 0x79c   : > { %9134 = vmatprep.subr.bf16.mxu0 %v10365_v14 }
 0x79e   : > { %9121 = vmatpush3.bf16.msra.mxu1 %v10374_v19 }
 0x79f   : > { %9122 = vmatprep.subr.bf16.mxu1 %v12492_v58  ;;  %9136 = vmatpush3.bf16.msra.mxu0 %v10390_v29 }
 0x7a0   : > { %9138 = vmatprep.subr.bf16.mxu0 %v10393_v30 }
 0x7a2   : > { %9124 = vmatpush3.bf16.msra.mxu1 %v12496_v59 }
 0x7a3   : > { %9158 = vmatprep.subr.bf16.mxu1 %v12534_v39  ;;  %9140 = vmatpush3.bf16.msra.mxu0 %v12535_v44  ;;  %v2766_v44 = vld [vmem:[%s12284_s1 + $0x190] sm:$0x3] }
 0x7a4   : > { %9142 = vmatprep.subr.bf16.mxu0 %v12536_v53  ;;  %v2732_v53 = vld [vmem:[%s12284_s1 + $0x170] sm:$0x3] }
 0x7a5   : > { %8388 = vmatmul.mubr.msk.f32.vlgmr.msra.gmra.mrb[26].mxu1 %vm411_vm0, %v2485_v10  ;;  %v2701_v10 = vld [vmem:[%s12284_s1 + $0x140] sm:$0x3] }
 0x7a6   : > { %9160 = vmatpush3.bf16.msra.mxu1 %v12537_v38 }
 0x7a7   : > { %9162 = vmatprep.subr.bf16.mxu1 %v12538_v28  ;;  %9144 = vmatpush3.bf16.msra.mxu0 %v12539_v35  ;;  %v2802_v28 = vld [vmem:[%s12284_s1 + $0x1c0] sm:$0x3] }
 0x7a8   : > { %9146 = vmatprep.subr.bf16.mxu0 %v12540_v37 }
 0x7aa   : > { %9164 = vmatpush3.bf16.msra.mxu1 %v12541_v36 }
 0x7ab   : > { %9166 = vmatprep.subr.bf16.mxu1 %v12542_v25  ;;  %9148 = vmatpush3.bf16.msra.mxu0 %v12543_v16 }
 0x7ac   : > { %9150 = vmatprep.subr.bf16.mxu0 %v12544_v41 }
 0x7ae   : > { %9168 = vmatpush3.bf16.msra.mxu1 %v12545_v56 }
 0x7af   : > { %9170 = vmatprep.subr.bf16.mxu1 %v12546_v51  ;;  %9152 = vmatpush3.bf16.msra.mxu0 %v12547_v20  ;;  %v2767_v51 = vld [vmem:[%s12284_s1 + $0x198] sm:$0x3] }
 0x7b0   : > { %9154 = vmatprep.subr.bf16.mxu0 %v12548_v21 }
 0x7b2   : > { %9172 = vmatpush3.bf16.msra.mxu1 %v12549_v60  ;;  %v2702_v60 = vld [vmem:[%s12284_s1 + $0x148] sm:$0x3] }
 0x7b3   : > { %9174 = vmatprep.subr.bf16.mxu1 %v12550_v45  ;;  %9156 = vmatpush3.bf16.msra.mxu0 %v12551_v0 }
 0x7b4   : > { %9202 = vmatprep.subr.bf16.mxu0 %v12552_v24  ;;  %v2731_v24 = vld [vmem:[%s12284_s1 + $0x168] sm:$0x3] }
 0x7b6   : > { %9176 = vmatpush3.bf16.msra.mxu1 %v12553_v3 }
 0x7b7   : > { %9178 = vmatprep.subr.bf16.mxu1 %v12554_v6 }
 0x7ba   : > { %9180 = vmatpush3.bf16.msra.mxu1 %v12555_v55 }
 0x7bb   : > { %9182 = vmatprep.subr.bf16.mxu1 %v12556_v46 }
 0x7be   : > { %9184 = vmatpush3.bf16.msra.mxu1 %v12557_v61 }
 0x7bf   : > { %9186 = vmatprep.subr.bf16.mxu1 %v12558_v49  ;;  %v2733_v49 = vld [vmem:[%s12284_s1 + $0x178] sm:$0x3] }
 0x7c2   : > { %9188 = vmatpush3.bf16.msra.mxu1 %v12559_v48  ;;  %v2703_v48 = vld [vmem:[%s12284_s1 + $0x150] sm:$0x3] }
 0x7c3   : > { %9189 = vmatprep.subr.bf16.mxu1 %v12492_v58 }
 0x868   : > { %v2555_v43 = vpop.f32.mrb[24].mxu1  ;;  %v2626_v0 = vpop.f32.mrb[20].mxu0 }
 0x869   : > { %v2709_v21 = vrot.slane %v2555_v43, %v10649_v31  ;;  %v2739_v61 = vrot.slane %v2555_v43, %v10652_v32  ;;  %v2557_v20 = vpop.f32.mrb[25].mxu1  ;;  %v2628_v46 = vpop.f32.mrb[21].mxu0  ;;  %v2717_v55 = vrot.slane %v2626_v0, %v10649_v31  ;;  %v2747_v41 = vrot.slane %v2626_v0, %v10652_v32 }
 0x86a   : > { %v2774_v3 = vrot.slane %v2555_v43, %v11056_v4  ;;  %v2809_v37 = vrot.slane %v2555_v43, %v11059_v50  ;;  %v2721_v56 = vrot.slane %v2628_v46, %v10649_v31  ;;  %v2751_v30 = vrot.slane %v2628_v46, %v10652_v32 }
 0x86b   : > { %v2726_v16 = vmul.f32 %v2709_v21, %v2701_v10  ;;  %v2756_v6 = vmul.f32 %v2739_v61, %v2731_v24  ;;  %v2728_v35 = vmul.f32 %v2717_v55, %v2703_v48  ;;  %v2758_v45 = vmul.f32 %v2747_v41, %v2733_v49  ;;  %v2704_v55 = vld [vmem:[%s12284_s1 + $0x158] sm:$0x3]  ;;  %v2734_v49 = vld [vmem:[%s12284_s1 + $0x180] sm:$0x3] }
 0x86c   : > { %v2782_v21 = vrot.slane %v2626_v0, %v11056_v4  ;;  %v2713_v24 = vrot.slane %v2557_v20, %v10649_v31  ;;  %v2743_v61 = vrot.slane %v2557_v20, %v10652_v32  ;;  %v2778_v41 = vrot.slane %v2557_v20, %v11056_v4  ;;  %v2768_v10 = vld [vmem:[%s12284_s1 + $0x1a0] sm:$0x3] }
 0x86d   : > { %v2761_v48 = vadd.f32 %v2756_v6, %v2726_v16  ;;  %v2763_v43 = vadd.f32 %v2758_v45, %v2728_v35  ;;  %v2813_v36 = vrot.slane %v2557_v20, %v11059_v50  ;;  %v2769_v35 = vld [vmem:[%s12284_s1 + $0x1a8] sm:$0x3]  ;;  %v2786_v16 = vrot.slane %v2628_v46, %v11056_v4 }
 0x86e   : > { %v2727_v29 = vmul.f32 %v2713_v24, %v2702_v60  ;;  %v2757_v25 = vmul.f32 %v2743_v61, %v2732_v53  ;;  %v2791_v45 = vmul.f32 %v2774_v3, %v2766_v44  ;;  %v2729_v6 = vmul.f32 %v2721_v56, %v2704_v55  ;;  %v2801_v53 = vld [vmem:[%s12284_s1 + $0x1b8] sm:$0x3]  ;;  %v2804_v44 = vld [vmem:[%s12284_s1 + $0x1d0] sm:$0x3] }
 0x86f   : > { %v2759_v14 = vmul.f32 %v2751_v30, %v2734_v49  ;;  %v2821_v12 = vrot.slane %v2628_v46, %v11059_v50  ;;  %v2793_v20 = vmul.f32 %v2782_v21, %v2768_v10  ;;  %v2817_v60 = vrot.slane %v2626_v0, %v11059_v50  ;;  %v2803_v30 = vld [vmem:[%s12284_s1 + $0x1c8] sm:$0x3] }
 0x870   : > { %v2792_v24 = vmul.f32 %v2778_v41, %v2767_v51  ;;  %v2762_v61 = vadd.f32 %v2757_v25, %v2727_v29  ;;  %v2794_v56 = vmul.f32 %v2786_v16, %v2769_v35  ;;  %v2796_v46 = vadd.f32 %v2791_v45, %v2761_v48 }
 0x871   : > { %v2764_v3 = vadd.f32 %v2759_v14, %v2729_v6  ;;  %v2827_v49 = vmul.f32 %v2813_v36, %v2802_v28  ;;  %v2798_v38 = vadd.f32 %v2793_v20, %v2763_v43  ;;  %v2826_v1 = vmul.f32 %v2809_v37, %v2801_v53  ;;  %v2705_v14 = vld [vmem:[%s12284_s1 + $0x160] sm:$0x3]  ;;  %v2735_v28 = vld [vmem:[%s12284_s1 + $0x188] sm:$0x3]  ;;  %v2770_v43 = vld [vmem:[%s12284_s1 + $0x1b0] sm:$0x3] }
 0x872   : > { %v2797_v55 = vadd.f32 %v2792_v24, %v2762_v61  ;;  %v2829_v10 = vmul.f32 %v2821_v12, %v2804_v44  ;;  %v2828_v0 = vmul.f32 %v2817_v60, %v2803_v30  ;;  %v2805_v6 = vld [vmem:[%s12284_s1 + $0x1d8] sm:$0x3] }
 0x873   : > { %v2799_v21 = vadd.f32 %v2794_v56, %v2764_v3  ;;  %v2831_v25 = vadd.f32 %v2826_v1, %v2796_v46  ;;  %v2840_v56 = vpop.permute.xlu1 %2839 }
 0x874   : > { %v2832_v51 = vadd.f32 %v2827_v49, %v2797_v55  ;;  %v2833_v41 = vadd.f32 %v2828_v0, %v2798_v38  ;;  %v1321_v49 = vpop.permute.xlu0 %1320 }
 0x875   : > { %v2834_v29 = vadd.f32 %v2829_v10, %v2799_v21 }
 0x876   : > { %2909 = vmatprep.mubr.f32.mxu0 %v2832_v51 }
 0x877   : > { %2979 = vmatprep.mubr.f32.mxu1 %v2834_v29  ;;  %2910 = vmatmul.mubr.f32.vlgmr.msra.gmra.mrb[22].mxu0 %v2831_v25 }
 0x878   : > { %v2697_v63 = vpop.f32.mrb[26].mxu1  ;;  %2980 = vmatmul.mubr.f32.vlgmr.msra.gmra.mrb[28].mxu1 %v2833_v41  ;;  %9204 = vmatpush1.bf16.msra.mxu0 %v10251_v8 }
 0x879   : > { %v2725_v12 = vrot.slane %v2697_v63, %v10649_v31  ;;  %v2755_v37 = vrot.slane %v2697_v63, %v10652_v32  ;;  %v8389_v36 = vpop.f32.mrb[27].mxu1  ;;  %9191 = vmatpush3.bf16.msra.mxu1 %v10692_v2  ;;  %8406 = vmatprep.mubr.msk.f32.mxu1 %vm10145_vm1, %v12493_v11  ;;  %v2790_v48 = vrot.slane %v2697_v63, %v11056_v4 }
 0x87a   : > { %9192 = vmatprep.subr.bf16.mxu1 %v12492_v58  ;;  %3214 = vmatprep.mubr.f32.mxu0 %v12493_v11  ;;  %v2825_v45 = vrot.slane %v2697_v63, %v11059_v50  ;;  %v3392_v50 = vld [vmem:[%s12284_s1 + $0x208] sm:$0xf] }
 0x87b   : > { %v2730_v1 = vmul.f32 %v2725_v12, %v2705_v14  ;;  %v2760_v38 = vmul.f32 %v2755_v37, %v2735_v28  ;;  %9206 = vmatprep.subr.bf16.mxu0 %v10261_v17  ;;  %v2795_v16 = vmul.f32 %v2790_v48, %v2770_v43  ;;  %v12560_v48 = vld [vmem:[#allocation13_spill] sm:$0xff]  ;;  %v12561_v43 = vld [vmem:[#allocation14_spill] sm:$0xff] }
 0x87c   : > { %9208 = vmatpush1.bf16.msra.mxu0 %v10263_v18  ;;  %v2830_v20 = vmul.f32 %v2825_v45, %v2805_v6  ;;  %v12564_v45 = vld [vmem:[#allocation16_spill] sm:$0xff]  ;;  %v12565_v6 = vld [vmem:[#allocation17_spill] sm:$0xff] }
 0x87d   : > { %9194 = vmatpush3.bf16.msra.mxu1 %v10701_v52  ;;  %v2765_v35 = vadd.f32 %v2760_v38, %v2730_v1  ;;  %9210 = vmatprep.subr.bf16.mxu0 %v10271_v27  ;;  %v3065_v38 = vld [vmem:[%s12286_s3 + $0x8] sm:$0x3] }
 0x87e   : > { %9195 = vmatprep.subr.bf16.mxu1 %v12492_v58 }
 0x87f   : > { %v2800_v53 = vadd.f32 %v2795_v16, %v2765_v35  ;;  %v12562_v35 = vld [vmem:[#allocation25_spill] sm:$0xff]  ;;  %v12563_v16 = vld [vmem:[#allocation26_spill] sm:$0xff] }
 0x880   : > { %9212 = vmatpush1.bf16.msra.mxu0 %v10280_v34 }
 0x881   : > { %9197 = vmatpush3.bf16.msra.mxu1 %v10715_v15  ;;  %9214 = vmatprep.subr.bf16.mxu0 %v10288_v40  ;;  %v2835_v60 = vadd.f32 %v2830_v20, %v2800_v53  ;;  %v12566_v53 = vld [vmem:[#allocation29_spill] sm:$0xff]  ;;  %v12567_v20 = vld [vmem:[#allocation30_spill] sm:$0xff] }
 0x882   : > { %9198 = vmatprep.subr.bf16.mxu1 %v12492_v58 }
 0x884   : > { %9216 = vmatpush1.bf16.msra.mxu0 %v10295_v47 }
 0x885   : > { %9200 = vmatpush3.bf16.msra.mxu1 %v10733_v42  ;;  %9218 = vmatprep.subr.bf16.mxu0 %v10253_v9 }
 0x886   : > { %8409 = vmatprep.subr.mxu1 %v12493_v11 }
 0x888   : > { %8407 = vmatmul.mubr.msk.f32.vlgmr.msra.gmra.mrb[10].mxu1 %vm411_vm0, %v2835_v60  ;;  %v12568_v60 = vld [vmem:[#allocation19_spill] sm:$0xff] }
 0x889   : > { %8411 = vmatprep.mubr.msk.f32.mxu1 %vm10145_vm1, %v12493_v11 }
 0x94a   : > { %v7525_v63 = vpop.f32.mrb[22].mxu0 }
 0x94b   : > { %v7560_v24 = vpop.f32.mrb[28].mxu1  ;;  %v7526_v61 = vpop.f32.mrb[23].mxu0 }
 0x94c   : > { %v7527_v44 = vadd.f32 %v7526_v61, %v7525_v63  ;;  %v7561_v30 = vpop.f32.mrb[29].mxu1  ;;  %v12569_v63 = vld [vmem:[#allocation20_spill] sm:$0xff]  ;;  %v12571_v61 = vld [vmem:[#allocation33_spill] sm:$0xff] }
 0x94d   : > { %v7562_v3 = vadd.f32 %v7561_v30, %v7560_v24  ;;  %v12570_v24 = vld [vmem:[#allocation32_spill] sm:$0xff] }
 0x94e   : > { %v2912_v46 = vadd.f32 %v7527_v44, %v2840_v56  ;;  %v12572_v44 = vld [vmem:[#allocation23_spill] sm:$0xff]  ;;  %v12573_v30 = vld [vmem:[#allocation24_spill] sm:$0xff]  ;;  %v12574_v56 = vld [vmem:[#allocation34_spill] sm:$0xff] }
 0x950   : > { %v2982_v55 = vadd.f32 %v7562_v3, %v2912_v46  ;;  %v12575_v3 = vld [vmem:[#allocation35_spill] sm:$0xff] }
 0x951   : > { %v12576_v46 = vld [vmem:[#allocation27_spill] sm:$0xff] }
 0x952   : > { %v10042_v21 = vadd.f32 %v2982_v55, %v1321_v49  ;;  %v12577_v55 = vld [vmem:[#allocation28_spill] sm:$0xff] }
 0x953   : > { %v12578_v49 = vld [vmem:[#allocation36_spill] sm:$0xff] }
 0x95b   : > { %v3051_v10 = vpop.f32.mrb[10].mxu1 }
 0x95c   : > { %v10043_v0 = vadd.f32 %v10042_v21, %v3051_v10  ;;  %v8408_v51 = vpop.f32.mrb[11].mxu1  ;;  %v12579_v21 = vld [vmem:[#allocation37_spill] sm:$0xff]  ;;  %v12580_v10 = vld [vmem:[#allocation31_spill] sm:$0xff] }
 0x95d   : > { %v12582_v51 = vld [vmem:[#allocation39_spill] sm:$0xff] }
 0x95e   : > { %v3057_v29 = vmul.f32 0.044715, %v10043_v0  ;;  %v3056_v37 = vmul.f32 0.5, %v10043_v0 }
 0x960   : > { %v3058_v25 = vmul.f32 %v10043_v0, %v3057_v29  ;;  %v12583_v29 = vld [vmem:[#allocation41_spill] sm:$0xff] }
 0x962   : > { %v3059_v41 = vmul.f32 %v10043_v0, %v3058_v25  ;;  %v12584_v25 = vld [vmem:[#allocation40_spill] sm:$0xff] }
 0x964   : > { %v3060_v14 = vadd.f32 %v10043_v0, %v3059_v41  ;;  %v12581_v0 = vld [vmem:[#allocation38_spill] sm:$0xff] }
 0x965   : > { %v12585_v41 = vld [vmem:[#allocation42_spill] sm:$0xff] }
 0x966   : > { %v3061_v28 = vmul.f32 0.7978846, %v3060_v14  ;;  %v12586_v14 = vld [vmem:[#allocation43_spill] sm:$0xff] }
 0x968   : > { %10086 = vtanh.f32 %v3061_v28  ;;  %v12587_v28 = vld [vmem:[#allocation45_spill] sm:$0xff] }
 0x972   : > { %v10087_v12 = vpop.eup %10086 }
 0x973   : > { %v3063_v36 = vadd.f32 1.0, %v10087_v12  ;;  %v12588_v12 = vld [vmem:[#allocation44_spill] sm:$0xff] }
 0x975   : > { %v3064_v1 = vmul.f32 %v3063_v36, %v3056_v37  ;;  %v12589_v37 = vld [vmem:[#allocation46_spill] sm:$0xff]  ;;  %v12590_v36 = vld [vmem:[#allocation5_spill] sm:$0xff] }
 0x977   : > { %8410 = vmatpush3.msk.msra.mxu1 %vm1327_vm4, %v3064_v1  ;;  %7158 = vmatmul.mubr.msk.f32.vlgmr.msra.gmra.mrb[24].mxu0 %vm411_vm0, %v3064_v1 }
 0x978   : > { %9220 = vmatpush1.bf16.msra.mxu0 %v10257_v13  ;;  %8412 = vmatmul.mubr.msk.f32.vlgmr.msra.gmra.mrb[30].mxu1 %vm1323_vm5, %v3065_v38  ;;  %v3362_v38 = vld [vmem:[%s12284_s1 + $0x1e0] sm:$0xf] }
 0x979   : > { %9233 = vmatprep.subr.bf16.mxu1 %v12492_v58  ;;  %9222 = vmatprep.subr.bf16.mxu0 %v10266_v22 }
 0x97a   : > { %9235 = vmatpush3.bf16.msra.mxu1 %v10324_v57  ;;  %3285 = vmatprep.mubr.f32.mxu0 %v12493_v11 }
 0x97b   : > { %9236 = vmatprep.subr.bf16.mxu1 %v12492_v58  ;;  %8430 = vmatprep.mubr.msk.f32.mxu1 %vm10145_vm1, %v12493_v11 }
 0x97c   : > { %9224 = vmatpush1.bf16.msra.mxu0 %v10269_v26 }
 0x97d   : > { %9226 = vmatprep.subr.bf16.mxu0 %v12529_v7 }
 0x97e   : > { %9238 = vmatpush3.bf16.msra.mxu1 %v10350_v5 }
 0x97f   : > { %9239 = vmatprep.subr.bf16.mxu1 %v12492_v58 }
 0x980   : > { %9228 = vmatpush1.bf16.msra.mxu0 %v12530_v54 }
 0x981   : > { %9230 = vmatprep.subr.bf16.mxu0 %v12531_v33 }
 0x982   : > { %9241 = vmatpush3.bf16.msra.mxu1 %v10374_v19 }
 0x983   : > { %9242 = vmatprep.subr.bf16.mxu1 %v12492_v58 }
 0x984   : > { %9232 = vmatpush1.bf16.msra.mxu0 %v12532_v62 }
 0x985   : > { %9246 = vmatprep.subr.bf16.mxu0 %v12533_v23 }
 0x986   : > { %9244 = vmatpush3.bf16.msra.mxu1 %v12496_v59 }
 0x987   : > { %7159 = vmatmul.mubr.msk.f32.vlgmr.msra.gmra.mrb[26].mxu0 %vm411_vm0, %v3064_v1  ;;  %9278 = vmatprep.subr.bf16.mxu1 %v12534_v39 }
 0x988   : > { %9248 = vmatpush3.bf16.msra.mxu0 %v12560_v48 }
 0x989   : > { %8431 = vmatmul.mubr.msk.f32.vlgmr.msra.gmra.mrb[32].mxu1 %vm411_vm0, %v3064_v1  ;;  %9250 = vmatprep.subr.bf16.mxu0 %v12561_v43 }
 0x98a   : > { %9280 = vmatpush3.bf16.msra.mxu1 %v12562_v35 }
 0x98b   : > { %9282 = vmatprep.subr.bf16.mxu1 %v12563_v16 }
 0x98c   : > { %9252 = vmatpush3.bf16.msra.mxu0 %v12564_v45 }
 0x98d   : > { %9254 = vmatprep.subr.bf16.mxu0 %v12565_v6 }
 0x98e   : > { %9284 = vmatpush3.bf16.msra.mxu1 %v12566_v53 }
 0x98f   : > { %9286 = vmatprep.subr.bf16.mxu1 %v12567_v20 }
 0x990   : > { %9256 = vmatpush3.bf16.msra.mxu0 %v12568_v60 }
 0x991   : > { %9258 = vmatprep.subr.bf16.mxu0 %v12569_v63 }
 0x992   : > { %9288 = vmatpush3.bf16.msra.mxu1 %v12570_v24 }
 0x993   : > { %9290 = vmatprep.subr.bf16.mxu1 %v12571_v61 }
 0x994   : > { %9260 = vmatpush3.bf16.msra.mxu0 %v12572_v44 }
 0x995   : > { %9262 = vmatprep.subr.bf16.mxu0 %v12573_v30 }
 0x996   : > { %9292 = vmatpush3.bf16.msra.mxu1 %v12574_v56 }
 0x997   : > { %9294 = vmatprep.subr.bf16.mxu1 %v12575_v3 }
 0x998   : > { %9264 = vmatpush3.bf16.msra.mxu0 %v12576_v46 }
 0x999   : > { %9266 = vmatprep.subr.bf16.mxu0 %v12577_v55 }
 0x99a   : > { %9296 = vmatpush3.bf16.msra.mxu1 %v12578_v49 }
 0x99b   : > { %9298 = vmatprep.subr.bf16.mxu1 %v12579_v21 }
 0x99c   : > { %9268 = vmatpush3.bf16.msra.mxu0 %v12580_v10 }
 0x99d   : > { %9270 = vmatprep.subr.bf16.mxu0 %v12581_v0 }
 0x99e   : > { %9300 = vmatpush3.bf16.msra.mxu1 %v12582_v51 }
 0x99f   : > { %9302 = vmatprep.subr.bf16.mxu1 %v12583_v29 }
 0x9a0   : > { %9272 = vmatpush3.bf16.msra.mxu0 %v12584_v25 }
 0x9a1   : > { %9274 = vmatprep.subr.bf16.mxu0 %v12585_v41 }
 0x9a2   : > { %9304 = vmatpush3.bf16.msra.mxu1 %v12586_v14 }
 0x9a3   : > { %9306 = vmatprep.subr.bf16.mxu1 %v12587_v28 }
 0x9a4   : > { %9276 = vmatpush3.bf16.msra.mxu0 %v12588_v12 }
 0x9a5   : > { %9309 = vmatprep.subr.bf16.mxu0 %v12492_v58 }
 0x9a6   : > { %9308 = vmatpush3.bf16.msra.mxu1 %v12589_v37  ;;  %v3393_v37 = vld [vmem:[%s12284_s1 + $0x210] sm:$0xf] }
 0x9a7   : > { %9322 = vmatprep.subr.bf16.mxu1 %v12590_v36  ;;  %v3363_v36 = vld [vmem:[%s12284_s1 + $0x1e8] sm:$0xf] }
 0xa4a   : > { %v3216_v1 = vpop.f32.mrb[24].mxu0 }
 0xa4b   : > { %v3370_v4 = vrot.slane %v3216_v1, %v10649_v31  ;;  %v3400_v28 = vrot.slane %v3216_v1, %v10652_v32  ;;  %v11379_v14 = vpop.f32.mrb[30].mxu1  ;;  %v3218_v29 = vpop.f32.mrb[25].mxu0 }
 0xa4c   : > { %12591 = vst [vmem:[#allocation51_spill] sm:$0xff] %v11379_v14  ;;  %v3374_v51 = vrot.slane %v3218_v29, %v10649_v31  ;;  %v3404_v21 = vrot.slane %v3218_v29, %v10652_v32  ;;  %v8413_v49 = vpop.f32.mrb[31].mxu1  ;;  %v3395_v29 = vld [vmem:[%s12284_s1 + $0x220] sm:$0xf] }
 0xa4d   : > { %v3387_v12 = vmul.f32 %v3370_v4, %v3362_v38  ;;  %v3417_v3 = vmul.f32 %v3400_v28, %v3392_v50  ;;  %v3364_v4 = vld [vmem:[%s12284_s1 + $0x1f0] sm:$0xf]  ;;  %v3394_v50 = vld [vmem:[%s12284_s1 + $0x218] sm:$0xf] }
 0xa4e   : > { %v3388_v56 = vmul.f32 %v3374_v51, %v3363_v36  ;;  %v3418_v1 = vmul.f32 %v3404_v21, %v3393_v37  ;;  %v3365_v51 = vld [vmem:[%s12284_s1 + $0x1f8] sm:$0xf]  ;;  %v3396_v37 = vld [vmem:[%s12284_s1 + $0x228] sm:$0xf] }
 0xa4f   : > { %v3422_v14 = vadd.f32 %v3417_v3, %v3387_v12  ;;  %v3366_v12 = vld [vmem:[%s12284_s1 + $0x200] sm:$0xf] }
 0xa50   : > { %v3423_v41 = vadd.f32 %v3418_v1, %v3388_v56 }
 0xa52   : > { %3500 = vmatprep.mubr.f32.mxu0 %v3423_v41 }
 0xa53   : > { %3501 = vmatmul.mubr.f32.vlgmr.msra.gmra.mrb[28].mxu0 %v3422_v14 }
 0xa54   : > { %9311 = vmatpush3.bf16.msra.mxu0 %v10692_v2  ;;  %8449 = vmatprep.mubr.msk.f32.mxu0 %vm10145_vm1, %v12493_v11 }
 0xa55   : > { %9312 = vmatprep.subr.bf16.mxu0 %v12492_v58 }
 0xa58   : > { %9314 = vmatpush3.bf16.msra.mxu0 %v10701_v52 }
 0xa59   : > { %9315 = vmatprep.subr.bf16.mxu0 %v12492_v58 }
 0xa5a   : > { %v3287_v49 = vpop.f32.mrb[26].mxu0 }
 0xa5b   : > { %v3378_v56 = vrot.slane %v3287_v49, %v10649_v31  ;;  %v3408_v3 = vrot.slane %v3287_v49, %v10652_v32  ;;  %v3289_v21 = vpop.f32.mrb[27].mxu0 }
 0xa5c   : > { %v3382_v41 = vrot.slane %v3289_v21, %v10649_v31  ;;  %v3412_v14 = vrot.slane %v3289_v21, %v10652_v32  ;;  %v3358_v28 = vpop.f32.mrb[32].mxu1  ;;  %9317 = vmatpush3.bf16.msra.mxu0 %v10715_v15 }
 0xa5d   : > { %v3389_v36 = vmul.f32 %v3378_v56, %v3364_v4  ;;  %v3419_v38 = vmul.f32 %v3408_v3, %v3394_v50  ;;  %v3386_v1 = vrot.slane %v3358_v28, %v10649_v31  ;;  %v3416_v49 = vrot.slane %v3358_v28, %v10652_v32  ;;  %v8432_v52 = vpop.f32.mrb[33].mxu1  ;;  %9318 = vmatprep.subr.bf16.mxu0 %v12492_v58 }
 0xa5e   : > { %v3390_v21 = vmul.f32 %v3382_v41, %v3365_v51  ;;  %v3420_v2 = vmul.f32 %v3412_v14, %v3395_v29 }
 0xa5f   : > { %v3391_v25 = vmul.f32 %v3386_v1, %v3366_v12  ;;  %v3421_v61 = vmul.f32 %v3416_v49, %v3396_v37  ;;  %v3424_v0 = vadd.f32 %v3419_v38, %v3389_v36  ;;  %v12592_v49 = vld [vmem:[#allocation31_spill] sm:$0xff] }
 0xa60   : > { %9320 = vmatpush3.bf16.msra.mxu0 %v10733_v42  ;;  %v3425_v24 = vadd.f32 %v3420_v2, %v3390_v21  ;;  %v12593_v21 = vld [vmem:[#allocation38_spill] sm:$0xff] }
 0xa61   : > { %v3426_v10 = vadd.f32 %v3421_v61, %v3391_v25  ;;  %9338 = vmatprep.subr.bf16.mxu0 %v10253_v9  ;;  %v3431_v61 = vpop.permute.xlu1 %3430 }
 0xa62   : > { %3570 = vmatprep.mubr.f32.mxu1 %v3425_v24 }
 0xa63   : > { %3571 = vmatmul.mubr.f32.vlgmr.msra.gmra.mrb[34].mxu1 %v3424_v0  ;;  %8450 = vmatmul.mubr.msk.f32.vlgmr.msra.gmra.mrb[30].mxu0 %vm411_vm0, %v3426_v10 }
 0xa64   : > { %9324 = vmatpush1.bf16.msra.mxu1 %v10251_v8  ;;  %9340 = vmatpush1.bf16.msra.mxu0 %v10257_v13 }
 0xa65   : > { %9326 = vmatprep.subr.bf16.mxu1 %v10261_v17  ;;  %9342 = vmatprep.subr.bf16.mxu0 %v10266_v22 }
 0xa66   : > { %3722 = vmatprep.mubr.f32.mxu1 %v12493_v11  ;;  %3793 = vmatprep.mubr.f32.mxu0 %v12493_v11 }
 0xa68   : > { %9328 = vmatpush1.bf16.msra.mxu1 %v10263_v18  ;;  %9344 = vmatpush1.bf16.msra.mxu0 %v10269_v26 }
 0xa69   : > { %9330 = vmatprep.subr.bf16.mxu1 %v10271_v27  ;;  %9346 = vmatprep.subr.bf16.mxu0 %v12529_v7 }
 0xa6c   : > { %9332 = vmatpush1.bf16.msra.mxu1 %v10280_v34  ;;  %9348 = vmatpush1.bf16.msra.mxu0 %v12530_v54 }
 0xa6d   : > { %9334 = vmatprep.subr.bf16.mxu1 %v10288_v40  ;;  %9350 = vmatprep.subr.bf16.mxu0 %v12531_v33 }
 0xa70   : > { %9336 = vmatpush1.bf16.msra.mxu1 %v10295_v47  ;;  %9352 = vmatpush1.bf16.msra.mxu0 %v12532_v62 }
 0xa71   : > { %9353 = vmatprep.subr.bf16.mxu1 %v12492_v58  ;;  %9366 = vmatprep.subr.bf16.mxu0 %v12533_v23 }
 0xb26   : > { %v7615_v2 = vpop.f32.mrb[28].mxu0 }
 0xb27   : > { %v7616_v52 = vpop.f32.mrb[29].mxu0 }
 0xb28   : > { %v7617_v24 = vadd.f32 %v7616_v52, %v7615_v2  ;;  %v12594_v2 = vld [vmem:[#allocation32_spill] sm:$0xff]  ;;  %v12595_v52 = vld [vmem:[#allocation33_spill] sm:$0xff] }
 0xb2a   : > { %v3503_v50 = vadd.f32 %v7617_v24, %v3431_v61  ;;  %v12596_v24 = vld [vmem:[#allocation40_spill] sm:$0xff]  ;;  %v12597_v61 = vld [vmem:[#allocation42_spill] sm:$0xff] }
 0xb36   : > { %v7650_v10 = vpop.f32.mrb[34].mxu1  ;;  %v3642_v0 = vpop.f32.mrb[30].mxu0 }
 0xb37   : > { %v7651_v25 = vpop.f32.mrb[35].mxu1  ;;  %v8451_v4 = vpop.f32.mrb[31].mxu0 }
 0xb38   : > { %v7652_v56 = vadd.f32 %v7651_v25, %v7650_v10  ;;  %v12598_v10 = vld [vmem:[#allocation34_spill] sm:$0xff]  ;;  %v12600_v25 = vld [vmem:[#allocation44_spill] sm:$0xff] }
 0xb39   : > { %v12601_v4 = vld [vmem:[#allocation36_spill] sm:$0xff] }
 0xb3a   : > { %v3573_v3 = vadd.f32 %v7652_v56, %v3503_v50  ;;  %v12602_v50 = vld [vmem:[#allocation37_spill] sm:$0xff]  ;;  %v12603_v56 = vld [vmem:[#allocation39_spill] sm:$0xff] }
 0xb3c   : > { %v3643_v51 = vadd.f32 %v3642_v0, %v3573_v3  ;;  %v12599_v0 = vld [vmem:[#allocation35_spill] sm:$0xff]  ;;  %v12604_v3 = vld [vmem:[#allocation41_spill] sm:$0xff] }
 0xb3e   : > { %v3647_v29 = vmul.f32 0.044715, %v3643_v51  ;;  %v3646_v36 = vmul.f32 0.5, %v3643_v51 }
 0xb40   : > { %v3648_v41 = vmul.f32 %v3647_v29, %v3643_v51  ;;  %v12606_v29 = vld [vmem:[#allocation45_spill] sm:$0xff] }
 0xb42   : > { %v3649_v14 = vmul.f32 %v3648_v41, %v3643_v51  ;;  %v12607_v41 = vld [vmem:[#allocation46_spill] sm:$0xff] }
 0xb44   : > { %v3650_v28 = vadd.f32 %v3649_v14, %v3643_v51  ;;  %v12605_v51 = vld [vmem:[#allocation43_spill] sm:$0xff]  ;;  %v12608_v14 = vld [vmem:[#allocation5_spill] sm:$0xff] }
 0xb46   : > { %v3651_v12 = vmul.f32 0.7978846, %v3650_v28 }
 0xb48   : > { %10088 = vtanh.f32 %v3651_v12  ;;  %v3870_v12 = vld [vmem:[%s12284_s1 + $0x230] sm:$0xf] }
 0xb52   : > { %v10089_v37 = vpop.eup %10088 }
 0xb53   : > { %v3653_v38 = vadd.f32 1.0, %v10089_v37  ;;  %v3900_v37 = vld [vmem:[%s12284_s1 + $0x258] sm:$0xf] }
 0xb55   : > { %v3654_v1 = vmul.f32 %v3653_v38, %v3646_v36 }
 0xb57   : > { %7162 = vmatmul.mubr.msk.f32.vlgmr.msra.gmra.mrb[36].mxu1 %vm411_vm0, %v3654_v1  ;;  %7163 = vmatmul.mubr.msk.f32.vlgmr.msra.gmra.mrb[32].mxu0 %vm411_vm0, %v3654_v1 }
 0xb58   : > { %9355 = vmatpush3.bf16.msra.mxu1 %v10324_v57  ;;  %8468 = vmatprep.mubr.msk.f32.mxu1 %vm10145_vm1, %v12493_v11 }
 0xb59   : > { %9356 = vmatprep.subr.bf16.mxu1 %v12492_v58  ;;  %9368 = vmatpush3.bf16.msra.mxu0 %v12560_v48 }
 0xb5a   : > { %9370 = vmatprep.subr.bf16.mxu0 %v12561_v43 }
 0xb5c   : > { %9358 = vmatpush3.bf16.msra.mxu1 %v10350_v5 }
 0xb5d   : > { %9359 = vmatprep.subr.bf16.mxu1 %v12492_v58  ;;  %9372 = vmatpush3.bf16.msra.mxu0 %v12564_v45 }
 0xb5e   : > { %9374 = vmatprep.subr.bf16.mxu0 %v12565_v6 }
 0xb60   : > { %9361 = vmatpush3.bf16.msra.mxu1 %v10374_v19 }
 0xb61   : > { %9362 = vmatprep.subr.bf16.mxu1 %v12492_v58  ;;  %9376 = vmatpush3.bf16.msra.mxu0 %v12568_v60 }
 0xb62   : > { %9378 = vmatprep.subr.bf16.mxu0 %v12569_v63 }
 0xb64   : > { %9364 = vmatpush3.bf16.msra.mxu1 %v12496_v59 }
 0xb65   : > { %9398 = vmatprep.subr.bf16.mxu1 %v12534_v39  ;;  %9380 = vmatpush3.bf16.msra.mxu0 %v12572_v44  ;;  %v3971_v39 = vld [vmem:[%s12284_s1 + $0x2b0] sm:$0xf] }
 0xb66   : > { %9382 = vmatprep.subr.bf16.mxu0 %v12573_v30 }
 0xb67   : > { %8469 = vmatmul.mubr.msk.f32.vlgmr.msra.gmra.mrb[38].mxu1 %vm411_vm0, %v3654_v1 }
 0xb68   : > { %9400 = vmatpush3.bf16.msra.mxu1 %v12562_v35 }
 0xb69   : > { %9402 = vmatprep.subr.bf16.mxu1 %v12563_v16  ;;  %9384 = vmatpush3.bf16.msra.mxu0 %v12576_v46 }
 0xb6a   : > { %9386 = vmatprep.subr.bf16.mxu0 %v12577_v55 }
 0xb6c   : > { %9404 = vmatpush3.bf16.msra.mxu1 %v12566_v53 }
 0xb6d   : > { %9406 = vmatprep.subr.bf16.mxu1 %v12567_v20  ;;  %9388 = vmatpush3.bf16.msra.mxu0 %v12592_v49  ;;  %v3935_v49 = vld [vmem:[%s12284_s1 + $0x280] sm:$0xf]  ;;  %v3936_v20 = vld [vmem:[%s12284_s1 + $0x288] sm:$0xf] }
 0xb6e   : > { %9390 = vmatprep.subr.bf16.mxu0 %v12593_v21  ;;  %v3901_v21 = vld [vmem:[%s12284_s1 + $0x260] sm:$0xf] }
 0xb70   : > { %9408 = vmatpush3.bf16.msra.mxu1 %v12594_v2  ;;  %v3871_v2 = vld [vmem:[%s12284_s1 + $0x238] sm:$0xf] }
 0xb71   : > { %9410 = vmatprep.subr.bf16.mxu1 %v12595_v52  ;;  %9392 = vmatpush3.bf16.msra.mxu0 %v12596_v24 }
 0xb72   : > { %9394 = vmatprep.subr.bf16.mxu0 %v12597_v61 }
 0xb74   : > { %9412 = vmatpush3.bf16.msra.mxu1 %v12598_v10  ;;  %v12610_v10 = vld [vmem:[#allocation50_spill] sm:$0xff] }
 0xb75   : > { %9414 = vmatprep.subr.bf16.mxu1 %v12599_v0  ;;  %9396 = vmatpush3.bf16.msra.mxu0 %v12600_v25  ;;  %v12609_v25 = vld [vmem:[#allocation47_spill] sm:$0xff] }
 0xb76   : > { %9429 = vmatprep.subr.bf16.mxu0 %v12492_v58 }
 0xb78   : > { %9416 = vmatpush3.bf16.msra.mxu1 %v12601_v4 }
 0xb79   : > { %9418 = vmatprep.subr.bf16.mxu1 %v12602_v50 }
 0xb7c   : > { %9420 = vmatpush3.bf16.msra.mxu1 %v12603_v56 }
 0xb7d   : > { %9422 = vmatprep.subr.bf16.mxu1 %v12604_v3 }
 0xb80   : > { %9424 = vmatpush3.bf16.msra.mxu1 %v12605_v51 }
 0xb81   : > { %9426 = vmatprep.subr.bf16.mxu1 %v12606_v29 }
 0xb84   : > { %9428 = vmatpush3.bf16.msra.mxu1 %v12607_v41  ;;  %v3872_v41 = vld [vmem:[%s12284_s1 + $0x240] sm:$0xf] }
 0xb85   : > { %9442 = vmatprep.subr.bf16.mxu1 %v12608_v14  ;;  %v3902_v14 = vld [vmem:[%s12284_s1 + $0x268] sm:$0xf] }
 0xc2a   : > { %v3724_v28 = vpop.f32.mrb[36].mxu1  ;;  %v3795_v36 = vpop.f32.mrb[32].mxu0 }
 0xc2b   : > { %v3878_v38 = vrot.slane %v3724_v28, %v10649_v31  ;;  %v3908_v1 = vrot.slane %v3724_v28, %v10652_v32  ;;  %v3726_v29 = vpop.f32.mrb[37].mxu1  ;;  %v3797_v51 = vpop.f32.mrb[33].mxu0  ;;  %v3886_v3 = vrot.slane %v3795_v36, %v10649_v31  ;;  %v3916_v56 = vrot.slane %v3795_v36, %v10652_v32 }
 0xc2c   : > { %v3943_v0 = vrot.slane %v3724_v28, %v12609_v25  ;;  %v3978_v61 = vrot.slane %v3724_v28, %v12610_v10  ;;  %v3912_v28 = vrot.slane %v3726_v29, %v10652_v32  ;;  %v3890_v53 = vrot.slane %v3797_v51, %v10649_v31 }
 0xc2d   : > { %v3895_v50 = vmul.f32 %v3878_v38, %v3870_v12  ;;  %v3925_v4 = vmul.f32 %v3908_v1, %v3900_v37  ;;  %v3897_v24 = vmul.f32 %v3886_v3, %v3872_v41  ;;  %v3927_v52 = vmul.f32 %v3916_v56, %v3902_v14  ;;  %v3873_v3 = vld [vmem:[%s12284_s1 + $0x248] sm:$0xf]  ;;  %v3903_v41 = vld [vmem:[%s12284_s1 + $0x270] sm:$0xf] }
 0xc2e   : > { %v3951_v12 = vrot.slane %v3795_v36, %v12609_v25  ;;  %v3882_v37 = vrot.slane %v3726_v29, %v10649_v31  ;;  %v3947_v56 = vrot.slane %v3726_v29, %v12609_v25  ;;  %v3937_v1 = vld [vmem:[%s12284_s1 + $0x290] sm:$0xf]  ;;  %v3920_v55 = vrot.slane %v3797_v51, %v10652_v32 }
 0xc2f   : > { %v3930_v14 = vadd.f32 %v3925_v4, %v3895_v50  ;;  %v3932_v38 = vadd.f32 %v3927_v52, %v3897_v24  ;;  %v3926_v16 = vmul.f32 %v3912_v28, %v3901_v21  ;;  %v3982_v35 = vrot.slane %v3726_v29, %v12610_v10  ;;  %v3938_v52 = vld [vmem:[%s12284_s1 + $0x298] sm:$0xf]  ;;  %v3970_v21 = vld [vmem:[%s12284_s1 + $0x2a8] sm:$0xf] }
 0xc30   : > { %v3896_v46 = vmul.f32 %v3882_v37, %v3871_v2  ;;  %v3955_v24 = vrot.slane %v3797_v51, %v12609_v25  ;;  %v3960_v4 = vmul.f32 %v3943_v0, %v3935_v49  ;;  %v3898_v50 = vmul.f32 %v3890_v53, %v3873_v3  ;;  %v3973_v53 = vld [vmem:[%s12284_s1 + $0x2c0] sm:$0xf] }
 0xc31   : > { %v3928_v30 = vmul.f32 %v3920_v55, %v3903_v41  ;;  %v3990_v44 = vrot.slane %v3797_v51, %v12610_v10  ;;  %v3962_v2 = vmul.f32 %v3951_v12, %v3937_v1  ;;  %v3986_v29 = vrot.slane %v3795_v36, %v12610_v10  ;;  %v3972_v55 = vld [vmem:[%s12284_s1 + $0x2b8] sm:$0xf] }
 0xc32   : > { %v3961_v37 = vmul.f32 %v3947_v56, %v3936_v20  ;;  %v3931_v28 = vadd.f32 %v3926_v16, %v3896_v46  ;;  %v3963_v49 = vmul.f32 %v3955_v24, %v3938_v52  ;;  %v3965_v51 = vadd.f32 %v3960_v4, %v3930_v14  ;;  %v3939_v52 = vld [vmem:[%s12284_s1 + $0x2a0] sm:$0xf] }
 0xc33   : > { %v3933_v0 = vadd.f32 %v3928_v30, %v3898_v50  ;;  %v3996_v41 = vmul.f32 %v3982_v35, %v3971_v39  ;;  %v3967_v59 = vadd.f32 %v3962_v2, %v3932_v38  ;;  %v3995_v63 = vmul.f32 %v3978_v61, %v3970_v21  ;;  %v3874_v30 = vld [vmem:[%s12284_s1 + $0x250] sm:$0xf]  ;;  %v3904_v39 = vld [vmem:[%s12284_s1 + $0x278] sm:$0xf]  ;;  %v12612_v24 = vld [vmem:[#allocation49_spill] sm:$0xff] }
 0xc34   : > { %v3966_v3 = vadd.f32 %v3961_v37, %v3931_v28  ;;  %v3998_v1 = vmul.f32 %v3990_v44, %v3973_v53  ;;  %v3997_v36 = vmul.f32 %v3986_v29, %v3972_v55  ;;  %v12611_v35 = vld [vmem:[#allocation48_spill] sm:$0xff]  ;;  %v3974_v2 = vld [vmem:[%s12284_s1 + $0x2c8] sm:$0xf] }
 0xc35   : > { %v3968_v12 = vadd.f32 %v3963_v49, %v3933_v0  ;;  %v4000_v46 = vadd.f32 %v3995_v63, %v3965_v51  ;;  %v4009_v51 = vpop.permute.xlu0 %4008 }
 0xc36   : > { %v4001_v20 = vadd.f32 %v3996_v41, %v3966_v3  ;;  %v4002_v56 = vadd.f32 %v3997_v36, %v3967_v59 }
 0xc37   : > { %v4003_v16 = vadd.f32 %v3998_v1, %v3968_v12 }
 0xc38   : > { %4078 = vmatprep.mubr.f32.mxu0 %v4001_v20 }
 0xc39   : > { %4148 = vmatprep.mubr.f32.mxu1 %v4003_v16  ;;  %4079 = vmatmul.mubr.f32.vlgmr.msra.gmra.mrb[34].mxu0 %v4000_v46 }
 0xc3a   : > { %v3866_v60 = vpop.f32.mrb[38].mxu1  ;;  %4149 = vmatmul.mubr.f32.vlgmr.msra.gmra.mrb[40].mxu1 %v4002_v56  ;;  %9431 = vmatpush3.bf16.msra.mxu0 %v12611_v35 }
 0xc3b   : > { %v3894_v44 = vrot.slane %v3866_v60, %v10649_v31  ;;  %v3924_v63 = vrot.slane %v3866_v60, %v10652_v32  ;;  %v8470_v61 = vpop.f32.mrb[39].mxu1  ;;  %9432 = vmatprep.subr.bf16.mxu0 %v12492_v58  ;;  %8487 = vmatprep.mubr.msk.f32.mxu0 %vm10145_vm1, %v12493_v11  ;;  %v3959_v38 = vrot.slane %v3866_v60, %v12609_v25 }
 0xc3c   : > { %9444 = vmatpush1.bf16.msra.mxu1 %v10251_v8  ;;  %4300 = vmatprep.mubr.f32.mxu1 %v12493_v11  ;;  %v3994_v21 = vrot.slane %v3866_v60, %v12610_v10 }
 0xc3d   : > { %v3899_v59 = vmul.f32 %v3894_v44, %v3874_v30  ;;  %v3929_v14 = vmul.f32 %v3924_v63, %v3904_v39  ;;  %9446 = vmatprep.subr.bf16.mxu1 %v10261_v17  ;;  %v3964_v50 = vmul.f32 %v3959_v38, %v3939_v52  ;;  %v12614_v38 = vld [vmem:[#allocation20_spill] sm:$0xff]  ;;  %v12615_v52 = vld [vmem:[#allocation21_spill] sm:$0xff] }
 0xc3e   : > { %9434 = vmatpush3.bf16.msra.mxu0 %v12612_v24  ;;  %v3999_v37 = vmul.f32 %v3994_v21, %v3974_v2  ;;  %v12618_v21 = vld [vmem:[#allocation24_spill] sm:$0xff]  ;;  %v12619_v2 = vld [vmem:[#allocation25_spill] sm:$0xff] }
 0xc3f   : > { %v3934_v4 = vadd.f32 %v3929_v14, %v3899_v59  ;;  %9435 = vmatprep.subr.bf16.mxu0 %v12492_v58  ;;  %v12613_v14 = vld [vmem:[#allocation19_spill] sm:$0xff] }
 0xc40   : > { %9448 = vmatpush1.bf16.msra.mxu1 %v10263_v18 }
 0xc41   : > { %9450 = vmatprep.subr.bf16.mxu1 %v10271_v27  ;;  %v3969_v29 = vadd.f32 %v3964_v50, %v3934_v4  ;;  %v12616_v4 = vld [vmem:[#allocation22_spill] sm:$0xff]  ;;  %v12617_v50 = vld [vmem:[#allocation23_spill] sm:$0xff] }
 0xc42   : > { %9437 = vmatpush3.bf16.msra.mxu0 %v10715_v15 }
 0xc43   : > { %9438 = vmatprep.subr.bf16.mxu0 %v12492_v58  ;;  %v4004_v28 = vadd.f32 %v3999_v37, %v3969_v29  ;;  %v12620_v29 = vld [vmem:[#allocation26_spill] sm:$0xff]  ;;  %v12621_v37 = vld [vmem:[#allocation27_spill] sm:$0xff] }
 0xc44   : > { %9452 = vmatpush1.bf16.msra.mxu1 %v10280_v34 }
 0xc45   : > { %9454 = vmatprep.subr.bf16.mxu1 %v10288_v40 }
 0xc46   : > { %9440 = vmatpush3.bf16.msra.mxu0 %v10733_v42 }
 0xc47   : > { %9458 = vmatprep.subr.bf16.mxu0 %v10253_v9 }
 0xc48   : > { %9456 = vmatpush1.bf16.msra.mxu1 %v10295_v47 }
 0xc49   : > { %8488 = vmatmul.mubr.msk.f32.vlgmr.msra.gmra.mrb[36].mxu0 %vm411_vm0, %v4004_v28  ;;  %9473 = vmatprep.subr.bf16.mxu1 %v12492_v58  ;;  %v12622_v28 = vld [vmem:[#allocation28_spill] sm:$0xff] }
 0xc4a   : > { %9460 = vmatpush1.bf16.msra.mxu0 %v10257_v13  ;;  %4371 = vmatprep.mubr.f32.mxu0 %v12493_v11 }
 0xc4b   : > { %9462 = vmatprep.subr.bf16.mxu0 %v10266_v22 }
 0xc4e   : > { %9464 = vmatpush1.bf16.msra.mxu0 %v10269_v26 }
 0xc4f   : > { %9466 = vmatprep.subr.bf16.mxu0 %v12529_v7 }
 0xc52   : > { %9468 = vmatpush1.bf16.msra.mxu0 %v12530_v54 }
 0xc53   : > { %9470 = vmatprep.subr.bf16.mxu0 %v12531_v33 }
 0xc56   : > { %9472 = vmatpush1.bf16.msra.mxu0 %v12532_v62 }
 0xc57   : > { %9486 = vmatprep.subr.bf16.mxu0 %v12533_v23 }
 0xd0c   : > { %v7703_v60 = vpop.f32.mrb[34].mxu0 }
 0xd0d   : > { %v7738_v53 = vpop.f32.mrb[40].mxu1  ;;  %v7704_v55 = vpop.f32.mrb[35].mxu0 }
 0xd0e   : > { %v7705_v49 = vadd.f32 %v7704_v55, %v7703_v60  ;;  %v7739_v0 = vpop.f32.mrb[41].mxu1  ;;  %v12623_v60 = vld [vmem:[#allocation29_spill] sm:$0xff]  ;;  %v12625_v55 = vld [vmem:[#allocation31_spill] sm:$0xff] }
 0xd0f   : > { %v7740_v3 = vadd.f32 %v7739_v0, %v7738_v53  ;;  %v12624_v53 = vld [vmem:[#allocation30_spill] sm:$0xff]  ;;  %v12627_v0 = vld [vmem:[#allocation32_spill] sm:$0xff] }
 0xd10   : > { %v4081_v41 = vadd.f32 %v7705_v49, %v4009_v51  ;;  %v12626_v49 = vld [vmem:[#allocation38_spill] sm:$0xff]  ;;  %v12628_v51 = vld [vmem:[#allocation33_spill] sm:$0xff] }
 0xd12   : > { %v4151_v12 = vadd.f32 %v7740_v3, %v4081_v41  ;;  %v12629_v3 = vld [vmem:[#allocation40_spill] sm:$0xff]  ;;  %v12630_v41 = vld [vmem:[#allocation42_spill] sm:$0xff] }
 0xd1c   : > { %v4220_v1 = vpop.f32.mrb[36].mxu0 }
 0xd1d   : > { %v4221_v36 = vadd.f32 %v4220_v1, %v4151_v12  ;;  %v8489_v20 = vpop.f32.mrb[37].mxu0  ;;  %v12631_v12 = vld [vmem:[#allocation34_spill] sm:$0xff]  ;;  %v12632_v1 = vld [vmem:[#allocation35_spill] sm:$0xff] }
 0xd1e   : > { %v12634_v20 = vld [vmem:[#allocation36_spill] sm:$0xff] }
 0xd1f   : > { %v4225_v16 = vmul.f32 0.044715, %v4221_v36  ;;  %v4224_v63 = vmul.f32 0.5, %v4221_v36 }
 0xd21   : > { %v4226_v46 = vmul.f32 %v4225_v16, %v4221_v36  ;;  %v12635_v16 = vld [vmem:[#allocation37_spill] sm:$0xff] }
 0xd23   : > { %v4227_v56 = vmul.f32 %v4226_v46, %v4221_v36  ;;  %v12636_v46 = vld [vmem:[#allocation39_spill] sm:$0xff] }
 0xd25   : > { %v4228_v30 = vadd.f32 %v4227_v56, %v4221_v36  ;;  %v12633_v36 = vld [vmem:[#allocation44_spill] sm:$0xff]  ;;  %v12637_v56 = vld [vmem:[#allocation41_spill] sm:$0xff] }
 0xd27   : > { %v4229_v39 = vmul.f32 0.7978846, %v4228_v30  ;;  %v12638_v30 = vld [vmem:[#allocation43_spill] sm:$0xff] }
 0xd29   : > { %10090 = vtanh.f32 %v4229_v39  ;;  %v12639_v39 = vld [vmem:[#allocation45_spill] sm:$0xff] }
 0xd33   : > { %v10091_v44 = vpop.eup %10090 }
 0xd34   : > { %v4231_v61 = vadd.f32 1.0, %v10091_v44  ;;  %v12640_v44 = vld [vmem:[#allocation46_spill] sm:$0xff] }
 0xd36   : > { %v4232_v59 = vmul.f32 %v4231_v61, %v4224_v63  ;;  %v4448_v61 = vld [vmem:[%s12284_s1 + $0x2d0] sm:$0x3] }
 0xd38   : > { %7166 = vmatmul.mubr.msk.f32.vlgmr.msra.gmra.mrb[42].mxu1 %vm411_vm0, %v4232_v59  ;;  %7167 = vmatmul.mubr.msk.f32.vlgmr.msra.gmra.mrb[38].mxu0 %vm411_vm0, %v4232_v59 }
 0xd39   : > { %9475 = vmatpush3.bf16.msra.mxu1 %v10324_v57  ;;  %8506 = vmatprep.mubr.msk.f32.mxu1 %vm10145_vm1, %v12493_v11  ;;  %v4549_v57 = vld [vmem:[%s12284_s1 + $0x350] sm:$0x3] }
 0xd3a   : > { %9476 = vmatprep.subr.bf16.mxu1 %v12492_v58  ;;  %9488 = vmatpush3.bf16.msra.mxu0 %v12560_v48 }
 0xd3b   : > { %9490 = vmatprep.subr.bf16.mxu0 %v12561_v43 }
 0xd3d   : > { %9478 = vmatpush3.bf16.msra.mxu1 %v10350_v5 }
 0xd3e   : > { %9479 = vmatprep.subr.bf16.mxu1 %v12492_v58  ;;  %9492 = vmatpush3.bf16.msra.mxu0 %v12564_v45 }
 0xd3f   : > { %9494 = vmatprep.subr.bf16.mxu0 %v12565_v6 }
 0xd41   : > { %9481 = vmatpush3.bf16.msra.mxu1 %v10374_v19 }
 0xd42   : > { %9482 = vmatprep.subr.bf16.mxu1 %v12492_v58  ;;  %9496 = vmatpush3.bf16.msra.mxu0 %v12613_v14 }
 0xd43   : > { %9498 = vmatprep.subr.bf16.mxu0 %v12614_v38 }
 0xd45   : > { %9484 = vmatpush3.bf16.msra.mxu1 %v12615_v52  ;;  %v4513_v52 = vld [vmem:[%s12284_s1 + $0x320] sm:$0x3] }
 0xd46   : > { %9518 = vmatprep.subr.bf16.mxu1 %v12616_v4  ;;  %9500 = vmatpush3.bf16.msra.mxu0 %v12617_v50  ;;  %v4479_v4 = vld [vmem:[%s12284_s1 + $0x300] sm:$0x3] }
 0xd47   : > { %9502 = vmatprep.subr.bf16.mxu0 %v12618_v21 }
 0xd48   : > { %8507 = vmatmul.mubr.msk.f32.vlgmr.msra.gmra.mrb[44].mxu1 %vm411_vm0, %v4232_v59  ;;  %v4478_v59 = vld [vmem:[%s12284_s1 + $0x2f8] sm:$0x3] }
 0xd49   : > { %9520 = vmatpush3.bf16.msra.mxu1 %v12619_v2 }
 0xd4a   : > { %9522 = vmatprep.subr.bf16.mxu1 %v12620_v29  ;;  %9504 = vmatpush3.bf16.msra.mxu0 %v12621_v37 }
 0xd4b   : > { %9506 = vmatprep.subr.bf16.mxu0 %v12622_v28 }
 0xd4d   : > { %9524 = vmatpush3.bf16.msra.mxu1 %v12623_v60 }
 0xd4e   : > { %9526 = vmatprep.subr.bf16.mxu1 %v12624_v53  ;;  %9508 = vmatpush3.bf16.msra.mxu0 %v12625_v55 }
 0xd4f   : > { %9510 = vmatprep.subr.bf16.mxu0 %v12626_v49 }
 0xd51   : > { %9528 = vmatpush3.bf16.msra.mxu1 %v12627_v0 }
 0xd52   : > { %9530 = vmatprep.subr.bf16.mxu1 %v12628_v51  ;;  %9512 = vmatpush3.bf16.msra.mxu0 %v12629_v3 }
 0xd53   : > { %9514 = vmatprep.subr.bf16.mxu0 %v12630_v41  ;;  %v4514_v41 = vld [vmem:[%s12284_s1 + $0x328] sm:$0x3] }
 0xd55   : > { %9532 = vmatpush3.bf16.msra.mxu1 %v12631_v12 }
 0xd56   : > { %9534 = vmatprep.subr.bf16.mxu1 %v12632_v1  ;;  %9516 = vmatpush3.bf16.msra.mxu0 %v12633_v36  ;;  %v4449_v36 = vld [vmem:[%s12284_s1 + $0x2d8] sm:$0x3] }
 0xd57   : > { %9549 = vmatprep.subr.bf16.mxu0 %v12492_v58 }
 0xd59   : > { %9536 = vmatpush3.bf16.msra.mxu1 %v12634_v20 }
 0xd5a   : > { %9538 = vmatprep.subr.bf16.mxu1 %v12635_v16 }
 0xd5d   : > { %9540 = vmatpush3.bf16.msra.mxu1 %v12636_v46 }
 0xd5e   : > { %9542 = vmatprep.subr.bf16.mxu1 %v12637_v56 }
 0xd61   : > { %9544 = vmatpush3.bf16.msra.mxu1 %v12638_v30 }
 0xd62   : > { %9546 = vmatprep.subr.bf16.mxu1 %v12639_v39  ;;  %v4480_v39 = vld [vmem:[%s12284_s1 + $0x308] sm:$0x3] }
 0xd65   : > { %9548 = vmatpush3.bf16.msra.mxu1 %v12640_v44  ;;  %v4450_v44 = vld [vmem:[%s12284_s1 + $0x2e0] sm:$0x3] }
 0xd66   : > { %8528 = vmatprep.subr.mxu1 %v12493_v11 }
 0xe0b   : > { %v4302_v63 = vpop.f32.mrb[42].mxu1  ;;  %v4373_v46 = vpop.f32.mrb[38].mxu0 }
 0xe0c   : > { %v4456_v56 = vrot.slane %v4302_v63, %v10649_v31  ;;  %v4486_v30 = vrot.slane %v4302_v63, %v10652_v32  ;;  %v4304_v16 = vpop.f32.mrb[43].mxu1  ;;  %v4375_v20 = vpop.f32.mrb[39].mxu0  ;;  %v4464_v1 = vrot.slane %v4373_v46, %v10649_v31  ;;  %v4494_v12 = vrot.slane %v4373_v46, %v10652_v32 }
 0xe0d   : > { %v4521_v53 = vrot.slane %v4302_v63, %v12609_v25  ;;  %v4556_v60 = vrot.slane %v4302_v63, %v12610_v10  ;;  %v4490_v63 = vrot.slane %v4304_v16, %v10652_v32  ;;  %v4468_v3 = vrot.slane %v4375_v20, %v10649_v31 }
 0xe0e   : > { %v4473_v51 = vmul.f32 %v4456_v56, %v4448_v61  ;;  %v4503_v0 = vmul.f32 %v4486_v30, %v4478_v59  ;;  %v4475_v29 = vmul.f32 %v4464_v1, %v4450_v44  ;;  %v4505_v2 = vmul.f32 %v4494_v12, %v4480_v39  ;;  %v4451_v1 = vld [vmem:[%s12284_s1 + $0x2e8] sm:$0x3]  ;;  %v4481_v39 = vld [vmem:[%s12284_s1 + $0x310] sm:$0x3] }
 0xe0f   : > { %v4529_v56 = vrot.slane %v4373_v46, %v12609_v25  ;;  %v4460_v30 = vrot.slane %v4304_v16, %v10649_v31  ;;  %v4525_v12 = vrot.slane %v4304_v16, %v12609_v25  ;;  %v4515_v59 = vld [vmem:[%s12284_s1 + $0x330] sm:$0x3]  ;;  %v4498_v19 = vrot.slane %v4375_v20, %v10652_v32 }
 0xe10   : > { %v4508_v44 = vadd.f32 %v4503_v0, %v4473_v51  ;;  %v4510_v61 = vadd.f32 %v4505_v2, %v4475_v29  ;;  %v4504_v55 = vmul.f32 %v4490_v63, %v4479_v4  ;;  %v4560_v5 = vrot.slane %v4304_v16, %v12610_v10  ;;  %v4516_v2 = vld [vmem:[%s12284_s1 + $0x338] sm:$0x3]  ;;  %v4548_v4 = vld [vmem:[%s12284_s1 + $0x348] sm:$0x3] }
 0xe11   : > { %v4474_v49 = vmul.f32 %v4460_v30, %v4449_v36  ;;  %v4533_v29 = vrot.slane %v4375_v20, %v12609_v25  ;;  %v4538_v0 = vmul.f32 %v4521_v53, %v4513_v52  ;;  %v4476_v51 = vmul.f32 %v4468_v3, %v4451_v1  ;;  %v4551_v52 = vld [vmem:[%s12284_s1 + $0x360] sm:$0x3] }
 0xe12   : > { %v4506_v28 = vmul.f32 %v4498_v19, %v4481_v39  ;;  %v4568_v37 = vrot.slane %v4375_v20, %v12610_v10  ;;  %v4540_v36 = vmul.f32 %v4529_v56, %v4515_v59  ;;  %v4564_v16 = vrot.slane %v4373_v46, %v12610_v10  ;;  %v4550_v19 = vld [vmem:[%s12284_s1 + $0x358] sm:$0x3] }
 0xe13   : > { %v4539_v30 = vmul.f32 %v4525_v12, %v4514_v41  ;;  %v4509_v63 = vadd.f32 %v4504_v55, %v4474_v49  ;;  %v4541_v53 = vmul.f32 %v4533_v29, %v4516_v2  ;;  %v4543_v20 = vadd.f32 %v4538_v0, %v4508_v44 }
 0xe14   : > { %v4511_v3 = vadd.f32 %v4506_v28, %v4476_v51  ;;  %v4574_v39 = vmul.f32 %v4560_v5, %v4549_v57  ;;  %v4545_v21 = vadd.f32 %v4540_v36, %v4510_v61  ;;  %v4573_v50 = vmul.f32 %v4556_v60, %v4548_v4  ;;  %v4452_v28 = vld [vmem:[%s12284_s1 + $0x2f0] sm:$0x3]  ;;  %v4482_v57 = vld [vmem:[%s12284_s1 + $0x318] sm:$0x3]  ;;  %v4517_v61 = vld [vmem:[%s12284_s1 + $0x340] sm:$0x3] }
 0xe15   : > { %v4544_v1 = vadd.f32 %v4539_v30, %v4509_v63  ;;  %v4576_v59 = vmul.f32 %v4568_v37, %v4551_v52  ;;  %v4575_v46 = vmul.f32 %v4564_v16, %v4550_v19  ;;  %v4552_v51 = vld [vmem:[%s12284_s1 + $0x368] sm:$0x3] }
 0xe16   : > { %v4546_v56 = vadd.f32 %v4541_v53, %v4511_v3  ;;  %v4578_v49 = vadd.f32 %v4573_v50, %v4543_v20  ;;  %v4587_v53 = vpop.permute.xlu1 %4586 }
 0xe17   : > { %v4579_v41 = vadd.f32 %v4574_v39, %v4544_v1  ;;  %v4580_v12 = vadd.f32 %v4575_v46, %v4545_v21  ;;  %v3070_v1 = vpop.permute.xlu0 %3069  ;;  %v12641_v39 = vld [vmem:[#allocation51_spill] sm:$0xff] }
 0xe18   : > { %v4581_v55 = vadd.f32 %v4576_v59, %v4546_v56  ;;  %v3145_v56 = vadd.f32 %v12641_v39, %v3070_v1  ;;  %v12657_v1 = vld [vmem:[#allocation44_spill] sm:$0xff]  ;;  %v12658_v39 = vld [vmem:[#allocation25_spill] sm:$0xff] }
 0xe19   : > { %4656 = vmatprep.mubr.f32.mxu0 %v4579_v41 }
 0xe1a   : > { %4726 = vmatprep.mubr.f32.mxu1 %v4581_v55  ;;  %4657 = vmatmul.mubr.f32.vlgmr.msra.gmra.mrb[40].mxu0 %v4578_v49 }
 0xe1b   : > { %v4444_v47 = vpop.f32.mrb[44].mxu1  ;;  %4727 = vmatmul.mubr.f32.vlgmr.msra.gmra.mrb[46].mxu1 %v4580_v12  ;;  %9551 = vmatpush3.bf16.msra.mxu0 %v12611_v35 }
 0xe1c   : > { %v4472_v5 = vrot.slane %v4444_v47, %v10649_v31  ;;  %v4502_v50 = vrot.slane %v4444_v47, %v10652_v32  ;;  %v8508_v37 = vpop.f32.mrb[45].mxu1  ;;  %9552 = vmatprep.subr.bf16.mxu0 %v12492_v58  ;;  %8525 = vmatprep.mubr.msk.f32.mxu0 %vm10145_vm1, %v12493_v11  ;;  %v4537_v44 = vrot.slane %v4444_v47, %v12609_v25 }
 0xe1d   : > { %8530 = vmatprep.mubr.msk.f32.mxu1 %vm10145_vm1, %v12493_v11  ;;  %v4572_v0 = vrot.slane %v4444_v47, %v12610_v10  ;;  %v5141_v10 = vld [vmem:[%s12284_s1 + $0x3a8] sm:$0xf] }
 0xe1e   : > { %v4477_v21 = vmul.f32 %v4472_v5, %v4452_v28  ;;  %v4507_v60 = vmul.f32 %v4502_v50, %v4482_v57  ;;  %v4542_v29 = vmul.f32 %v4537_v44, %v4517_v61  ;;  %v4812_v61 = vld [vmem:[%s12286_s3 + $0x10] sm:$0x3] }
 0xe1f   : > { %9554 = vmatpush3.bf16.msra.mxu0 %v12612_v24  ;;  %v4577_v36 = vmul.f32 %v4572_v0, %v4552_v51  ;;  %v12644_v0 = vld [vmem:[#allocation23_spill] sm:$0xff]  ;;  %v12645_v51 = vld [vmem:[#allocation24_spill] sm:$0xff] }
 0xe20   : > { %v4512_v2 = vadd.f32 %v4507_v60, %v4477_v21  ;;  %9555 = vmatprep.subr.bf16.mxu0 %v12492_v58 }
 0xe22   : > { %v4547_v4 = vadd.f32 %v4542_v29, %v4512_v2  ;;  %v12642_v2 = vld [vmem:[#allocation5_spill] sm:$0xff] }
 0xe23   : > { %9557 = vmatpush3.bf16.msra.mxu0 %v10715_v15  ;;  %v12643_v29 = vld [vmem:[#allocation9_spill] sm:$0xff] }
 0xe24   : > { %9558 = vmatprep.subr.bf16.mxu0 %v12492_v58  ;;  %v4582_v16 = vadd.f32 %v4577_v36, %v4547_v4  ;;  %v12646_v4 = vld [vmem:[#allocation12_spill] sm:$0xff]  ;;  %v12647_v36 = vld [vmem:[#allocation27_spill] sm:$0xff] }
 0xe27   : > { %9560 = vmatpush3.bf16.msra.mxu0 %v10733_v42 }
 0xe28   : > { %9578 = vmatprep.subr.bf16.mxu0 %v10253_v9 }
 0xe2a   : > { %8526 = vmatmul.mubr.msk.f32.vlgmr.msra.gmra.mrb[42].mxu0 %vm411_vm0, %v4582_v16  ;;  %v12648_v16 = vld [vmem:[#allocation28_spill] sm:$0xff] }
 0xe2b   : > { %9580 = vmatpush1.bf16.msra.mxu0 %v10257_v13  ;;  %5032 = vmatprep.mubr.f32.mxu0 %v12493_v11 }
 0xe2c   : > { %9582 = vmatprep.subr.bf16.mxu0 %v10266_v22 }
 0xe2f   : > { %9584 = vmatpush1.bf16.msra.mxu0 %v10269_v26 }
 0xe30   : > { %9586 = vmatprep.subr.bf16.mxu0 %v12529_v7 }
 0xe33   : > { %9588 = vmatpush1.bf16.msra.mxu0 %v12530_v54 }
 0xe34   : > { %9590 = vmatprep.subr.bf16.mxu0 %v12531_v33 }
 0xe37   : > { %9592 = vmatpush1.bf16.msra.mxu0 %v12532_v62 }
 0xe38   : > { %9606 = vmatprep.subr.bf16.mxu0 %v12533_v23 }
 0xeed   : > { %v7791_v47 = vpop.f32.mrb[40].mxu0 }
 0xeee   : > { %v7826_v30 = vpop.f32.mrb[46].mxu1  ;;  %v7792_v63 = vpop.f32.mrb[41].mxu0 }
 0xeef   : > { %v7793_v52 = vadd.f32 %v7792_v63, %v7791_v47  ;;  %v7827_v19 = vpop.f32.mrb[47].mxu1  ;;  %v12649_v47 = vld [vmem:[#allocation15_spill] sm:$0xff]  ;;  %v12651_v63 = vld [vmem:[#allocation38_spill] sm:$0xff] }
 0xef0   : > { %v7828_v3 = vadd.f32 %v7827_v19, %v7826_v30  ;;  %v12650_v30 = vld [vmem:[#allocation31_spill] sm:$0xff]  ;;  %v12653_v19 = vld [vmem:[#allocation40_spill] sm:$0xff] }
 0xef1   : > { %v4659_v20 = vadd.f32 %v7793_v52, %v4587_v53  ;;  %v12652_v52 = vld [vmem:[#allocation18_spill] sm:$0xff] }
 0xef2   : > { %v12654_v53 = vld [vmem:[#allocation42_spill] sm:$0xff] }
 0xef3   : > { %v4729_v59 = vadd.f32 %v7828_v3, %v4659_v20  ;;  %v12655_v3 = vld [vmem:[#allocation21_spill] sm:$0xff]  ;;  %v12656_v20 = vld [vmem:[#allocation22_spill] sm:$0xff] }
 0xef5   : > { %v10045_v46 = vadd.f32 %v4729_v59, %v3145_v56  ;;  %v12659_v56 = vld [vmem:[#allocation26_spill] sm:$0xff]  ;;  %v12660_v59 = vld [vmem:[#allocation29_spill] sm:$0xff] }
 0xefd   : > { %v4798_v41 = vpop.f32.mrb[42].mxu0 }
 0xefe   : > { %v10046_v55 = vadd.f32 %v10045_v46, %v4798_v41  ;;  %v8527_v49 = vpop.f32.mrb[43].mxu0  ;;  %v12661_v46 = vld [vmem:[#allocation30_spill] sm:$0xff]  ;;  %v12662_v41 = vld [vmem:[#allocation32_spill] sm:$0xff] }
 0xeff   : > { %v12664_v49 = vld [vmem:[#allocation34_spill] sm:$0xff] }
 0xf00   : > { %v4804_v12 = vmul.f32 0.044715, %v10046_v55  ;;  %v4803_v21 = vmul.f32 0.5, %v10046_v55 }
 0xf02   : > { %v4805_v28 = vmul.f32 %v10046_v55, %v4804_v12  ;;  %v12665_v12 = vld [vmem:[#allocation35_spill] sm:$0xff] }
 0xf04   : > { %v4806_v57 = vmul.f32 %v10046_v55, %v4805_v28  ;;  %v12666_v28 = vld [vmem:[#allocation36_spill] sm:$0xff] }
 0xf06   : > { %v4807_v5 = vadd.f32 %v10046_v55, %v4806_v57  ;;  %v12663_v55 = vld [vmem:[#allocation33_spill] sm:$0xff] }
 0xf07   : > { %v12667_v57 = vld [vmem:[#allocation37_spill] sm:$0xff] }
 0xf08   : > { %v4808_v50 = vmul.f32 0.7978846, %v4807_v5  ;;  %v12668_v5 = vld [vmem:[#allocation39_spill] sm:$0xff] }
 0xf0a   : > { %10092 = vtanh.f32 %v4808_v50  ;;  %v12669_v50 = vld [vmem:[#allocation41_spill] sm:$0xff] }
 0xf14   : > { %v10093_v37 = vpop.eup %10092 }
 0xf15   : > { %v4810_v60 = vadd.f32 1.0, %v10093_v37  ;;  %v12670_v37 = vld [vmem:[#allocation43_spill] sm:$0xff] }
 0xf17   : > { %v4811_v44 = vmul.f32 %v4810_v60, %v4803_v21  ;;  %v12671_v21 = vld [vmem:[#allocation45_spill] sm:$0xff]  ;;  %v12672_v60 = vld [vmem:[#allocation46_spill] sm:$0xff] }
 0xf19   : > { %8529 = vmatpush3.msk.msra.mxu1 %vm1327_vm4, %v4811_v44  ;;  %7173 = vmatmul.mubr.msk.f32.vlgmr.msra.gmra.mrb[44].mxu0 %vm411_vm0, %v4811_v44 }
 0xf1a   : > { %9562 = vmatprep.subr.bf16.mxu1 %v12642_v2  ;;  %8531 = vmatmul.mubr.msk.f32.vlgmr.msra.gmra.mrb[48].mxu1 %vm1323_vm5, %v4812_v61  ;;  %v5111_v61 = vld [vmem:[%s12284_s1 + $0x380] sm:$0xf] }
 0xf1b   : > { %9564 = vmatpush1.bf16.msra.mxu1 %v10251_v8  ;;  %4961 = vmatprep.mubr.f32.mxu1 %v12493_v11 }
 0xf1c   : > { %9566 = vmatprep.subr.bf16.mxu1 %v10261_v17  ;;  %9608 = vmatpush3.bf16.msra.mxu0 %v12560_v48 }
 0xf1d   : > { %9610 = vmatprep.subr.bf16.mxu0 %v12561_v43 }
 0xf1f   : > { %9568 = vmatpush1.bf16.msra.mxu1 %v10263_v18 }
 0xf20   : > { %9570 = vmatprep.subr.bf16.mxu1 %v10271_v27  ;;  %9612 = vmatpush3.bf16.msra.mxu0 %v12564_v45 }
 0xf21   : > { %9614 = vmatprep.subr.bf16.mxu0 %v12565_v6 }
 0xf23   : > { %9572 = vmatpush1.bf16.msra.mxu1 %v10280_v34 }
 0xf24   : > { %9574 = vmatprep.subr.bf16.mxu1 %v10288_v40  ;;  %9616 = vmatpush3.bf16.msra.mxu0 %v12613_v14 }
 0xf25   : > { %9618 = vmatprep.subr.bf16.mxu0 %v12614_v38 }
 0xf27   : > { %9576 = vmatpush1.bf16.msra.mxu1 %v12643_v29 }
 0xf28   : > { %9593 = vmatprep.subr.bf16.mxu1 %v12492_v58  ;;  %9620 = vmatpush3.bf16.msra.mxu0 %v12644_v0 }
 0xf29   : > { %9622 = vmatprep.subr.bf16.mxu0 %v12645_v51 }
 0xf2a   : > { %7172 = vmatmul.mubr.msk.f32.vlgmr.msra.gmra.mrb[50].mxu1 %vm411_vm0, %v4811_v44 }
 0xf2b   : > { %9595 = vmatpush3.bf16.msra.mxu1 %v12646_v4  ;;  %8549 = vmatprep.mubr.msk.f32.mxu1 %vm10145_vm1, %v12493_v11 }
 0xf2c   : > { %9596 = vmatprep.subr.bf16.mxu1 %v12492_v58  ;;  %9624 = vmatpush3.bf16.msra.mxu0 %v12647_v36 }
 0xf2d   : > { %9626 = vmatprep.subr.bf16.mxu0 %v12648_v16 }
 0xf2f   : > { %9598 = vmatpush3.bf16.msra.mxu1 %v12649_v47 }
 0xf30   : > { %9599 = vmatprep.subr.bf16.mxu1 %v12492_v58  ;;  %9628 = vmatpush3.bf16.msra.mxu0 %v12650_v30 }
 0xf31   : > { %9630 = vmatprep.subr.bf16.mxu0 %v12651_v63 }
 0xf33   : > { %9601 = vmatpush3.bf16.msra.mxu1 %v12652_v52 }
 0xf34   : > { %9602 = vmatprep.subr.bf16.mxu1 %v12492_v58  ;;  %9632 = vmatpush3.bf16.msra.mxu0 %v12653_v19 }
 0xf35   : > { %9634 = vmatprep.subr.bf16.mxu0 %v12654_v53 }
 0xf37   : > { %9604 = vmatpush3.bf16.msra.mxu1 %v12655_v3 }
 0xf38   : > { %9638 = vmatprep.subr.bf16.mxu1 %v12656_v20  ;;  %9636 = vmatpush3.bf16.msra.mxu0 %v12657_v1 }
 0xf39   : > { %9669 = vmatprep.subr.bf16.mxu0 %v12492_v58 }
 0xf3a   : > { %8550 = vmatmul.mubr.msk.f32.vlgmr.msra.gmra.mrb[52].mxu1 %vm411_vm0, %v4811_v44 }
 0xf3b   : > { %9640 = vmatpush3.bf16.msra.mxu1 %v12658_v39 }
 0xf3c   : > { %9642 = vmatprep.subr.bf16.mxu1 %v12659_v56 }
 0xf3f   : > { %9644 = vmatpush3.bf16.msra.mxu1 %v12660_v59 }
 0xf40   : > { %9646 = vmatprep.subr.bf16.mxu1 %v12661_v46 }
 0xf43   : > { %9648 = vmatpush3.bf16.msra.mxu1 %v12662_v41 }
 0xf44   : > { %9650 = vmatprep.subr.bf16.mxu1 %v12663_v55 }
 0xf47   : > { %9652 = vmatpush3.bf16.msra.mxu1 %v12664_v49 }
 0xf48   : > { %9654 = vmatprep.subr.bf16.mxu1 %v12665_v12 }
 0xf4b   : > { %9656 = vmatpush3.bf16.msra.mxu1 %v12666_v28 }
 0xf4c   : > { %9658 = vmatprep.subr.bf16.mxu1 %v12667_v57 }
 0xf4f   : > { %9660 = vmatpush3.bf16.msra.mxu1 %v12668_v5 }
 0xf50   : > { %9662 = vmatprep.subr.bf16.mxu1 %v12669_v50 }
 0xf53   : > { %9664 = vmatpush3.bf16.msra.mxu1 %v12670_v37 }
 0xf54   : > { %9666 = vmatprep.subr.bf16.mxu1 %v12671_v21 }
 0xf57   : > { %9668 = vmatpush3.bf16.msra.mxu1 %v12672_v60  ;;  %v5112_v60 = vld [vmem:[%s12284_s1 + $0x388] sm:$0xf] }
 0xf58   : > { %9682 = vmatprep.subr.bf16.mxu1 %v12642_v2  ;;  %v5142_v2 = vld [vmem:[%s12284_s1 + $0x3b0] sm:$0xf] }
 0xfec   : > { %v5034_v44 = vpop.f32.mrb[44].mxu0 }
 0xfed   : > { %v5125_v25 = vrot.slane %v5034_v44, %v10649_v31  ;;  %v5155_v50 = vrot.slane %v5034_v44, %v10652_v32  ;;  %v5036_v37 = vpop.f32.mrb[45].mxu0 }
 0xfee   : > { %v5129_v21 = vrot.slane %v5036_v37, %v10649_v31  ;;  %v5159_v5 = vrot.slane %v5036_v37, %v10652_v32 }
 0xfef   : > { %v5136_v57 = vmul.f32 %v5125_v25, %v5111_v61  ;;  %v5166_v28 = vmul.f32 %v5155_v50, %v5141_v10  ;;  %v5109_v10 = vld [vmem:[%s12284_s1 + $0x370] sm:$0xf]  ;;  %v5139_v25 = vld [vmem:[%s12284_s1 + $0x398] sm:$0xf] }
 0xff0   : > { %v5137_v1 = vmul.f32 %v5129_v21, %v5112_v60  ;;  %v5167_v12 = vmul.f32 %v5159_v5, %v5142_v2 }
 0xff1   : > { %v5171_v53 = vadd.f32 %v5166_v28, %v5136_v57 }
 0xff2   : > { %v5172_v49 = vadd.f32 %v5167_v12, %v5137_v1  ;;  %v5140_v12 = vld [vmem:[%s12284_s1 + $0x3a0] sm:$0xf] }
 0xff4   : > { %5317 = vmatprep.mubr.f32.mxu1 %v5172_v49  ;;  %v5110_v49 = vld [vmem:[%s12284_s1 + $0x378] sm:$0xf] }
 0xff5   : > { %5318 = vmatmul.mubr.f32.vlgmr.msra.gmra.mrb[54].mxu1 %v5171_v53 }
 0xff6   : > { %9684 = vmatpush1.bf16.msra.mxu1 %v10251_v8  ;;  %5469 = vmatprep.mubr.f32.mxu1 %v12493_v11 }
 0xff7   : > { %9686 = vmatprep.subr.bf16.mxu1 %v10261_v17 }
 0xffa   : > { %9688 = vmatpush1.bf16.msra.mxu1 %v10263_v18 }
 0xffb   : > { %9690 = vmatprep.subr.bf16.mxu1 %v10271_v27 }
 0xffd   : > { %v4963_v44 = vpop.f32.mrb[50].mxu1 }
 0xffe   : > { %v5117_v2 = vrot.slane %v4963_v44, %v10649_v31  ;;  %v5147_v53 = vrot.slane %v4963_v44, %v10652_v32  ;;  %v4965_v1 = vpop.f32.mrb[51].mxu1  ;;  %9692 = vmatpush1.bf16.msra.mxu1 %v10280_v34 }
 0xfff   : > { %v5121_v28 = vrot.slane %v4965_v1, %v10649_v31  ;;  %v5151_v57 = vrot.slane %v4965_v1, %v10652_v32  ;;  %9694 = vmatprep.subr.bf16.mxu1 %v10288_v40 }
0x1000   : > { %v5134_v5 = vmul.f32 %v5117_v2, %v5109_v10  ;;  %v5164_v50 = vmul.f32 %v5147_v53, %v5139_v25  ;;  %v5113_v10 = vld [vmem:[%s12284_s1 + $0x390] sm:$0xf]  ;;  %v5143_v25 = vld [vmem:[%s12284_s1 + $0x3b8] sm:$0xf] }
0x1001   : > { %v5135_v37 = vmul.f32 %v5121_v28, %v5110_v49  ;;  %v5165_v21 = vmul.f32 %v5151_v57, %v5140_v12 }
0x1002   : > { %9696 = vmatpush1.bf16.msra.mxu1 %v12643_v29  ;;  %v5169_v61 = vadd.f32 %v5164_v50, %v5134_v5 }
0x1003   : > { %v5170_v60 = vadd.f32 %v5165_v21, %v5135_v37  ;;  %9713 = vmatprep.subr.bf16.mxu1 %v12492_v58 }
0x1005   : > { %5247 = vmatprep.mubr.f32.mxu0 %v5170_v60 }
0x1006   : > { %5248 = vmatmul.mubr.f32.vlgmr.msra.gmra.mrb[46].mxu0 %v5169_v61  ;;  %v5178_v61 = vpop.permute.xlu1 %5177 }
0x1007   : > { %9671 = vmatpush3.bf16.msra.mxu0 %v12611_v35  ;;  %8568 = vmatprep.mubr.msk.f32.mxu0 %vm10145_vm1, %v12493_v11 }
0x1008   : > { %9672 = vmatprep.subr.bf16.mxu0 %v12492_v58 }
0x100b   : > { %9674 = vmatpush3.bf16.msra.mxu0 %v12612_v24 }
0x100c   : > { %9675 = vmatprep.subr.bf16.mxu0 %v12492_v58 }
0x100d   : > { %v5105_v44 = vpop.f32.mrb[52].mxu1 }
0x100e   : > { %v5133_v2 = vrot.slane %v5105_v44, %v10649_v31  ;;  %v5163_v53 = vrot.slane %v5105_v44, %v10652_v32  ;;  %v8551_v1 = vpop.f32.mrb[53].mxu1 }
0x100f   : > { %9677 = vmatpush3.bf16.msra.mxu0 %v10715_v15 }
0x1010   : > { %v5138_v49 = vmul.f32 %v5133_v2, %v5113_v10  ;;  %v5168_v12 = vmul.f32 %v5163_v53, %v5143_v25  ;;  %9678 = vmatprep.subr.bf16.mxu0 %v12492_v58 }
0x1012   : > { %v5173_v28 = vadd.f32 %v5168_v12, %v5138_v49 }
0x1013   : > { %9680 = vmatpush3.bf16.msra.mxu0 %v10733_v42 }
0x1014   : > { %9698 = vmatprep.subr.bf16.mxu0 %v10253_v9 }
0x1016   : > { %8569 = vmatmul.mubr.msk.f32.vlgmr.msra.gmra.mrb[48].mxu0 %vm411_vm0, %v5173_v28 }
0x1017   : > { %9700 = vmatpush1.bf16.msra.mxu0 %v10257_v13  ;;  %5540 = vmatprep.mubr.f32.mxu0 %v12493_v11 }
0x1018   : > { %9702 = vmatprep.subr.bf16.mxu0 %v10266_v22 }
0x101b   : > { %9704 = vmatpush1.bf16.msra.mxu0 %v10269_v26 }
0x101c   : > { %9706 = vmatprep.subr.bf16.mxu0 %v12529_v7 }
0x101f   : > { %9708 = vmatpush1.bf16.msra.mxu0 %v12530_v54 }
0x1020   : > { %9710 = vmatprep.subr.bf16.mxu0 %v12531_v33 }
0x1023   : > { %9712 = vmatpush1.bf16.msra.mxu0 %v12532_v62 }
0x1024   : > { %9726 = vmatprep.subr.bf16.mxu0 %v12533_v23 }
0x10c8   : > { %v7916_v57 = vpop.f32.mrb[54].mxu1 }
0x10c9   : > { %v7917_v5 = vpop.f32.mrb[55].mxu1 }
0x10ca   : > { %v7918_v50 = vadd.f32 %v7917_v5, %v7916_v57  ;;  %v12678_v57 = vld [vmem:[#allocation37_spill] sm:$0xff]  ;;  %v12679_v5 = vld [vmem:[#allocation39_spill] sm:$0xff] }
0x10d9   : > { %v7881_v37 = vpop.f32.mrb[46].mxu0 }
0x10da   : > { %v7882_v21 = vpop.f32.mrb[47].mxu0 }
0x10db   : > { %v7883_v60 = vadd.f32 %v7882_v21, %v7881_v37  ;;  %v12681_v37 = vld [vmem:[#allocation43_spill] sm:$0xff]  ;;  %v12682_v21 = vld [vmem:[#allocation45_spill] sm:$0xff] }
0x10dd   : > { %v5250_v44 = vadd.f32 %v7883_v60, %v5178_v61  ;;  %v12683_v60 = vld [vmem:[#allocation46_spill] sm:$0xff]  ;;  %v12684_v61 = vld [vmem:[#allocation5_spill] sm:$0xff] }
0x10df   : > { %v5320_v10 = vadd.f32 %v7918_v50, %v5250_v44  ;;  %v12680_v50 = vld [vmem:[#allocation41_spill] sm:$0xff] }
0x10e9   : > { %v5389_v25 = vpop.f32.mrb[48].mxu0 }
0x10ea   : > { %v5390_v2 = vadd.f32 %v5389_v25, %v5320_v10  ;;  %v8570_v53 = vpop.f32.mrb[49].mxu0  ;;  %v5617_v10 = vld [vmem:[%s12284_s1 + $0x3c0] sm:$0xf]  ;;  %v5647_v25 = vld [vmem:[%s12284_s1 + $0x3e8] sm:$0xf] }
0x10ec   : > { %v5394_v1 = vmul.f32 0.044715, %v5390_v2  ;;  %v5393_v23 = vmul.f32 0.5, %v5390_v2 }
0x10ee   : > { %v5395_v49 = vmul.f32 %v5394_v1, %v5390_v2 }
0x10f0   : > { %v5396_v12 = vmul.f32 %v5395_v49, %v5390_v2  ;;  %v5619_v49 = vld [vmem:[%s12284_s1 + $0x3d0] sm:$0xf] }
0x10f2   : > { %v5397_v28 = vadd.f32 %v5396_v12, %v5390_v2  ;;  %v5649_v12 = vld [vmem:[%s12284_s1 + $0x3f8] sm:$0xf] }
0x10f4   : > { %v5398_v33 = vmul.f32 0.7978846, %v5397_v28 }
0x10f6   : > { %10094 = vtanh.f32 %v5398_v33  ;;  %v12675_v33 = vld [vmem:[#allocation35_spill] sm:$0xff] }
0x1100   : > { %v10095_v62 = vpop.eup %10094 }
0x1101   : > { %v5400_v54 = vadd.f32 1.0, %v10095_v62  ;;  %v12676_v62 = vld [vmem:[#allocation44_spill] sm:$0xff] }
0x1103   : > { %v5401_v7 = vmul.f32 %v5400_v54, %v5393_v23  ;;  %v12674_v54 = vld [vmem:[#allocation34_spill] sm:$0xff]  ;;  %v12677_v23 = vld [vmem:[#allocation36_spill] sm:$0xff] }
0x1105   : > { %7176 = vmatmul.mubr.msk.f32.vlgmr.msra.gmra.mrb[56].mxu1 %vm411_vm0, %v5401_v7  ;;  %7177 = vmatmul.mubr.msk.f32.vlgmr.msra.gmra.mrb[50].mxu0 %vm411_vm0, %v5401_v7 }
0x1106   : > { %9715 = vmatpush3.bf16.msra.mxu1 %v12646_v4  ;;  %8587 = vmatprep.mubr.msk.f32.mxu1 %vm10145_vm1, %v12493_v11 }
0x1107   : > { %9716 = vmatprep.subr.bf16.mxu1 %v12492_v58  ;;  %9728 = vmatpush3.bf16.msra.mxu0 %v12560_v48 }
0x1108   : > { %9730 = vmatprep.subr.bf16.mxu0 %v12561_v43 }
0x110a   : > { %9718 = vmatpush3.bf16.msra.mxu1 %v12649_v47 }
0x110b   : > { %9719 = vmatprep.subr.bf16.mxu1 %v12492_v58  ;;  %9732 = vmatpush3.bf16.msra.mxu0 %v12564_v45 }
0x110c   : > { %9734 = vmatprep.subr.bf16.mxu0 %v12565_v6 }
0x110e   : > { %9721 = vmatpush3.bf16.msra.mxu1 %v12652_v52 }
0x110f   : > { %9722 = vmatprep.subr.bf16.mxu1 %v12492_v58  ;;  %9736 = vmatpush3.bf16.msra.mxu0 %v12613_v14 }
0x1110   : > { %9738 = vmatprep.subr.bf16.mxu0 %v12614_v38 }
0x1112   : > { %9724 = vmatpush3.bf16.msra.mxu1 %v12655_v3 }
0x1113   : > { %9758 = vmatprep.subr.bf16.mxu1 %v12656_v20  ;;  %9740 = vmatpush3.bf16.msra.mxu0 %v12644_v0 }
0x1114   : > { %9742 = vmatprep.subr.bf16.mxu0 %v12645_v51 }
0x1115   : > { %8588 = vmatmul.mubr.msk.f32.vlgmr.msra.gmra.mrb[58].mxu1 %vm411_vm0, %v5401_v7  ;;  %v12673_v7 = vld [vmem:[#allocation42_spill] sm:$0xff] }
0x1116   : > { %9760 = vmatpush3.bf16.msra.mxu1 %v12658_v39  ;;  %v5718_v39 = vld [vmem:[%s12284_s1 + $0x440] sm:$0xf] }
0x1117   : > { %9762 = vmatprep.subr.bf16.mxu1 %v12659_v56  ;;  %9744 = vmatpush3.bf16.msra.mxu0 %v12647_v36 }
0x1118   : > { %9746 = vmatprep.subr.bf16.mxu0 %v12648_v16 }
0x111a   : > { %9764 = vmatpush3.bf16.msra.mxu1 %v12660_v59 }
0x111b   : > { %9766 = vmatprep.subr.bf16.mxu1 %v12661_v46  ;;  %9748 = vmatpush3.bf16.msra.mxu0 %v12650_v30 }
0x111c   : > { %9750 = vmatprep.subr.bf16.mxu0 %v12651_v63 }
0x111e   : > { %9768 = vmatpush3.bf16.msra.mxu1 %v12662_v41  ;;  %v5683_v41 = vld [vmem:[%s12284_s1 + $0x418] sm:$0xf] }
0x111f   : > { %9770 = vmatprep.subr.bf16.mxu1 %v12663_v55  ;;  %9752 = vmatpush3.bf16.msra.mxu0 %v12653_v19  ;;  %v5648_v19 = vld [vmem:[%s12284_s1 + $0x3f0] sm:$0xf] }
0x1120   : > { %9754 = vmatprep.subr.bf16.mxu0 %v12673_v7  ;;  %v5618_v7 = vld [vmem:[%s12284_s1 + $0x3c8] sm:$0xf]  ;;  %v5682_v55 = vld [vmem:[%s12284_s1 + $0x410] sm:$0xf] }
0x1122   : > { %9772 = vmatpush3.bf16.msra.mxu1 %v12674_v54 }
0x1123   : > { %9774 = vmatprep.subr.bf16.mxu1 %v12675_v33  ;;  %9756 = vmatpush3.bf16.msra.mxu0 %v12676_v62 }
0x1124   : > { %9789 = vmatprep.subr.bf16.mxu0 %v12492_v58 }
0x1126   : > { %9776 = vmatpush3.bf16.msra.mxu1 %v12677_v23 }
0x1127   : > { %9778 = vmatprep.subr.bf16.mxu1 %v12678_v57  ;;  %v12685_v57 = vld [vmem:[#allocation47_spill] sm:$0xff] }
0x112a   : > { %9780 = vmatpush3.bf16.msra.mxu1 %v12679_v5 }
0x112b   : > { %9782 = vmatprep.subr.bf16.mxu1 %v12680_v50 }
0x112e   : > { %9784 = vmatpush3.bf16.msra.mxu1 %v12681_v37 }
0x112f   : > { %9786 = vmatprep.subr.bf16.mxu1 %v12682_v21 }
0x1132   : > { %9788 = vmatpush3.bf16.msra.mxu1 %v12683_v60 }
0x1133   : > { %9802 = vmatprep.subr.bf16.mxu1 %v12684_v61  ;;  %v12686_v61 = vld [vmem:[#allocation50_spill] sm:$0xff] }
0x11d8   : > { %v5471_v44 = vpop.f32.mrb[56].mxu1  ;;  %v5542_v2 = vpop.f32.mrb[50].mxu0 }
0x11d9   : > { %v5625_v53 = vrot.slane %v5471_v44, %v10649_v31  ;;  %v5655_v1 = vrot.slane %v5471_v44, %v10652_v32  ;;  %v5473_v28 = vpop.f32.mrb[57].mxu1  ;;  %v5544_v60 = vpop.f32.mrb[51].mxu0  ;;  %v5633_v21 = vrot.slane %v5542_v2, %v10649_v31  ;;  %v5663_v37 = vrot.slane %v5542_v2, %v10652_v32 }
0x11da   : > { %v5690_v23 = vrot.slane %v5471_v44, %v12685_v57  ;;  %v5725_v62 = vrot.slane %v5471_v44, %v12686_v61  ;;  %v5659_v44 = vrot.slane %v5473_v28, %v10652_v32  ;;  %v5637_v63 = vrot.slane %v5544_v60, %v10649_v31 }
0x11db   : > { %v5642_v50 = vmul.f32 %v5625_v53, %v5617_v10  ;;  %v5672_v5 = vmul.f32 %v5655_v1, %v5647_v25  ;;  %v5644_v33 = vmul.f32 %v5633_v21, %v5619_v49  ;;  %v5674_v54 = vmul.f32 %v5663_v37, %v5649_v12  ;;  %v5620_v21 = vld [vmem:[%s12284_s1 + $0x3d8] sm:$0xf]  ;;  %v5650_v53 = vld [vmem:[%s12284_s1 + $0x400] sm:$0xf] }
0x11dc   : > { %v5698_v10 = vrot.slane %v5542_v2, %v12685_v57  ;;  %v5629_v25 = vrot.slane %v5473_v28, %v10649_v31  ;;  %v5694_v37 = vrot.slane %v5473_v28, %v12685_v57  ;;  %v5684_v12 = vld [vmem:[%s12284_s1 + $0x420] sm:$0xf]  ;;  %v5667_v30 = vrot.slane %v5544_v60, %v10652_v32 }
0x11dd   : > { %v5677_v1 = vadd.f32 %v5672_v5, %v5642_v50  ;;  %v5679_v49 = vadd.f32 %v5674_v54, %v5644_v33  ;;  %v5673_v59 = vmul.f32 %v5659_v44, %v5648_v19  ;;  %v5729_v16 = vrot.slane %v5473_v28, %v12686_v61  ;;  %v5685_v54 = vld [vmem:[%s12284_s1 + $0x428] sm:$0xf]  ;;  %v5717_v19 = vld [vmem:[%s12284_s1 + $0x438] sm:$0xf] }
0x11de   : > { %v5643_v46 = vmul.f32 %v5629_v25, %v5618_v7  ;;  %v5702_v33 = vrot.slane %v5544_v60, %v12685_v57  ;;  %v5707_v5 = vmul.f32 %v5690_v23, %v5682_v55  ;;  %v5645_v50 = vmul.f32 %v5637_v63, %v5620_v21  ;;  %v5720_v63 = vld [vmem:[%s12284_s1 + $0x450] sm:$0xf] }
0x11df   : > { %v5675_v36 = vmul.f32 %v5667_v30, %v5650_v53  ;;  %v5737_v56 = vrot.slane %v5544_v60, %v12686_v61  ;;  %v5709_v7 = vmul.f32 %v5698_v10, %v5684_v12  ;;  %v5733_v28 = vrot.slane %v5542_v2, %v12686_v61  ;;  %v5719_v30 = vld [vmem:[%s12284_s1 + $0x448] sm:$0xf] }
0x11e0   : > { %v5708_v25 = vmul.f32 %v5694_v37, %v5683_v41  ;;  %v5678_v44 = vadd.f32 %v5673_v59, %v5643_v46  ;;  %v5710_v55 = vmul.f32 %v5702_v33, %v5685_v54  ;;  %v5712_v60 = vadd.f32 %v5707_v5, %v5677_v1 }
0x11e1   : > { %v5680_v23 = vadd.f32 %v5675_v36, %v5645_v50  ;;  %v5743_v53 = vmul.f32 %v5729_v16, %v5718_v39  ;;  %v5714_v51 = vadd.f32 %v5709_v7, %v5679_v49  ;;  %v5742_v0 = vmul.f32 %v5725_v62, %v5717_v19  ;;  %v5621_v36 = vld [vmem:[%s12284_s1 + $0x3e0] sm:$0xf]  ;;  %v5651_v16 = vld [vmem:[%s12284_s1 + $0x408] sm:$0xf]  ;;  %v5686_v49 = vld [vmem:[%s12284_s1 + $0x430] sm:$0xf] }
0x11e2   : > { %v5713_v21 = vadd.f32 %v5708_v25, %v5678_v44  ;;  %v5745_v12 = vmul.f32 %v5737_v56, %v5720_v63  ;;  %v5744_v2 = vmul.f32 %v5733_v28, %v5719_v30  ;;  %v5721_v50 = vld [vmem:[%s12284_s1 + $0x458] sm:$0xf]  ;;  %v12688_v25 = vld [vmem:[#allocation7_spill] sm:$0xff]  ;;  %v12690_v63 = vld [vmem:[#allocation10_spill] sm:$0xff] }
0x11e3   : > { %v5715_v10 = vadd.f32 %v5710_v55, %v5680_v23  ;;  %v5747_v46 = vadd.f32 %v5742_v0, %v5712_v60  ;;  %v12689_v44 = vld [vmem:[#allocation8_spill] sm:$0xff]  ;;  %v12691_v30 = vld [vmem:[#allocation11_spill] sm:$0xff] }
0x11e4   : > { %v5748_v41 = vadd.f32 %v5743_v53, %v5713_v21  ;;  %v5749_v37 = vadd.f32 %v5744_v2, %v5714_v51 }
0x11e5   : > { %v5750_v59 = vadd.f32 %v5745_v12, %v5715_v10  ;;  %v5756_v10 = vpop.permute.xlu0 %5755 }
0x11e6   : > { %5825 = vmatprep.mubr.f32.mxu0 %v5748_v41 }
0x11e7   : > { %5895 = vmatprep.mubr.f32.mxu1 %v5750_v59  ;;  %5826 = vmatmul.mubr.f32.vlgmr.msra.gmra.mrb[52].mxu0 %v5747_v46 }
0x11e8   : > { %v5613_v20 = vpop.f32.mrb[58].mxu1  ;;  %5896 = vmatmul.mubr.f32.vlgmr.msra.gmra.mrb[60].mxu1 %v5749_v37  ;;  %9791 = vmatpush3.bf16.msra.mxu0 %v12611_v35 }
0x11e9   : > { %v5641_v39 = vrot.slane %v5613_v20, %v10649_v31  ;;  %v5671_v0 = vrot.slane %v5613_v20, %v10652_v32  ;;  %v8589_v56 = vpop.f32.mrb[59].mxu1  ;;  %9792 = vmatprep.subr.bf16.mxu0 %v12492_v58  ;;  %8606 = vmatprep.mubr.msk.f32.mxu0 %vm10145_vm1, %v12493_v11  ;;  %v5706_v1 = vrot.slane %v5613_v20, %v12685_v57 }
0x11ea   : > { %9804 = vmatpush1.bf16.msra.mxu1 %v10251_v8  ;;  %6047 = vmatprep.mubr.f32.mxu1 %v12493_v11  ;;  %v5741_v5 = vrot.slane %v5613_v20, %v12686_v61  ;;  %v12687_v20 = vld [vmem:[#allocation6_spill] sm:$0xff] }
0x11eb   : > { %v5646_v51 = vmul.f32 %v5641_v39, %v5621_v36  ;;  %v5676_v62 = vmul.f32 %v5671_v0, %v5651_v16  ;;  %9806 = vmatprep.subr.bf16.mxu1 %v10261_v17  ;;  %v5711_v33 = vmul.f32 %v5706_v1, %v5686_v49 }
0x11ec   : > { %9794 = vmatpush3.bf16.msra.mxu0 %v12612_v24  ;;  %v5746_v7 = vmul.f32 %v5741_v5, %v5721_v50  ;;  %v12694_v5 = vld [vmem:[#allocation24_spill] sm:$0xff]  ;;  %v12695_v50 = vld [vmem:[#allocation25_spill] sm:$0xff] }
0x11ed   : > { %v5681_v54 = vadd.f32 %v5676_v62, %v5646_v51  ;;  %9795 = vmatprep.subr.bf16.mxu0 %v12492_v58 }
0x11ee   : > { %9808 = vmatpush1.bf16.msra.mxu1 %v10263_v18 }
0x11ef   : > { %9810 = vmatprep.subr.bf16.mxu1 %v10271_v27  ;;  %v5716_v19 = vadd.f32 %v5711_v33, %v5681_v54  ;;  %v12692_v54 = vld [vmem:[#allocation22_spill] sm:$0xff]  ;;  %v12693_v33 = vld [vmem:[#allocation23_spill] sm:$0xff] }
0x11f0   : > { %9797 = vmatpush3.bf16.msra.mxu0 %v10715_v15 }
0x11f1   : > { %9798 = vmatprep.subr.bf16.mxu0 %v12492_v58  ;;  %v5751_v28 = vadd.f32 %v5746_v7, %v5716_v19  ;;  %v12696_v19 = vld [vmem:[#allocation26_spill] sm:$0xff]  ;;  %v12697_v7 = vld [vmem:[#allocation27_spill] sm:$0xff] }
0x11f2   : > { %9812 = vmatpush1.bf16.msra.mxu1 %v10280_v34 }
0x11f3   : > { %9814 = vmatprep.subr.bf16.mxu1 %v10288_v40 }
0x11f4   : > { %9800 = vmatpush3.bf16.msra.mxu0 %v10733_v42 }
0x11f5   : > { %9818 = vmatprep.subr.bf16.mxu0 %v10253_v9 }
0x11f6   : > { %9816 = vmatpush1.bf16.msra.mxu1 %v12643_v29 }
0x11f7   : > { %8607 = vmatmul.mubr.msk.f32.vlgmr.msra.gmra.mrb[54].mxu0 %vm411_vm0, %v5751_v28  ;;  %9833 = vmatprep.subr.bf16.mxu1 %v12492_v58  ;;  %v12698_v28 = vld [vmem:[#allocation28_spill] sm:$0xff] }
0x11f8   : > { %9820 = vmatpush1.bf16.msra.mxu0 %v10257_v13  ;;  %6118 = vmatprep.mubr.f32.mxu0 %v12493_v11 }
0x11f9   : > { %9822 = vmatprep.subr.bf16.mxu0 %v10266_v22 }
0x11fc   : > { %9824 = vmatpush1.bf16.msra.mxu0 %v10269_v26 }
0x11fd   : > { %9826 = vmatprep.subr.bf16.mxu0 %v12687_v20 }
0x1200   : > { %9828 = vmatpush1.bf16.msra.mxu0 %v12688_v25 }
0x1201   : > { %9830 = vmatprep.subr.bf16.mxu0 %v12689_v44 }
0x1204   : > { %9832 = vmatpush1.bf16.msra.mxu0 %v12690_v63 }
0x1205   : > { %9846 = vmatprep.subr.bf16.mxu0 %v12691_v30 }
0x12ba   : > { %v7969_v55 = vpop.f32.mrb[52].mxu0 }
0x12bb   : > { %v8004_v23 = vpop.f32.mrb[60].mxu1  ;;  %v7970_v60 = vpop.f32.mrb[53].mxu0 }
0x12bc   : > { %v7971_v21 = vadd.f32 %v7970_v60, %v7969_v55  ;;  %v8005_v53 = vpop.f32.mrb[61].mxu1  ;;  %v12699_v55 = vld [vmem:[#allocation29_spill] sm:$0xff]  ;;  %v12701_v60 = vld [vmem:[#allocation31_spill] sm:$0xff] }
0x12bd   : > { %v8006_v12 = vadd.f32 %v8005_v53, %v8004_v23  ;;  %v12700_v23 = vld [vmem:[#allocation30_spill] sm:$0xff]  ;;  %v12703_v53 = vld [vmem:[#allocation32_spill] sm:$0xff] }
0x12be   : > { %v5828_v2 = vadd.f32 %v7971_v21, %v5756_v10  ;;  %v12702_v21 = vld [vmem:[#allocation38_spill] sm:$0xff]  ;;  %v12704_v10 = vld [vmem:[#allocation33_spill] sm:$0xff] }
0x12c0   : > { %v5898_v41 = vadd.f32 %v8006_v12, %v5828_v2  ;;  %v12705_v12 = vld [vmem:[#allocation40_spill] sm:$0xff]  ;;  %v12706_v2 = vld [vmem:[#allocation42_spill] sm:$0xff] }
0x12ca   : > { %v5967_v59 = vpop.f32.mrb[54].mxu0 }
0x12cb   : > { %v5968_v46 = vadd.f32 %v5967_v59, %v5898_v41  ;;  %v8608_v37 = vpop.f32.mrb[55].mxu0  ;;  %v12707_v41 = vld [vmem:[#allocation34_spill] sm:$0xff]  ;;  %v12708_v59 = vld [vmem:[#allocation35_spill] sm:$0xff] }
0x12cc   : > { %v12710_v37 = vld [vmem:[#allocation5_spill] sm:$0xff] }
0x12cd   : > { %v5972_v36 = vmul.f32 0.044715, %v5968_v46  ;;  %v5971_v62 = vmul.f32 0.5, %v5968_v46 }
0x12cf   : > { %v5973_v16 = vmul.f32 %v5972_v36, %v5968_v46  ;;  %v12711_v36 = vld [vmem:[#allocation36_spill] sm:$0xff] }
0x12d1   : > { %v5974_v39 = vmul.f32 %v5973_v16, %v5968_v46  ;;  %v12712_v16 = vld [vmem:[#allocation37_spill] sm:$0xff] }
0x12d3   : > { %v5975_v0 = vadd.f32 %v5974_v39, %v5968_v46  ;;  %v12709_v46 = vld [vmem:[#allocation44_spill] sm:$0xff]  ;;  %v12713_v39 = vld [vmem:[#allocation39_spill] sm:$0xff] }
0x12d5   : > { %v5976_v56 = vmul.f32 0.7978846, %v5975_v0  ;;  %v12714_v0 = vld [vmem:[#allocation41_spill] sm:$0xff] }
0x12d7   : > { %10096 = vtanh.f32 %v5976_v56  ;;  %v12715_v56 = vld [vmem:[#allocation43_spill] sm:$0xff] }
0x12e1   : > { %v10097_v51 = vpop.eup %10096 }
0x12e2   : > { %v5978_v1 = vadd.f32 1.0, %v10097_v51  ;;  %v12716_v51 = vld [vmem:[#allocation45_spill] sm:$0xff] }
0x12e4   : > { %v5979_v49 = vmul.f32 %v5978_v1, %v5971_v62  ;;  %v12717_v62 = vld [vmem:[#allocation46_spill] sm:$0xff] }
0x12e6   : > { %7180 = vmatmul.mubr.msk.f32.vlgmr.msra.gmra.mrb[62].mxu1 %vm411_vm0, %v5979_v49  ;;  %7181 = vmatmul.mubr.msk.f32.vlgmr.msra.gmra.mrb[56].mxu0 %vm411_vm0, %v5979_v49 }
0x12e7   : > { %9835 = vmatpush3.bf16.msra.mxu1 %v12646_v4  ;;  %8625 = vmatprep.mubr.msk.f32.mxu1 %vm10145_vm1, %v12493_v11 }
0x12e8   : > { %9836 = vmatprep.subr.bf16.mxu1 %v12492_v58  ;;  %9848 = vmatpush3.bf16.msra.mxu0 %v12560_v48 }
0x12e9   : > { %9850 = vmatprep.subr.bf16.mxu0 %v12561_v43 }
0x12eb   : > { %9838 = vmatpush3.bf16.msra.mxu1 %v12649_v47 }
0x12ec   : > { %9839 = vmatprep.subr.bf16.mxu1 %v12492_v58  ;;  %9852 = vmatpush3.bf16.msra.mxu0 %v12564_v45  ;;  %v6260_v45 = vld [vmem:[%s12284_s1 + $0x4b0] sm:$0x3] }
0x12ed   : > { %9854 = vmatprep.subr.bf16.mxu0 %v12565_v6  ;;  %v6226_v6 = vld [vmem:[%s12284_s1 + $0x490] sm:$0x3] }
0x12ef   : > { %9841 = vmatpush3.bf16.msra.mxu1 %v12652_v52 }
0x12f0   : > { %9842 = vmatprep.subr.bf16.mxu1 %v12492_v58  ;;  %9856 = vmatpush3.bf16.msra.mxu0 %v12613_v14 }
0x12f1   : > { %9858 = vmatprep.subr.bf16.mxu0 %v12614_v38 }
0x12f3   : > { %9844 = vmatpush3.bf16.msra.mxu1 %v12655_v3 }
0x12f4   : > { %9878 = vmatprep.subr.bf16.mxu1 %v12692_v54  ;;  %9860 = vmatpush3.bf16.msra.mxu0 %v12693_v33 }
0x12f5   : > { %9862 = vmatprep.subr.bf16.mxu0 %v12694_v5 }
0x12f6   : > { %8626 = vmatmul.mubr.msk.f32.vlgmr.msra.gmra.mrb[64].mxu1 %vm411_vm0, %v5979_v49  ;;  %v6195_v49 = vld [vmem:[%s12284_s1 + $0x460] sm:$0x3] }
0x12f7   : > { %9880 = vmatpush3.bf16.msra.mxu1 %v12695_v50 }
0x12f8   : > { %9882 = vmatprep.subr.bf16.mxu1 %v12696_v19  ;;  %9864 = vmatpush3.bf16.msra.mxu0 %v12697_v7 }
0x12f9   : > { %9866 = vmatprep.subr.bf16.mxu0 %v12698_v28 }
0x12fb   : > { %9884 = vmatpush3.bf16.msra.mxu1 %v12699_v55 }
0x12fc   : > { %9886 = vmatprep.subr.bf16.mxu1 %v12700_v23  ;;  %9868 = vmatpush3.bf16.msra.mxu0 %v12701_v60  ;;  %v6227_v60 = vld [vmem:[%s12284_s1 + $0x498] sm:$0x3] }
0x12fd   : > { %9870 = vmatprep.subr.bf16.mxu0 %v12702_v21  ;;  %v6197_v21 = vld [vmem:[%s12284_s1 + $0x470] sm:$0x3] }
0x12ff   : > { %9888 = vmatpush3.bf16.msra.mxu1 %v12703_v53 }
0x1300   : > { %9890 = vmatprep.subr.bf16.mxu1 %v12704_v10  ;;  %9872 = vmatpush3.bf16.msra.mxu0 %v12705_v12  ;;  %v6296_v10 = vld [vmem:[%s12284_s1 + $0x4e0] sm:$0x3] }
0x1301   : > { %9874 = vmatprep.subr.bf16.mxu0 %v12706_v2 }
0x1303   : > { %9892 = vmatpush3.bf16.msra.mxu1 %v12707_v41 }
0x1304   : > { %9894 = vmatprep.subr.bf16.mxu1 %v12708_v59  ;;  %9876 = vmatpush3.bf16.msra.mxu0 %v12709_v46 }
0x1305   : > { %9922 = vmatprep.subr.bf16.mxu0 %v12710_v37  ;;  %v6225_v37 = vld [vmem:[%s12284_s1 + $0x488] sm:$0x3] }
0x1307   : > { %9896 = vmatpush3.bf16.msra.mxu1 %v12711_v36 }
0x1308   : > { %9898 = vmatprep.subr.bf16.mxu1 %v12712_v16  ;;  %v6261_v16 = vld [vmem:[%s12284_s1 + $0x4b8] sm:$0x3] }
0x130b   : > { %9900 = vmatpush3.bf16.msra.mxu1 %v12713_v39  ;;  %v6196_v39 = vld [vmem:[%s12284_s1 + $0x468] sm:$0x3] }
0x130c   : > { %9902 = vmatprep.subr.bf16.mxu1 %v12714_v0 }
0x130f   : > { %9904 = vmatpush3.bf16.msra.mxu1 %v12715_v56 }
0x1310   : > { %9906 = vmatprep.subr.bf16.mxu1 %v12716_v51 }
0x1313   : > { %9908 = vmatpush3.bf16.msra.mxu1 %v12717_v62 }
0x1314   : > { %9909 = vmatprep.subr.bf16.mxu1 %v12492_v58 }
0x13b9   : > { %v6049_v1 = vpop.f32.mrb[62].mxu1  ;;  %v6120_v46 = vpop.f32.mrb[56].mxu0 }
0x13ba   : > { %v6203_v2 = vrot.slane %v6049_v1, %v10649_v31  ;;  %v6233_v12 = vrot.slane %v6049_v1, %v10652_v32  ;;  %v6051_v28 = vpop.f32.mrb[63].mxu1  ;;  %v6122_v7 = vpop.f32.mrb[57].mxu0  ;;  %v6211_v62 = vrot.slane %v6120_v46, %v10649_v31  ;;  %v6241_v5 = vrot.slane %v6120_v46, %v10652_v32 }
0x13bb   : > { %v6268_v56 = vrot.slane %v6049_v1, %v12685_v57  ;;  %v6303_v38 = vrot.slane %v6049_v1, %v12686_v61  ;;  %v6237_v1 = vrot.slane %v6051_v28, %v10652_v32  ;;  %v6215_v36 = vrot.slane %v6122_v7, %v10649_v31 }
0x13bc   : > { %v6220_v33 = vmul.f32 %v6203_v2, %v6195_v49  ;;  %v6250_v51 = vmul.f32 %v6233_v12, %v6225_v37  ;;  %v6222_v14 = vmul.f32 %v6211_v62, %v6197_v21  ;;  %v6252_v0 = vmul.f32 %v6241_v5, %v6227_v60  ;;  %v6198_v60 = vld [vmem:[%s12284_s1 + $0x478] sm:$0x3]  ;;  %v6228_v21 = vld [vmem:[%s12284_s1 + $0x4a0] sm:$0x3] }
0x13bd   : > { %v6276_v12 = vrot.slane %v6120_v46, %v12685_v57  ;;  %v6207_v2 = vrot.slane %v6051_v28, %v10649_v31  ;;  %v6272_v5 = vrot.slane %v6051_v28, %v12685_v57  ;;  %v6262_v37 = vld [vmem:[%s12284_s1 + $0x4c0] sm:$0x3]  ;;  %v6245_v43 = vrot.slane %v6122_v7, %v10652_v32 }
0x13be   : > { %v6255_v62 = vadd.f32 %v6250_v51, %v6220_v33  ;;  %v6257_v49 = vadd.f32 %v6252_v0, %v6222_v14  ;;  %v6251_v59 = vmul.f32 %v6237_v1, %v6226_v6  ;;  %v6307_v41 = vrot.slane %v6051_v28, %v12686_v61  ;;  %v6263_v14 = vld [vmem:[%s12284_s1 + $0x4c8] sm:$0x3]  ;;  %v6295_v6 = vld [vmem:[%s12284_s1 + $0x4d8] sm:$0x3] }
0x13bf   : > { %v6221_v48 = vmul.f32 %v6207_v2, %v6196_v39  ;;  %v6280_v33 = vrot.slane %v6122_v7, %v12685_v57  ;;  %v6285_v0 = vmul.f32 %v6268_v56, %v6260_v45  ;;  %v6223_v51 = vmul.f32 %v6215_v36, %v6198_v60  ;;  %v6298_v45 = vld [vmem:[%s12284_s1 + $0x4f0] sm:$0x3] }
0x13c0   : > { %v6253_v30 = vmul.f32 %v6245_v43, %v6228_v21  ;;  %v6315_v63 = vrot.slane %v6122_v7, %v12686_v61  ;;  %v6287_v28 = vmul.f32 %v6276_v12, %v6262_v37  ;;  %v6311_v39 = vrot.slane %v6120_v46, %v12686_v61  ;;  %v6297_v43 = vld [vmem:[%s12284_s1 + $0x4e8] sm:$0x3] }
0x13c1   : > { %v6286_v2 = vmul.f32 %v6272_v5, %v6261_v16  ;;  %v6256_v1 = vadd.f32 %v6251_v59, %v6221_v48  ;;  %v6288_v7 = vmul.f32 %v6280_v33, %v6263_v14  ;;  %v6290_v56 = vadd.f32 %v6285_v0, %v6255_v62 }
0x13c2   : > { %v6258_v36 = vadd.f32 %v6253_v30, %v6223_v51  ;;  %v6321_v21 = vmul.f32 %v6307_v41, %v6296_v10  ;;  %v6292_v53 = vadd.f32 %v6287_v28, %v6257_v49  ;;  %v6320_v44 = vmul.f32 %v6303_v38, %v6295_v6  ;;  %v6199_v30 = vld [vmem:[%s12284_s1 + $0x480] sm:$0x3]  ;;  %v6229_v10 = vld [vmem:[%s12284_s1 + $0x4a8] sm:$0x3]  ;;  %v6264_v49 = vld [vmem:[%s12284_s1 + $0x4d0] sm:$0x3] }
0x13c3   : > { %v6291_v60 = vadd.f32 %v6286_v2, %v6256_v1  ;;  %v6323_v37 = vmul.f32 %v6315_v63, %v6298_v45  ;;  %v6322_v46 = vmul.f32 %v6311_v39, %v6297_v43 }
0x13c4   : > { %v6293_v12 = vadd.f32 %v6288_v7, %v6258_v36  ;;  %v6325_v59 = vadd.f32 %v6320_v44, %v6290_v56 }
0x13c5   : > { %v6326_v16 = vadd.f32 %v6321_v21, %v6291_v60  ;;  %v6327_v5 = vadd.f32 %v6322_v46, %v6292_v53  ;;  %v12718_v60 = vld [vmem:[#allocation7_spill] sm:$0xff]  ;;  %v12719_v21 = vld [vmem:[#allocation8_spill] sm:$0xff] }
0x13c6   : > { %v6328_v48 = vadd.f32 %v6323_v37, %v6293_v12  ;;  %v12721_v12 = vld [vmem:[#allocation33_spill] sm:$0xff]  ;;  %v12730_v46 = vld [vmem:[#allocation16_spill] sm:$0xff] }
0x13c7   : > { %6403 = vmatprep.mubr.f32.mxu0 %v6326_v16  ;;  %v12729_v37 = vld [vmem:[#allocation37_spill] sm:$0xff] }
0x13c8   : > { %6473 = vmatprep.mubr.f32.mxu1 %v6328_v48  ;;  %6404 = vmatmul.mubr.f32.vlgmr.msra.gmra.mrb[58].mxu0 %v6325_v59  ;;  %v12731_v16 = vld [vmem:[#allocation17_spill] sm:$0xff]  ;;  %v12732_v48 = vld [vmem:[#allocation39_spill] sm:$0xff] }
0x13c9   : > { %v6191_v25 = vpop.f32.mrb[64].mxu1  ;;  %6474 = vmatmul.mubr.f32.vlgmr.msra.gmra.mrb[66].mxu1 %v6327_v5  ;;  %9924 = vmatpush1.bf16.msra.mxu0 %v10251_v8  ;;  %v12733_v59 = vld [vmem:[#allocation41_spill] sm:$0xff]  ;;  %v12734_v5 = vld [vmem:[#allocation19_spill] sm:$0xff] }
0x13ca   : > { %v6219_v38 = vrot.slane %v6191_v25, %v10649_v31  ;;  %v6249_v63 = vrot.slane %v6191_v25, %v10652_v32  ;;  %v8627_v41 = vpop.f32.mrb[65].mxu1  ;;  %9911 = vmatpush3.bf16.msra.mxu1 %v12611_v35  ;;  %8644 = vmatprep.mubr.msk.f32.mxu1 %vm10145_vm1, %v12493_v11  ;;  %v6284_v62 = vrot.slane %v6191_v25, %v12685_v57 }
0x13cb   : > { %9912 = vmatprep.subr.bf16.mxu1 %v12492_v58  ;;  %6626 = vmatprep.mubr.f32.mxu0 %v12493_v11  ;;  %v6319_v8 = vrot.slane %v6191_v25, %v12686_v61  ;;  %v12739_v41 = vld [vmem:[#allocation24_spill] sm:$0xff] }
0x13cc   : > { %v6224_v44 = vmul.f32 %v6219_v38, %v6199_v30  ;;  %v6254_v53 = vmul.f32 %v6249_v63, %v6229_v10  ;;  %9926 = vmatprep.subr.bf16.mxu0 %v10261_v17  ;;  %v6289_v33 = vmul.f32 %v6284_v62, %v6264_v49  ;;  %v6299_v17 = vld [vmem:[%s12284_s1 + $0x4f8] sm:$0x3]  ;;  %v12736_v10 = vld [vmem:[#allocation43_spill] sm:$0xff]  ;;  %v12737_v38 = vld [vmem:[#allocation45_spill] sm:$0xff] }
0x13cd   : > { %9928 = vmatpush1.bf16.msra.mxu0 %v10263_v18  ;;  %v6324_v0 = vmul.f32 %v6319_v8, %v6299_v17  ;;  %v12735_v30 = vld [vmem:[#allocation20_spill] sm:$0xff]  ;;  %v12738_v63 = vld [vmem:[#allocation23_spill] sm:$0xff]  ;;  %v12746_v8 = vld [vmem:[#allocation42_spill] sm:$0xff] }
0x13ce   : > { %9914 = vmatpush3.bf16.msra.mxu1 %v12612_v24  ;;  %v6259_v14 = vadd.f32 %v6254_v53, %v6224_v44  ;;  %9930 = vmatprep.subr.bf16.mxu0 %v10271_v27  ;;  %v12740_v44 = vld [vmem:[#allocation46_spill] sm:$0xff]  ;;  %v12741_v53 = vld [vmem:[#allocation27_spill] sm:$0xff]  ;;  %v12742_v62 = vld [vmem:[#allocation28_spill] sm:$0xff] }
0x13cf   : > { %9915 = vmatprep.subr.bf16.mxu1 %v12492_v58  ;;  %v12743_v49 = vld [vmem:[#allocation31_spill] sm:$0xff]  ;;  %v12747_v17 = vld [vmem:[#allocation44_spill] sm:$0xff] }
0x13d0   : > { %v6294_v57 = vadd.f32 %v6289_v33, %v6259_v14  ;;  %v12744_v14 = vld [vmem:[#allocation38_spill] sm:$0xff]  ;;  %v12745_v33 = vld [vmem:[#allocation40_spill] sm:$0xff] }
0x13d1   : > { %9932 = vmatpush1.bf16.msra.mxu0 %v10280_v34 }
0x13d2   : > { %9917 = vmatpush3.bf16.msra.mxu1 %v10715_v15  ;;  %9934 = vmatprep.subr.bf16.mxu0 %v10288_v40  ;;  %v6329_v18 = vadd.f32 %v6324_v0, %v6294_v57  ;;  %v6774_v0 = vld [vmem:[%s12284_s1 + $0x500] sm:$0x3] }
0x13d3   : > { %9918 = vmatprep.subr.bf16.mxu1 %v12492_v58 }
0x13d5   : > { %9936 = vmatpush1.bf16.msra.mxu0 %v12643_v29 }
0x13d6   : > { %9920 = vmatpush3.bf16.msra.mxu1 %v10733_v42  ;;  %9938 = vmatprep.subr.bf16.mxu0 %v10253_v9 }
0x13d7   : > { %9953 = vmatprep.subr.bf16.mxu1 %v12492_v58 }
0x13d9   : > { %8645 = vmatmul.mubr.msk.f32.vlgmr.msra.gmra.mrb[48].mxu1 %vm411_vm0, %v6329_v18  ;;  %v6804_v18 = vld [vmem:[%s12284_s1 + $0x528] sm:$0x3] }
0x13da   : > { %9955 = vmatpush3.bf16.msra.mxu1 %v12646_v4  ;;  %8663 = vmatprep.mubr.msk.f32.mxu1 %vm10145_vm1, %v12493_v11  ;;  %v6334_v4 = vpop.permute.xlu1 %6333 }
0x13db   : > { %9956 = vmatprep.subr.bf16.mxu1 %v12492_v58 }
0x13de   : > { %9958 = vmatpush3.bf16.msra.mxu1 %v12649_v47  ;;  %v4817_v47 = vpop.permute.xlu0 %4816 }
0x13df   : > { %9959 = vmatprep.subr.bf16.mxu1 %v12492_v58 }
0x13e2   : > { %9961 = vmatpush3.bf16.msra.mxu1 %v12652_v52 }
0x13e3   : > { %9962 = vmatprep.subr.bf16.mxu1 %v12492_v58 }
0x13e6   : > { %9964 = vmatpush3.bf16.msra.mxu1 %v12655_v3 }
0x13e7   : > { %9998 = vmatprep.subr.bf16.mxu1 %v12692_v54 }
0x149b   : > { %v8057_v9 = vpop.f32.mrb[58].mxu0 }
0x149c   : > { %v8092_v27 = vpop.f32.mrb[66].mxu1  ;;  %v8058_v34 = vpop.f32.mrb[59].mxu0 }
0x149d   : > { %v8059_v40 = vadd.f32 %v8058_v34, %v8057_v9  ;;  %v8093_v29 = vpop.f32.mrb[67].mxu1 }
0x149e   : > { %v8094_v61 = vadd.f32 %v8093_v29, %v8092_v27  ;;  %v6775_v29 = vld [vmem:[%s12284_s1 + $0x508] sm:$0x3] }
0x149f   : > { %v6406_v25 = vadd.f32 %v8059_v40, %v6334_v4  ;;  %v6805_v4 = vld [vmem:[%s12284_s1 + $0x530] sm:$0x3] }
0x14a1   : > { %v6476_v51 = vadd.f32 %v8094_v61, %v6406_v25 }
0x14a3   : > { %v10047_v6 = vadd.f32 %v6476_v51, %v4817_v47 }
0x14ac   : > { %v6545_v28 = vpop.f32.mrb[48].mxu1 }
0x14ad   : > { %v10048_v39 = vadd.f32 %v10047_v6, %v6545_v28  ;;  %v8646_v52 = vpop.f32.mrb[49].mxu1 }
0x14af   : > { %v6551_v2 = vmul.f32 0.044715, %v10048_v39  ;;  %v6550_v7 = vmul.f32 0.5, %v10048_v39 }
0x14b1   : > { %v6552_v1 = vmul.f32 %v10048_v39, %v6551_v2 }
0x14b3   : > { %v6553_v45 = vmul.f32 %v10048_v39, %v6552_v1  ;;  %v6778_v1 = vld [vmem:[%s12284_s1 + $0x520] sm:$0x3] }
0x14b5   : > { %v6554_v3 = vadd.f32 %v10048_v39, %v6553_v45 }
0x14b7   : > { %v6555_v43 = vmul.f32 0.7978846, %v6554_v3  ;;  %v6808_v3 = vld [vmem:[%s12284_s1 + $0x548] sm:$0x3] }
0x14b9   : > { %10098 = vtanh.f32 %v6555_v43 }
0x14c3   : > { %v10099_v54 = vpop.eup %10098 }
0x14c4   : > { %v6557_v36 = vadd.f32 1.0, %v10099_v54 }
0x14c6   : > { %v6558_v56 = vmul.f32 %v6557_v36, %v6550_v7 }
0x14c8   : > { %7184 = vmatmul.mubr.msk.f32.vlgmr.msra.gmra.mrb[60].mxu0 %vm411_vm0, %v6558_v56  ;;  %8664 = vmatmul.mubr.msk.f32.vlgmr.msra.gmra.mrb[68].mxu1 %vm411_vm0, %v6558_v56 }
0x14c9   : > { %9940 = vmatpush1.bf16.msra.mxu0 %v10257_v13  ;;  %6697 = vmatprep.mubr.f32.mxu0 %v12493_v11  ;;  %v12720_v13 = vld [vmem:[#allocation32_spill] sm:$0xff] }
0x14ca   : > { %9942 = vmatprep.subr.bf16.mxu0 %v10266_v22  ;;  %10000 = vmatpush3.bf16.msra.mxu1 %v12695_v50  ;;  %v12722_v22 = vld [vmem:[#allocation10_spill] sm:$0xff]  ;;  %v12723_v50 = vld [vmem:[#allocation11_spill] sm:$0xff] }
0x14cb   : > { %10002 = vmatprep.subr.bf16.mxu1 %v12696_v19  ;;  %v12724_v19 = vld [vmem:[#allocation34_spill] sm:$0xff] }
0x14cd   : > { %9944 = vmatpush1.bf16.msra.mxu0 %v10269_v26  ;;  %v12725_v26 = vld [vmem:[#allocation35_spill] sm:$0xff] }
0x14ce   : > { %9946 = vmatprep.subr.bf16.mxu0 %v12687_v20  ;;  %10004 = vmatpush3.bf16.msra.mxu1 %v12699_v55  ;;  %v12726_v20 = vld [vmem:[#allocation13_spill] sm:$0xff]  ;;  %v12727_v55 = vld [vmem:[#allocation14_spill] sm:$0xff] }
0x14cf   : > { %10006 = vmatprep.subr.bf16.mxu1 %v12700_v23  ;;  %v12728_v23 = vld [vmem:[#allocation36_spill] sm:$0xff] }
0x14d1   : > { %9948 = vmatpush1.bf16.msra.mxu0 %v12718_v60  ;;  %v6807_v60 = vld [vmem:[%s12284_s1 + $0x540] sm:$0x3] }
0x14d2   : > { %9950 = vmatprep.subr.bf16.mxu0 %v12719_v21  ;;  %10008 = vmatpush3.bf16.msra.mxu1 %v12720_v13 }
0x14d3   : > { %10010 = vmatprep.subr.bf16.mxu1 %v12721_v12 }
0x14d5   : > { %9952 = vmatpush1.bf16.msra.mxu0 %v12722_v22 }
0x14d6   : > { %9966 = vmatprep.subr.bf16.mxu0 %v12723_v50  ;;  %10012 = vmatpush3.bf16.msra.mxu1 %v12724_v19 }
0x14d7   : > { %10014 = vmatprep.subr.bf16.mxu1 %v12725_v26 }
0x14d8   : > { %7185 = vmatmul.mubr.msk.f32.vlgmr.msra.gmra.mrb[62].mxu0 %vm411_vm0, %v6558_v56  ;;  %v6777_v56 = vld [vmem:[%s12284_s1 + $0x518] sm:$0x3] }
0x14d9   : > { %9968 = vmatpush3.bf16.msra.mxu0 %v12726_v20 }
0x14da   : > { %9970 = vmatprep.subr.bf16.mxu0 %v12727_v55  ;;  %10016 = vmatpush3.bf16.msra.mxu1 %v12728_v23 }
0x14db   : > { %10018 = vmatprep.subr.bf16.mxu1 %v12729_v37 }
0x14dd   : > { %9972 = vmatpush3.bf16.msra.mxu0 %v12730_v46  ;;  %v6843_v46 = vpop.permute.xlu1 %6842 }
0x14de   : > { %9974 = vmatprep.subr.bf16.mxu0 %v12731_v16  ;;  %10020 = vmatpush3.bf16.msra.mxu1 %v12732_v48 }
0x14df   : > { %10022 = vmatprep.subr.bf16.mxu1 %v12733_v59 }
0x14e1   : > { %9976 = vmatpush3.bf16.msra.mxu0 %v12734_v5 }
0x14e2   : > { %9978 = vmatprep.subr.bf16.mxu0 %v12735_v30  ;;  %10024 = vmatpush3.bf16.msra.mxu1 %v12736_v10 }
0x14e3   : > { %10026 = vmatprep.subr.bf16.mxu1 %v12737_v38 }
0x14e5   : > { %9980 = vmatpush3.bf16.msra.mxu0 %v12738_v63 }
0x14e6   : > { %9982 = vmatprep.subr.bf16.mxu0 %v12739_v41  ;;  %10028 = vmatpush3.bf16.msra.mxu1 %v12740_v44 }
0x14e9   : > { %9984 = vmatpush3.bf16.msra.mxu0 %v12741_v53 }
0x14ea   : > { %9986 = vmatprep.subr.bf16.mxu0 %v12742_v62 }
0x14ed   : > { %9988 = vmatpush3.bf16.msra.mxu0 %v12743_v49 }
0x14ee   : > { %9990 = vmatprep.subr.bf16.mxu0 %v12744_v14 }
0x14f1   : > { %9992 = vmatpush3.bf16.msra.mxu0 %v12745_v33 }
0x14f2   : > { %9994 = vmatprep.subr.bf16.mxu0 %v12746_v8 }
0x14f5   : > { %9996 = vmatpush3.bf16.msra.mxu0 %v12747_v17 }
0x14f6   : > { %10029 = vmatprep.subr.bf16.mxu0 %v12492_v58 }
0x159b   : > { %v6628_v57 = vpop.f32.mrb[60].mxu0  ;;  %v6770_v9 = vpop.f32.mrb[68].mxu1 }
0x159c   : > { %v6782_v27 = vrot.slane %v6628_v57, %v10649_v31  ;;  %v6812_v34 = vrot.slane %v6628_v57, %v10652_v32  ;;  %v6630_v40 = vpop.f32.mrb[61].mxu0  ;;  %v8665_v61 = vpop.f32.mrb[69].mxu1  ;;  %v6798_v45 = vrot.slane %v6770_v9, %v10649_v31  ;;  %v6828_v43 = vrot.slane %v6770_v9, %v10652_v32 }
0x159d   : > { %v6786_v25 = vrot.slane %v6630_v40, %v10649_v31  ;;  %v6816_v51 = vrot.slane %v6630_v40, %v10652_v32 }
0x159e   : > { %v6799_v47 = vmul.f32 %v6782_v27, %v6774_v0  ;;  %v6829_v6 = vmul.f32 %v6812_v34, %v6804_v18  ;;  %v6803_v12 = vmul.f32 %v6798_v45, %v6778_v1  ;;  %v6833_v22 = vmul.f32 %v6828_v43, %v6808_v3 }
0x159f   : > { %v6800_v28 = vmul.f32 %v6786_v25, %v6775_v29  ;;  %v6830_v39 = vmul.f32 %v6816_v51, %v6805_v4 }
0x15a0   : > { %v6834_v2 = vadd.f32 %v6829_v6, %v6799_v47  ;;  %v6838_v23 = vadd.f32 %v6833_v22, %v6803_v12 }
0x15a1   : > { %v6835_v52 = vadd.f32 %v6830_v39, %v6800_v28 }
0x15a3   : > { %6912 = vmatprep.mubr.f32.mxu0 %v6835_v52 }
0x15a4   : > { %6913 = vmatmul.mubr.f32.vlgmr.msra.gmra.mrb[64].mxu0 %v6834_v2 }
0x15a5   : > { %10031 = vmatpush3.bf16.msra.mxu0 %v12611_v35  ;;  %8682 = vmatprep.mubr.msk.f32.mxu0 %vm10145_vm1, %v12493_v11  ;;  %v6776_v11 = vld [vmem:[%s12284_s1 + $0x510] sm:$0x3] }
0x15a6   : > { %10032 = vmatprep.subr.bf16.mxu0 %v12492_v58 }
0x15a9   : > { %10034 = vmatpush3.bf16.msra.mxu0 %v12612_v24  ;;  %v6806_v24 = vld [vmem:[%s12284_s1 + $0x538] sm:$0x3] }
0x15aa   : > { %10035 = vmatprep.subr.bf16.mxu0 %v12492_v58 }
0x15ab   : > { %v6699_v35 = vpop.f32.mrb[62].mxu0 }
0x15ac   : > { %v6790_v54 = vrot.slane %v6699_v35, %v10649_v31  ;;  %v6820_v7 = vrot.slane %v6699_v35, %v10652_v32  ;;  %v6701_v36 = vpop.f32.mrb[63].mxu0 }
0x15ad   : > { %v6794_v21 = vrot.slane %v6701_v36, %v10649_v31  ;;  %v6824_v13 = vrot.slane %v6701_v36, %v10652_v32  ;;  %10037 = vmatpush3.bf16.msra.mxu0 %v10715_v15 }
0x15ae   : > { %v6801_v50 = vmul.f32 %v6790_v54, %v6776_v11  ;;  %v6831_v19 = vmul.f32 %v6820_v7, %v6806_v24  ;;  %10038 = vmatprep.subr.bf16.mxu0 %v12492_v58 }
0x15af   : > { %v6802_v26 = vmul.f32 %v6794_v21, %v6777_v56  ;;  %v6832_v20 = vmul.f32 %v6824_v13, %v6807_v60 }
0x15b0   : > { %v6836_v37 = vadd.f32 %v6831_v19, %v6801_v50 }
0x15b1   : > { %10040 = vmatpush3.bf16.msra.mxu0 %v10733_v42  ;;  %v6837_v55 = vadd.f32 %v6832_v20, %v6802_v26 }
0x15b3   : > { %6982 = vmatprep.mubr.f32.mxu1 %v6837_v55 }
0x15b4   : > { %6983 = vmatmul.mubr.f32.vlgmr.msra.gmra.mrb[70].mxu1 %v6836_v37  ;;  %8683 = vmatmul.mubr.msk.f32.vlgmr.msra.gmra.mrb[66].mxu0 %vm411_vm0, %v6838_v23 }
0x1677   : > { %v8145_v31 = vpop.f32.mrb[64].mxu0 }
0x1678   : > { %v8146_v32 = vpop.f32.mrb[65].mxu0 }
0x1679   : > { %v8147_v15 = vadd.f32 %v8146_v32, %v8145_v31 }
0x167b   : > { %v6915_v5 = vadd.f32 %v8147_v15, %v6843_v46 }
0x1687   : > { %v8180_v16 = vpop.f32.mrb[70].mxu1  ;;  %v7054_v48 = vpop.f32.mrb[66].mxu0 }
0x1688   : > { %v8181_v59 = vpop.f32.mrb[71].mxu1  ;;  %v8684_v58 = vpop.f32.mrb[67].mxu0 }
0x1689   : > { %v8182_v30 = vadd.f32 %v8181_v59, %v8180_v16 }
0x168b   : > { %v6985_v10 = vadd.f32 %v8182_v30, %v6915_v5 }
0x168d   : > { %v7055_v42 = vadd.f32 %v7054_v48, %v6985_v10 }
0x168f   : > { %7059 = vst.msk [vmem:[%s369_s30] sm:$0x3] %vm7058_vm6, %v7055_v42 }
0x1690 PF: > { %s21_s13 = sadd.s32 1, %s10138_s13  }
0x1691   : > { %p18_p3 = scmp.ge.s32.totalorder %s21_s13, 4  }
0x1693   :  { %20 = sbr.rel (!%p18_p3) target bundleno = 1 (0x1), region = 95 }
0x169a   :  { %7079 = vsyncpa [#allocation3], 1 }
0x169b   :  { %7081 = vsyncpa [#allocation3 + $0x1], 1 }

</bundles_post_ra>
